<compile_context>
chip_gen: v7x
topology: tpu7x:2x2x1
jax: 0.10.0
libtpu: 0.0.40
codegen_flags: <defaults>
</compile_context>

<pallas_src>
import functools
import math

import jax
import jax.numpy as jnp
from jax.experimental import pallas as pl
from jax.experimental.pallas import tpu as pltpu


def _rgem_kernel(x_ref, o_ref, hpad_ref, *, pr, size):
    # x_ref / o_ref : (1, H, W, CC) -- channels (multiple of 128) on lanes,
    #                  W on sublanes, H on the untiled outer dim.
    # hpad_ref      : (1, H + 2*pad, W, CC) f32 scratch (H-direction reflection pad).
    _, H, W, _ = x_ref.shape
    pad = (size - 1) // 2
    q = 1.0 / pr
    # 0.5 * (acc / size**2)**(1/pr)  ==  exp(q*log(acc) + lc1)
    lc1 = math.log(0.5) - q * math.log(float(size * size))

    def finish(acc, x_part):
        return jnp.exp(q * jnp.log(acc) + lc1) + 0.5 * x_part

    # elementwise x**pr (f32)
    xv = x_ref[...].astype(jnp.float32)
    if pr == 2.5:
        pw = xv * xv * jnp.sqrt(xv)          # 2 VPU muls + 1 EUP sqrt
    elif pr == 2.0:
        pw = xv * xv
    elif pr == 3.0:
        pw = xv * xv * xv
    else:
        pw = jnp.exp(pr * jnp.log(xv))       # assumes x >= 0 (as PyTorch LPPool, frac p)
    del xv  # re-read x_ref at the end; no full-block f32 copy of x kept live

    # ---- reflection pad along H into scratch (dim-1 slices: pure address offsets) ----
    hpad_ref[:, pad:pad + H, :, :] = pw
    for k in range(pad):
        hpad_ref[:, k:k + 1, :, :] = pw[:, pad - k:pad - k + 1, :, :]              # top
        hpad_ref[:, pad + H + k:pad + H + k + 1, :, :] = pw[:, H - 2 - k:H - 1 - k, :, :]

    # ---- pass 1: window sum along H (untiled-dim shifted reads are free offsets) ----
    s = hpad_ref[:, 0:H, :, :]
    for dy in range(1, size):
        s = s + hpad_ref[:, dy:dy + H, :, :]

    # ---- pass 2: window sum along W (sublanes). Interior columns use plain shifted
    #      slices of the value `s` (XLU sublane shifts, no scratch round trip); the
    #      2*pad reflected edge columns are patched below.
    inner = W - 2 * pad
    acc = s[:, :, 0:inner, :]
    for dx in range(1, size):
        acc = acc + s[:, :, dx:dx + inner, :]

    x_int = x_ref[:, :, pad:pad + inner, :].astype(jnp.float32)
    o_ref[:, :, pad:pad + inner, :] = finish(acc, x_int).astype(o_ref.dtype)

    # ---- reflected edge columns along W (2*pad columns; tiny masked column stores) ----
    for j in list(range(pad)) + list(range(W - pad, W)):
        acc_col = None
        for d in range(-pad, pad + 1):
            i = j + d
            i = -i if i < 0 else (2 * (W - 1) - i if i > W - 1 else i)   # reflect
            col = s[:, :, i:i + 1, :]
            acc_col = col if acc_col is None else acc_col + col
        x_col = x_ref[:, :, j:j + 1, :].astype(jnp.float32)
        o_ref[:, :, j:j + 1, :] = finish(acc_col, x_col).astype(o_ref.dtype)


def _vmem_capacity_bytes():
    try:
        return int(getattr(pltpu.get_tpu_info(), "vmem_capacity_bytes", 64 << 20))
    except Exception:
        return 64 << 20   # conservative fallback (v7x-sized)


def _pick_channel_chunk(C, H, W, itemsize, n_batch, vmem_budget):
    """C is a multiple of 128.  Pick the largest x128 divisor of C whose block stays
    near the 1-4 MiB DMA sweet spot and fits the VMEM budget; prefer cc == C (fully
    contiguous per-block DMA) when it fits; force an even program count >= 2 so the
    grid splits across v7x's two TensorCores."""
    per_ch = H * W * itemsize
    # Per-block live footprint ~ 2*in + 2*out double buffers + f32 scratch + f32 temps
    # ~ 10x the f32 block bytes -> size the target block from the budget.
    target = max(1 << 20, min(4 << 20, vmem_budget // 10))
    max_cc = max(128, (target // per_ch) // 128 * 128)
    cc = 128
    d = 128
    while d <= C:
        if C % d == 0 and d <= max_cc:
            cc = d
        d += 128
    if (n_batch * (C // cc)) % 2 != 0 and cc % 256 == 0:
        cc //= 2   # make N*(C//cc) even (>=2) for the 2-TC v7x megacore split
    return cc


def rgem_forward_nhwc(x_nhwc, pr=2.5, size=5):
    """rgem on an NHWC tensor; returns NHWC. Core Pallas path."""
    N, H, W, C = x_nhwc.shape
    size = int(size)
    if size % 2 != 1:
        raise ValueError("rgem Pallas kernel requires an odd pooling `size` "
                         "(even sizes change LPPool2d's output shape).")
    pad = (size - 1) // 2
    if H <= pad or W < size:
        raise ValueError(f"spatial dims too small for size={size}: need H > {pad} and "
                         f"W >= {size}, got H={H}, W={W}")

    # Lane-dense channels: pad C up to a multiple of 128 (per-channel pooling; the
    # zero channels stay exactly 0 and are sliced off below).
    Cp = -(-C // 128) * 128
    if Cp != C:
        x_nhwc = jnp.pad(x_nhwc, ((0, 0), (0, 0), (0, 0), (0, Cp - C)))

    cap = _vmem_capacity_bytes()
    budget = min((cap * 3) // 4, 96 << 20)           # 48 MiB on v7x, 96 MiB on v5e/v6e
    cc = _pick_channel_chunk(Cp, H, W, x_nhwc.dtype.itemsize, N, budget)
    block_f32 = H * W * cc * 4
    vmem_limit = int(min(max(budget, 10 * block_f32), (cap * 15) // 16))
    # TODO(synk): add H-tiling with a (size-1) row halo for very large feature maps
    # whose cc=128 block still exceeds the v7x per-block VMEM budget.

    grid = (N, Cp // cc)
    kernel = functools.partial(_rgem_kernel, pr=float(pr), size=size)

    y = pl.pallas_call(
        kernel,
        out_shape=jax.ShapeDtypeStruct((N, H, W, Cp), x_nhwc.dtype),
        grid=grid,
        in_specs=[pl.BlockSpec((1, H, W, cc), lambda n, c: (n, 0, 0, c))],
        out_specs=pl.BlockSpec((1, H, W, cc), lambda n, c: (n, 0, 0, c)),
        scratch_shapes=[pltpu.VMEM((1, H + 2 * pad, W, cc), jnp.float32)],
        compiler_params=pltpu.CompilerParams(
            dimension_semantics=("parallel", "parallel"),
            vmem_limit_bytes=vmem_limit,
        ),
    )(x_nhwc)

    return y[..., :C] if Cp != C else y


def rgem_forward(x, pr=2.5, size=5):
    """x: (N, C, H, W) float, PyTorch layout. Returns (N, C, H, W).

    The kernel runs on channel-on-lanes (NHWC) blocks; the NCHW<->NHWC transposes
    here are wrapper-side layout plumbing. Pipelines that keep activations in NHWC
    should call rgem_forward_nhwc directly and skip both copies.
    """
    x_nhwc = jnp.transpose(x, (0, 2, 3, 1))
    y_nhwc = rgem_forward_nhwc(x_nhwc, pr=pr, size=size)
    return jnp.transpose(y_nhwc, (0, 3, 1, 2))


def _rgem_reference(x, pr=2.5, size=5):
    # Pure-JAX reference (mirrors the PyTorch module).
    pad = int((size - 1) // 2.0)
    nominater = (size ** 2) ** (1.0 / pr)
    xp = jnp.pad(x / nominater, ((0, 0), (0, 0), (pad, pad), (pad, pad)),
                 mode="reflect")
    pw = jnp.power(xp, pr)
    summed = jax.lax.reduce_window(
        pw, 0.0, jax.lax.add,
        window_dimensions=(1, 1, size, size),
        window_strides=(1, 1, 1, 1),
        padding="VALID",
    )
    return 0.5 * jnp.power(summed, 1.0 / pr) + 0.5 * x


if __name__ == "__main__":
    key = jax.random.PRNGKey(0)
    k1, k2 = jax.random.split(key)

    # Non-negative features (as in the retrieval pipeline this module comes from);
    # LPPool with fractional p is NaN for negative inputs in PyTorch too.

    # 1) spec shape: small channel count (exercises the channel-padding path).
    x1 = jax.random.uniform(k1, (2, 4, 16, 16), dtype=jnp.float32)
    y1 = jax.block_until_ready(rgem_forward(x1))
    r1 = _rgem_reference(x1)
    assert y1.shape == x1.shape and y1.dtype == x1.dtype
    assert jnp.allclose(y1, r1, rtol=1e-4, atol=1e-5), "mismatch vs reference (C=4)"

    # 2) lane-dense path with C a multiple of 128 and C//cc > 1 (chunked index_map).
    x2 = jax.random.uniform(k2, (1, 256, 16, 16), dtype=jnp.float32)
    y2 = jax.block_until_ready(rgem_forward(x2))
    r2 = _rgem_reference(x2)
    assert y2.shape == x2.shape and y2.dtype == x2.dtype
    assert jnp.allclose(y2, r2, rtol=1e-4, atol=1e-5), "mismatch vs reference (C=256)"

    print("KERNEL_OK")
</pallas_src>

<mosaic_0001>
module attributes {stable_mosaic.version = 11 : i64} {
  func.func @_rgem_kernel(%arg0: i32, %arg1: i32, %arg2: memref<1x16x16x128xf32, #tpu.memory_space<vmem>>, %arg3: memref<1x16x16x128xf32, #tpu.memory_space<vmem>>, %arg4: memref<1x20x16x128xf32, #tpu.memory_space<vmem>>) attributes {dimension_semantics = [#tpu.dimension_semantics<parallel>, #tpu.dimension_semantics<parallel>], iteration_bounds = array<i64: 2, 1>, scalar_prefetch = 0 : i64, scratch_operands = 1 : i64, tpu.core_type = #tpu.core_type<tc>, window_params = [{transform_indices = @transform_0, window_bounds = array<i64: 1, 16, 16, 128>}, {transform_indices = @transform_1, window_bounds = array<i64: 1, 16, 16, 128>}]} {
    %c0 = arith.constant 0 : index
    %c0_0 = arith.constant 0 : index
    %c0_1 = arith.constant 0 : index
    %c0_2 = arith.constant 0 : index
    %0 = vector.load %arg2[%c0, %c0_0, %c0_1, %c0_2] : memref<1x16x16x128xf32, #tpu.memory_space<vmem>>, vector<1x16x16x128xf32>
    %1 = arith.mulf %0, %0 : vector<1x16x16x128xf32>
    %2 = math.sqrt %0 : vector<1x16x16x128xf32>
    %3 = arith.mulf %1, %2 : vector<1x16x16x128xf32>
    %c0_3 = arith.constant 0 : index
    %c2 = arith.constant 2 : index
    %c0_4 = arith.constant 0 : index
    %c0_5 = arith.constant 0 : index
    %4 = vector.load %arg4[%c0_3, %c2, %c0_4, %c0_5] : memref<1x20x16x128xf32, #tpu.memory_space<vmem>>, vector<1x16x16x128xf32>
    tpu.vector_store %arg4[%c0_3, %c2, %c0_4, %c0_5], %3 {strides = array<i32>} : memref<1x20x16x128xf32, #tpu.memory_space<vmem>>, vector<1x16x16x128xf32>,
    %5 = vector.extract_strided_slice %3 {offsets = [0, 2, 0, 0], sizes = [1, 1, 16, 128], strides = [1, 1, 1, 1]} : vector<1x16x16x128xf32> to vector<1x1x16x128xf32>
    %c0_6 = arith.constant 0 : index
    %c0_7 = arith.constant 0 : index
    %c0_8 = arith.constant 0 : index
    %c0_9 = arith.constant 0 : index
    %6 = vector.load %arg4[%c0_6, %c0_7, %c0_8, %c0_9] : memref<1x20x16x128xf32, #tpu.memory_space<vmem>>, vector<1x1x16x128xf32>
    tpu.vector_store %arg4[%c0_6, %c0_7, %c0_8, %c0_9], %5 {strides = array<i32>} : memref<1x20x16x128xf32, #tpu.memory_space<vmem>>, vector<1x1x16x128xf32>,
    %7 = vector.extract_strided_slice %3 {offsets = [0, 14, 0, 0], sizes = [1, 1, 16, 128], strides = [1, 1, 1, 1]} : vector<1x16x16x128xf32> to vector<1x1x16x128xf32>
    %c0_10 = arith.constant 0 : index
    %c18 = arith.constant 18 : index
    %c0_11 = arith.constant 0 : index
    %c0_12 = arith.constant 0 : index
    %8 = vector.load %arg4[%c0_10, %c18, %c0_11, %c0_12] : memref<1x20x16x128xf32, #tpu.memory_space<vmem>>, vector<1x1x16x128xf32>
    tpu.vector_store %arg4[%c0_10, %c18, %c0_11, %c0_12], %7 {strides = array<i32>} : memref<1x20x16x128xf32, #tpu.memory_space<vmem>>, vector<1x1x16x128xf32>,
    %9 = vector.extract_strided_slice %3 {offsets = [0, 1, 0, 0], sizes = [1, 1, 16, 128], strides = [1, 1, 1, 1]} : vector<1x16x16x128xf32> to vector<1x1x16x128xf32>
    %c0_13 = arith.constant 0 : index
    %c1 = arith.constant 1 : index
    %c0_14 = arith.constant 0 : index
    %c0_15 = arith.constant 0 : index
    %10 = vector.load %arg4[%c0_13, %c1, %c0_14, %c0_15] : memref<1x20x16x128xf32, #tpu.memory_space<vmem>>, vector<1x1x16x128xf32>
    tpu.vector_store %arg4[%c0_13, %c1, %c0_14, %c0_15], %9 {strides = array<i32>} : memref<1x20x16x128xf32, #tpu.memory_space<vmem>>, vector<1x1x16x128xf32>,
    %11 = vector.extract_strided_slice %3 {offsets = [0, 13, 0, 0], sizes = [1, 1, 16, 128], strides = [1, 1, 1, 1]} : vector<1x16x16x128xf32> to vector<1x1x16x128xf32>
    %c0_16 = arith.constant 0 : index
    %c19 = arith.constant 19 : index
    %c0_17 = arith.constant 0 : index
    %c0_18 = arith.constant 0 : index
    %12 = vector.load %arg4[%c0_16, %c19, %c0_17, %c0_18] : memref<1x20x16x128xf32, #tpu.memory_space<vmem>>, vector<1x1x16x128xf32>
    tpu.vector_store %arg4[%c0_16, %c19, %c0_17, %c0_18], %11 {strides = array<i32>} : memref<1x20x16x128xf32, #tpu.memory_space<vmem>>, vector<1x1x16x128xf32>,
    %c0_19 = arith.constant 0 : index
    %c0_20 = arith.constant 0 : index
    %c0_21 = arith.constant 0 : index
    %c0_22 = arith.constant 0 : index
    %13 = vector.load %arg4[%c0_19, %c0_20, %c0_21, %c0_22] : memref<1x20x16x128xf32, #tpu.memory_space<vmem>>, vector<1x16x16x128xf32>
    %c0_23 = arith.constant 0 : index
    %c1_24 = arith.constant 1 : index
    %c0_25 = arith.constant 0 : index
    %c0_26 = arith.constant 0 : index
    %14 = vector.load %arg4[%c0_23, %c1_24, %c0_25, %c0_26] : memref<1x20x16x128xf32, #tpu.memory_space<vmem>>, vector<1x16x16x128xf32>
    %15 = arith.addf %13, %14 : vector<1x16x16x128xf32>
    %c0_27 = arith.constant 0 : index
    %c2_28 = arith.constant 2 : index
    %c0_29 = arith.constant 0 : index
    %c0_30 = arith.constant 0 : index
    %16 = vector.load %arg4[%c0_27, %c2_28, %c0_29, %c0_30] : memref<1x20x16x128xf32, #tpu.memory_space<vmem>>, vector<1x16x16x128xf32>
    %17 = arith.addf %15, %16 : vector<1x16x16x128xf32>
    %c0_31 = arith.constant 0 : index
    %c3 = arith.constant 3 : index
    %c0_32 = arith.constant 0 : index
    %c0_33 = arith.constant 0 : index
    %18 = vector.load %arg4[%c0_31, %c3, %c0_32, %c0_33] : memref<1x20x16x128xf32, #tpu.memory_space<vmem>>, vector<1x16x16x128xf32>
    %19 = arith.addf %17, %18 : vector<1x16x16x128xf32>
    %c0_34 = arith.constant 0 : index
    %c4 = arith.constant 4 : index
    %c0_35 = arith.constant 0 : index
    %c0_36 = arith.constant 0 : index
    %20 = vector.load %arg4[%c0_34, %c4, %c0_35, %c0_36] : memref<1x20x16x128xf32, #tpu.memory_space<vmem>>, vector<1x16x16x128xf32>
    %21 = arith.addf %19, %20 : vector<1x16x16x128xf32>
    %22 = vector.extract_strided_slice %21 {offsets = [0, 0, 0, 0], sizes = [1, 16, 12, 128], strides = [1, 1, 1, 1]} : vector<1x16x16x128xf32> to vector<1x16x12x128xf32>
    %23 = vector.extract_strided_slice %21 {offsets = [0, 0, 1, 0], sizes = [1, 16, 12, 128], strides = [1, 1, 1, 1]} : vector<1x16x16x128xf32> to vector<1x16x12x128xf32>
    %24 = arith.addf %22, %23 : vector<1x16x12x128xf32>
    %25 = vector.extract_strided_slice %21 {offsets = [0, 0, 2, 0], sizes = [1, 16, 12, 128], strides = [1, 1, 1, 1]} : vector<1x16x16x128xf32> to vector<1x16x12x128xf32>
    %26 = arith.addf %24, %25 : vector<1x16x12x128xf32>
    %27 = vector.extract_strided_slice %21 {offsets = [0, 0, 3, 0], sizes = [1, 16, 12, 128], strides = [1, 1, 1, 1]} : vector<1x16x16x128xf32> to vector<1x16x12x128xf32>
    %28 = arith.addf %26, %27 : vector<1x16x12x128xf32>
    %29 = vector.extract_strided_slice %21 {offsets = [0, 0, 4, 0], sizes = [1, 16, 12, 128], strides = [1, 1, 1, 1]} : vector<1x16x16x128xf32> to vector<1x16x12x128xf32>
    %30 = arith.addf %28, %29 : vector<1x16x12x128xf32>
    %c0_37 = arith.constant 0 : index
    %c0_38 = arith.constant 0 : index
    %c2_39 = arith.constant 2 : index
    %c0_40 = arith.constant 0 : index
    %31 = vector.load %arg2[%c0_37, %c0_38, %c2_39, %c0_40] : memref<1x16x16x128xf32, #tpu.memory_space<vmem>>, vector<1x16x12x128xf32>
    %32 = math.log %30 : vector<1x16x12x128xf32>
    %cst = arith.constant 4.000000e-01 : f32
    %33 = vector.broadcast %cst : f32 to vector<1x16x12x128xf32>
    %34 = arith.mulf %33, %32 : vector<1x16x12x128xf32>
    %cst_41 = arith.constant -1.98069751 : f32
    %35 = vector.broadcast %cst_41 : f32 to vector<1x16x12x128xf32>
    %36 = arith.addf %34, %35 : vector<1x16x12x128xf32>
    %37 = math.exp %36 : vector<1x16x12x128xf32>
    %cst_42 = arith.constant 5.000000e-01 : f32
    %38 = vector.broadcast %cst_42 : f32 to vector<1x16x12x128xf32>
    %39 = arith.mulf %38, %31 : vector<1x16x12x128xf32>
    %40 = arith.addf %37, %39 : vector<1x16x12x128xf32>
    %c0_43 = arith.constant 0 : index
    %c0_44 = arith.constant 0 : index
    %c2_45 = arith.constant 2 : index
    %c0_46 = arith.constant 0 : index
    %41 = vector.load %arg3[%c0_43, %c0_44, %c2_45, %c0_46] : memref<1x16x16x128xf32, #tpu.memory_space<vmem>>, vector<1x16x12x128xf32>
    tpu.vector_store %arg3[%c0_43, %c0_44, %c2_45, %c0_46], %40 {strides = array<i32>} : memref<1x16x16x128xf32, #tpu.memory_space<vmem>>, vector<1x16x12x128xf32>,
    %42 = vector.extract_strided_slice %21 {offsets = [0, 0, 2, 0], sizes = [1, 16, 1, 128], strides = [1, 1, 1, 1]} : vector<1x16x16x128xf32> to vector<1x16x1x128xf32>
    %43 = vector.extract_strided_slice %21 {offsets = [0, 0, 1, 0], sizes = [1, 16, 1, 128], strides = [1, 1, 1, 1]} : vector<1x16x16x128xf32> to vector<1x16x1x128xf32>
    %44 = arith.addf %42, %43 : vector<1x16x1x128xf32>
    %45 = vector.extract_strided_slice %21 {offsets = [0, 0, 0, 0], sizes = [1, 16, 1, 128], strides = [1, 1, 1, 1]} : vector<1x16x16x128xf32> to vector<1x16x1x128xf32>
    %46 = arith.addf %44, %45 : vector<1x16x1x128xf32>
    %47 = vector.extract_strided_slice %21 {offsets = [0, 0, 1, 0], sizes = [1, 16, 1, 128], strides = [1, 1, 1, 1]} : vector<1x16x16x128xf32> to vector<1x16x1x128xf32>
    %48 = arith.addf %46, %47 : vector<1x16x1x128xf32>
    %49 = vector.extract_strided_slice %21 {offsets = [0, 0, 2, 0], sizes = [1, 16, 1, 128], strides = [1, 1, 1, 1]} : vector<1x16x16x128xf32> to vector<1x16x1x128xf32>
    %50 = arith.addf %48, %49 : vector<1x16x1x128xf32>
    %c0_47 = arith.constant 0 : index
    %c0_48 = arith.constant 0 : index
    %c0_49 = arith.constant 0 : index
    %c0_50 = arith.constant 0 : index
    %51 = vector.load %arg2[%c0_47, %c0_48, %c0_49, %c0_50] : memref<1x16x16x128xf32, #tpu.memory_space<vmem>>, vector<1x16x1x128xf32>
    %52 = math.log %50 : vector<1x16x1x128xf32>
    %cst_51 = arith.constant 4.000000e-01 : f32
    %53 = vector.broadcast %cst_51 : f32 to vector<1x16x1x128xf32>
    %54 = arith.mulf %53, %52 : vector<1x16x1x128xf32>
    %cst_52 = arith.constant -1.98069751 : f32
    %55 = vector.broadcast %cst_52 : f32 to vector<1x16x1x128xf32>
    %56 = arith.addf %54, %55 : vector<1x16x1x128xf32>
    %57 = math.exp %56 : vector<1x16x1x128xf32>
    %cst_53 = arith.constant 5.000000e-01 : f32
    %58 = vector.broadcast %cst_53 : f32 to vector<1x16x1x128xf32>
    %59 = arith.mulf %58, %51 : vector<1x16x1x128xf32>
    %60 = arith.addf %57, %59 : vector<1x16x1x128xf32>
    %c0_54 = arith.constant 0 : index
    %c0_55 = arith.constant 0 : index
    %c0_56 = arith.constant 0 : index
    %c0_57 = arith.constant 0 : index
    %61 = vector.load %arg3[%c0_54, %c0_55, %c0_56, %c0_57] : memref<1x16x16x128xf32, #tpu.memory_space<vmem>>, vector<1x16x1x128xf32>
    tpu.vector_store %arg3[%c0_54, %c0_55, %c0_56, %c0_57], %60 {strides = array<i32>} : memref<1x16x16x128xf32, #tpu.memory_space<vmem>>, vector<1x16x1x128xf32>,
    %62 = vector.extract_strided_slice %21 {offsets = [0, 0, 1, 0], sizes = [1, 16, 1, 128], strides = [1, 1, 1, 1]} : vector<1x16x16x128xf32> to vector<1x16x1x128xf32>
    %63 = vector.extract_strided_slice %21 {offsets = [0, 0, 0, 0], sizes = [1, 16, 1, 128], strides = [1, 1, 1, 1]} : vector<1x16x16x128xf32> to vector<1x16x1x128xf32>
    %64 = arith.addf %62, %63 : vector<1x16x1x128xf32>
    %65 = vector.extract_strided_slice %21 {offsets = [0, 0, 1, 0], sizes = [1, 16, 1, 128], strides = [1, 1, 1, 1]} : vector<1x16x16x128xf32> to vector<1x16x1x128xf32>
    %66 = arith.addf %64, %65 : vector<1x16x1x128xf32>
    %67 = vector.extract_strided_slice %21 {offsets = [0, 0, 2, 0], sizes = [1, 16, 1, 128], strides = [1, 1, 1, 1]} : vector<1x16x16x128xf32> to vector<1x16x1x128xf32>
    %68 = arith.addf %66, %67 : vector<1x16x1x128xf32>
    %69 = vector.extract_strided_slice %21 {offsets = [0, 0, 3, 0], sizes = [1, 16, 1, 128], strides = [1, 1, 1, 1]} : vector<1x16x16x128xf32> to vector<1x16x1x128xf32>
    %70 = arith.addf %68, %69 : vector<1x16x1x128xf32>
    %c0_58 = arith.constant 0 : index
    %c0_59 = arith.constant 0 : index
    %c1_60 = arith.constant 1 : index
    %c0_61 = arith.constant 0 : index
    %71 = vector.load %arg2[%c0_58, %c0_59, %c1_60, %c0_61] : memref<1x16x16x128xf32, #tpu.memory_space<vmem>>, vector<1x16x1x128xf32>
    %72 = math.log %70 : vector<1x16x1x128xf32>
    %cst_62 = arith.constant 4.000000e-01 : f32
    %73 = vector.broadcast %cst_62 : f32 to vector<1x16x1x128xf32>
    %74 = arith.mulf %73, %72 : vector<1x16x1x128xf32>
    %cst_63 = arith.constant -1.98069751 : f32
    %75 = vector.broadcast %cst_63 : f32 to vector<1x16x1x128xf32>
    %76 = arith.addf %74, %75 : vector<1x16x1x128xf32>
    %77 = math.exp %76 : vector<1x16x1x128xf32>
    %cst_64 = arith.constant 5.000000e-01 : f32
    %78 = vector.broadcast %cst_64 : f32 to vector<1x16x1x128xf32>
    %79 = arith.mulf %78, %71 : vector<1x16x1x128xf32>
    %80 = arith.addf %77, %79 : vector<1x16x1x128xf32>
    %c0_65 = arith.constant 0 : index
    %c0_66 = arith.constant 0 : index
    %c1_67 = arith.constant 1 : index
    %c0_68 = arith.constant 0 : index
    %81 = vector.load %arg3[%c0_65, %c0_66, %c1_67, %c0_68] : memref<1x16x16x128xf32, #tpu.memory_space<vmem>>, vector<1x16x1x128xf32>
    tpu.vector_store %arg3[%c0_65, %c0_66, %c1_67, %c0_68], %80 {strides = array<i32>} : memref<1x16x16x128xf32, #tpu.memory_space<vmem>>, vector<1x16x1x128xf32>,
    %82 = vector.extract_strided_slice %21 {offsets = [0, 0, 12, 0], sizes = [1, 16, 1, 128], strides = [1, 1, 1, 1]} : vector<1x16x16x128xf32> to vector<1x16x1x128xf32>
    %83 = vector.extract_strided_slice %21 {offsets = [0, 0, 13, 0], sizes = [1, 16, 1, 128], strides = [1, 1, 1, 1]} : vector<1x16x16x128xf32> to vector<1x16x1x128xf32>
    %84 = arith.addf %82, %83 : vector<1x16x1x128xf32>
    %85 = vector.extract_strided_slice %21 {offsets = [0, 0, 14, 0], sizes = [1, 16, 1, 128], strides = [1, 1, 1, 1]} : vector<1x16x16x128xf32> to vector<1x16x1x128xf32>
    %86 = arith.addf %84, %85 : vector<1x16x1x128xf32>
    %87 = vector.extract_strided_slice %21 {offsets = [0, 0, 15, 0], sizes = [1, 16, 1, 128], strides = [1, 1, 1, 1]} : vector<1x16x16x128xf32> to vector<1x16x1x128xf32>
    %88 = arith.addf %86, %87 : vector<1x16x1x128xf32>
    %89 = vector.extract_strided_slice %21 {offsets = [0, 0, 14, 0], sizes = [1, 16, 1, 128], strides = [1, 1, 1, 1]} : vector<1x16x16x128xf32> to vector<1x16x1x128xf32>
    %90 = arith.addf %88, %89 : vector<1x16x1x128xf32>
    %c0_69 = arith.constant 0 : index
    %c0_70 = arith.constant 0 : index
    %c14 = arith.constant 14 : index
    %c0_71 = arith.constant 0 : index
    %91 = vector.load %arg2[%c0_69, %c0_70, %c14, %c0_71] : memref<1x16x16x128xf32, #tpu.memory_space<vmem>>, vector<1x16x1x128xf32>
    %92 = math.log %90 : vector<1x16x1x128xf32>
    %cst_72 = arith.constant 4.000000e-01 : f32
    %93 = vector.broadcast %cst_72 : f32 to vector<1x16x1x128xf32>
    %94 = arith.mulf %93, %92 : vector<1x16x1x128xf32>
    %cst_73 = arith.constant -1.98069751 : f32
    %95 = vector.broadcast %cst_73 : f32 to vector<1x16x1x128xf32>
    %96 = arith.addf %94, %95 : vector<1x16x1x128xf32>
    %97 = math.exp %96 : vector<1x16x1x128xf32>
    %cst_74 = arith.constant 5.000000e-01 : f32
    %98 = vector.broadcast %cst_74 : f32 to vector<1x16x1x128xf32>
    %99 = arith.mulf %98, %91 : vector<1x16x1x128xf32>
    %100 = arith.addf %97, %99 : vector<1x16x1x128xf32>
    %c0_75 = arith.constant 0 : index
    %c0_76 = arith.constant 0 : index
    %c14_77 = arith.constant 14 : index
    %c0_78 = arith.constant 0 : index
    %101 = vector.load %arg3[%c0_75, %c0_76, %c14_77, %c0_78] : memref<1x16x16x128xf32, #tpu.memory_space<vmem>>, vector<1x16x1x128xf32>
    tpu.vector_store %arg3[%c0_75, %c0_76, %c14_77, %c0_78], %100 {strides = array<i32>} : memref<1x16x16x128xf32, #tpu.memory_space<vmem>>, vector<1x16x1x128xf32>,
    %102 = vector.extract_strided_slice %21 {offsets = [0, 0, 13, 0], sizes = [1, 16, 1, 128], strides = [1, 1, 1, 1]} : vector<1x16x16x128xf32> to vector<1x16x1x128xf32>
    %103 = vector.extract_strided_slice %21 {offsets = [0, 0, 14, 0], sizes = [1, 16, 1, 128], strides = [1, 1, 1, 1]} : vector<1x16x16x128xf32> to vector<1x16x1x128xf32>
    %104 = arith.addf %102, %103 : vector<1x16x1x128xf32>
    %105 = vector.extract_strided_slice %21 {offsets = [0, 0, 15, 0], sizes = [1, 16, 1, 128], strides = [1, 1, 1, 1]} : vector<1x16x16x128xf32> to vector<1x16x1x128xf32>
    %106 = arith.addf %104, %105 : vector<1x16x1x128xf32>
    %107 = vector.extract_strided_slice %21 {offsets = [0, 0, 14, 0], sizes = [1, 16, 1, 128], strides = [1, 1, 1, 1]} : vector<1x16x16x128xf32> to vector<1x16x1x128xf32>
    %108 = arith.addf %106, %107 : vector<1x16x1x128xf32>
    %109 = vector.extract_strided_slice %21 {offsets = [0, 0, 13, 0], sizes = [1, 16, 1, 128], strides = [1, 1, 1, 1]} : vector<1x16x16x128xf32> to vector<1x16x1x128xf32>
    %110 = arith.addf %108, %109 : vector<1x16x1x128xf32>
    %c0_79 = arith.constant 0 : index
    %c0_80 = arith.constant 0 : index
    %c15 = arith.constant 15 : index
    %c0_81 = arith.constant 0 : index
    %111 = vector.load %arg2[%c0_79, %c0_80, %c15, %c0_81] : memref<1x16x16x128xf32, #tpu.memory_space<vmem>>, vector<1x16x1x128xf32>
    %112 = math.log %110 : vector<1x16x1x128xf32>
    %cst_82 = arith.constant 4.000000e-01 : f32
    %113 = vector.broadcast %cst_82 : f32 to vector<1x16x1x128xf32>
    %114 = arith.mulf %113, %112 : vector<1x16x1x128xf32>
    %cst_83 = arith.constant -1.98069751 : f32
    %115 = vector.broadcast %cst_83 : f32 to vector<1x16x1x128xf32>
    %116 = arith.addf %114, %115 : vector<1x16x1x128xf32>
    %117 = math.exp %116 : vector<1x16x1x128xf32>
    %cst_84 = arith.constant 5.000000e-01 : f32
    %118 = vector.broadcast %cst_84 : f32 to vector<1x16x1x128xf32>
    %119 = arith.mulf %118, %111 : vector<1x16x1x128xf32>
    %120 = arith.addf %117, %119 : vector<1x16x1x128xf32>
    %c0_85 = arith.constant 0 : index
    %c0_86 = arith.constant 0 : index
    %c15_87 = arith.constant 15 : index
    %c0_88 = arith.constant 0 : index
    %121 = vector.load %arg3[%c0_85, %c0_86, %c15_87, %c0_88] : memref<1x16x16x128xf32, #tpu.memory_space<vmem>>, vector<1x16x1x128xf32>
    tpu.vector_store %arg3[%c0_85, %c0_86, %c15_87, %c0_88], %120 {strides = array<i32>} : memref<1x16x16x128xf32, #tpu.memory_space<vmem>>, vector<1x16x1x128xf32>,
    return
  }
  func.func @transform_0(%arg0: i32, %arg1: i32) -> (i32, i32, i32, i32) {
    %c0_i32 = arith.constant 0 : i32
    %c0_i32_0 = arith.constant 0 : i32
    %c0_i32_1 = arith.constant 0 : i32
    return %arg0, %c0_i32, %c0_i32_0, %arg1 : i32, i32, i32, i32
  }
  func.func @transform_1(%arg0: i32, %arg1: i32) -> (i32, i32, i32, i32) {
    %c0_i32 = arith.constant 0 : i32
    %c0_i32_0 = arith.constant 0 : i32
    %c0_i32_1 = arith.constant 0 : i32
    return %arg0, %c0_i32, %c0_i32_0, %arg1 : i32, i32, i32, i32
  }
}

</mosaic_0001>

<bundles_post_ra>
// kernel: tpu_custom_call.1
= control target key start
LH: loop header
LB: loop body
LE: loop exit
PB: predicated region body
PF: predicated region fallthrough
CT: control target
= control target key end

     0   :  { %6 = vsyncpa [#allocation4], 0  ;;  %s5616_s0 = inlined_call_operand.hbm [shape: f32[2,16,16,128], index: 0, kind: input, shape index: {}]   ;;  %s5617_s1 = inlined_call_operand.hbm [shape: f32[2,16,16,128], index: 1, kind: output, shape index: {}]  }
   0x1   :  { %8 = vsyncpa [#allocation4 + $0x1], 0 }
   0x2   :  { %9 = vsyncpa [#allocation5], 0 }
   0x3   :  { %11 = vsyncpa [#allocation5 + $0x1], 0  ;;  %s3459_s6 = smov 0   ;;  %s3461_s7 = smov 0  }
   0x4   :  { %s3463_s8 = smov 0   ;;  %s3465_s9 = smov 0  }
   0x5   :  { %s3467_s10 = smov 0   ;;  %s3469_s11 = smov 0  }
   0x6 LB: > { %s2798_s12 = sadd.s32 4294967295, %s3441_s11   ;;  %s2799_s13 = sadd.s32 4294967294, %s3441_s11   ;;  %s3441_s11 = sphi %s3469_s11, %s17_s11   ;;  %s3437_s10 = sphi %s3467_s10, %s5918_s10   ;;  %s3433_s9 = sphi %s3465_s9, %s5917_s9   ;;  %s3429_s8 = sphi %s3463_s8, %s5916_s8   ;;  %s3425_s7 = sphi %s3461_s7, %s5915_s7   ;;  %s3421_s6 = sphi %s3459_s6, %s5914_s6  }
   0x7   : > { %s29_s14 = sadd.s32 1, %s3437_s10  ;;  %s38_s15 = sadd.s32 1, %s3429_s8 }
   0x8   : > { %p31_p0 = scmp.ge.s32.totalorder %s29_s14, 2  ;;  %p45_p1 = scmp.ne.s32.totalorder %s3429_s8, %s3425_s7 }
   0x9   : > { %p46_p2 = scmp.eq.s32.totalorder %s3441_s11, 0  ;;  %p51_p3 = scmp.ne.s32.totalorder %s3425_s7, %s3421_s6 }
   0xa   : > { %s5920_s14 = smov (%p31_p0, %s29_s14), 0  ;;  %p52_p5 = scmp.eq.s32.totalorder %s2798_s12, 0 }
   0xb   : > { %p3500_p4 = por %p46_p2, %p45_p1  ;;  %s33_s17 = ssub.s32 %s3437_s10, %s5920_s14 }
   0xc   : > { %p77_p6 = scmp.eq.s32.totalorder %s2798_s12, 1  ;;  %p36_p7 = scmp.eq.s32.totalorder %s33_s17, 0 }
   0xd   : > { %p3506_p8 = por %p52_p5, %p51_p3  ;;  %p83_p10 = scmp.eq.s32.totalorder %s2799_s13, 1 }
   0xe   : > { %p3510_p9 = por %p77_p6, %p45_p1  ;;  %p2827_p13 = scmp.lt.s32.totalorder %s3441_s11, 2 }
   0xf   : > { %s3515_s20 = scalar_select %p36_p7, %s3429_s8, %s38_s15  }
  0x10   : > { %s5718_s19 = scalar_select %p3510_p9, 1, 0 }
  0x11   : > { %p3517_p11 = por %p83_p10, %p51_p3  ;;  %s103_s22 = sand.u32 1, %s3429_s8  }
  0x12   : > { %s2802_s23 = sshll.u32 %s103_s22, 8  ;;  %s2813_s24 = sshll.u32 %s3437_s10, 12 }
  0x13   : > { %s5719_s21 = scalar_select %p3517_p11, 1, 0 }
  0x14   : > { %s3528_s27 = scalar_lea.hbm %s5616_s0, %s2813_s24  ;;  %s107_s28 = scalar_lea.vmem [#allocation3], %s2802_s23 }
  0x15   : > { %s115_s29 = sshll.u32 %s107_s28, 4  ;;  %p3534_p0 = pnand %p2827_p13, %p3500_p4  ;;  %s3530_s29 = int_to_ptr.vmem [resolvable:$true] %s115_s29 }
  0x16   : > { %s3539_s2 = scalar_lea.sflag [#allocation4], %s103_s22  ;;  %s3329_s3 = scalar_lea.hbm %s3528_s27, 4096 }
  0x17   : > { %p3330_p2 = scmp.ne.s32.totalorder %s3528_s27, %s3329_s3  ;;  %p3331_p3 = pneg %p3534_p0 }
  0x18   : > { %s3334_s12 = scalar_lea.hbm %s5616_s0, 8192  ;;  %p3335_p4 = scmp.lt.u32.totalorder %s3528_s27, %s5616_s0 }
  0x19   : > { %p3332_p5 = pnand %p3331_p3, %p3330_p2  ;;  %p3336_p7 = scmp.lt.u32.totalorder %s3334_s12, %s3329_s3 }
  0x1a   : > { %p3338_p13 = scmp.lt.u32.totalorder %s3329_s3, %s3528_s27 }
  0x1b   : > { %p3333_p6 = pneg %p3332_p5  ;;  %p3337_p10 = por %p3336_p7, %p3335_p4 }
  0x1d   : > { %p3339_p12 = por %p3338_p13, %p3337_p10 }
  0x1f   : > { %p3340_p1 = pnand %p3339_p12, %p3333_p6 }
  0x21   : > { %3343 = shalt.err (!%p3340_p1)
}
  0x22   : > { %s3344_s16 = scalar_lea.vmem %s3530_s29, 4096  ;;  %s3443_s17 = smov [#allocation3]  }
  0x23   : > { %p3345_p2 = scmp.ne.s32.totalorder %s3530_s29, %s3344_s16  ;;  %s3349_s22 = sshll.u32 %s3443_s17, 4  ;;  %s3350_s22 = int_to_ptr.vmem [resolvable:$false] %s3349_s22 }
  0x24   : > { %s3351_s23 = scalar_lea.vmem %s3350_s22, 8192  ;;  %p3352_p9 = scmp.lt.s32.totalorder %s3530_s29, %s3350_s22 }
  0x25   : > { %p3347_p5 = pnand %p3345_p2, %p3331_p3  ;;  %p3353_p4 = scmp.lt.s32.totalorder %s3351_s23, %s3344_s16 }
  0x27   : > { %p3348_p11 = pneg %p3347_p5  ;;  %p3354_p7 = por %p3353_p4, %p3352_p9 }
  0x29   : > { %p3355_p10 = pnand %p3354_p7, %p3348_p11 }
  0x2b   : > { %3358 = shalt.err (!%p3355_p10)
}
  0x2c   : > { %s3444_s24 = smov 128   ;;  %s3445_s25 = smov 8  }
  0x2d   : > { %2822 = dma.hbm_to_vmem [thread:$0]  (!%p3534_p0), %s3528_s27, 4096, %s3530_s29, %s3539_s2, %s3444_s24, %s3444_s24, %s3445_s25  }
  0x2e   : > { %p123_p12 = scmp.lt.s32.totalorder %s3441_s11, 3  ;;  %p5721_p1 = scmp.ge.s32.totalorder %s3441_s11, 1 }
  0x30   : > { %p124_p3 = pnand %p5721_p1, %p123_p12 }
  0x32   : > { %127 = sbr.rel (%p124_p3) target bundleno = 553 (0x229), region = 24 }
  0x39   : > { %s3571_s26 = sand.u32 1, %s3425_s7  }
  0x3a   : > { %s2806_s28 = sshll.u32 %s3571_s26, 8  ;;  %s130_s3 = scalar_lea.sflag [#allocation4], %s3571_s26 }
  0x3b   : > { %s3577_s4 = scalar_lea.vmem [#allocation3], %s2806_s28 }
  0x3c   : > { %3412 = dma.done.wait (%p3506_p8), %s130_s3, 4096  }
  0x3d   : > { %3414 = vsyncadd (%p3506_p8), %s130_s3, 4294963200  ;;  %v152_v0 = vld [vmem:[%s3577_s4] sm:$0xff]  ;;  %v3585_v1 = vld [vmem:[%s3577_s4 + $0x8] sm:$0xff]  ;;  %s4044_s18 = scalar_lea.vmem [#allocation6], %s2806_s28  ;;  %s2814_s27 = sshll.u32 %s3433_s9, 12 }
  0x3e   : > { %v3588_v2 = vld [vmem:[%s3577_s4 + $0x10] sm:$0xff]  ;;  %2881 = vrsqrt.f32 %v152_v0  ;;  %v3591_v3 = vld [vmem:[%s3577_s4 + $0x18] sm:$0xff]  ;;  %v3594_v4 = vld [vmem:[%s3577_s4 + $0x20] sm:$0xff]  ;;  %v3600_v6 = vmul.f32 %v152_v0, %v152_v0  ;;  %v3604_v7 = vmul.f32 %v3585_v1, %v3585_v1  ;;  %vm218_vm0 = vcmp.eq.f32.partialorder %v152_v0, inf  ;;  %s2713_s29 = sshll.u32 %s4044_s18, 4  ;;  %s5564_s5 = scalar_lea.hbm %s5617_s1, %s2814_s27  ;;  %s5566_s29 = int_to_ptr.vmem [resolvable:$true] %s2713_s29 }
  0x3f   : > { %2883 = vrsqrt.f32 %v3585_v1  ;;  %v3598_v5 = vld [vmem:[%s3577_s4 + $0x28] sm:$0xff]  ;;  %v3609_v8 = vmul.f32 %v3588_v2, %v3588_v2  ;;  %v3613_v9 = vmul.f32 %v3591_v3, %v3591_v3  ;;  %v3617_v10 = vmul.f32 %v3594_v4, %v3594_v4  ;;  %v3626_v12 = vld [vmem:[%s3577_s4 + $0x30] sm:$0xff]  ;;  %v3632_v14 = vld [vmem:[%s3577_s4 + $0x38] sm:$0xff]  ;;  %s2699_s12 = scalar_lea.sflag [#allocation5], %s3571_s26  ;;  %s3359_s13 = scalar_lea.vmem %s5566_s29, 4096 }
  0x40   : > { %2885 = vrsqrt.f32 %v3588_v2  ;;  %v3622_v11 = vmul.f32 %v3598_v5, %v3598_v5  ;;  %vm220_vm1 = vcmp.eq.f32.partialorder %v152_v0, 0.0  ;;  %v221_v13 = vand.u32 2147483648, %v152_v0  ;;  %v3643_v18 = vld [vmem:[%s3577_s4 + $0x40] sm:$0xff]  ;;  %v3650_v20 = vld [vmem:[%s3577_s4 + $0x48] sm:$0xff]  ;;  %v3713_v55 = vld [vmem:[%s3577_s4 + $0x50] sm:$0xff]  ;;  %p3360_p8 = scmp.ne.s32.totalorder %s5566_s29, %s3359_s13  ;;  %p5911_p9 = scmp.ne.s32.totalorder %s5718_s19, 0 }
  0x41   : > { %2887 = vrsqrt.f32 %v3591_v3  ;;  %vm225_vm2 = vcmp.eq.f32.partialorder %v3585_v1, inf  ;;  %vm227_vm3 = vcmp.eq.f32.partialorder %v3585_v1, 0.0  ;;  %v228_v15 = vand.u32 2147483648, %v3585_v1  ;;  %s3446_s9 = smov [#allocation6]  }
  0x42   : > { %2889 = vrsqrt.f32 %v3594_v4  ;;  %vm232_vm4 = vcmp.eq.f32.partialorder %v3588_v2, inf  ;;  %vm234_vm5 = vcmp.eq.f32.partialorder %v3588_v2, 0.0  ;;  %v235_v16 = vand.u32 2147483648, %v3588_v2  ;;  %p3361_p11 = pnand %p3360_p8, %p5911_p9  ;;  %s3363_s15 = sshll.u32 %s3446_s9, 4  ;;  %s3364_s15 = int_to_ptr.vmem [resolvable:$false] %s3363_s15 }
  0x43   : > { %2891 = vrsqrt.f32 %v3598_v5  ;;  %vm239_vm6 = vcmp.eq.f32.partialorder %v3591_v3, inf  ;;  %vm241_vm7 = vcmp.eq.f32.partialorder %v3591_v3, 0.0  ;;  %v242_v17 = vand.u32 2147483648, %v3591_v3  ;;  %s3365_s16 = scalar_lea.vmem %s3364_s15, 8192  ;;  %p3366_p6 = scmp.lt.s32.totalorder %s5566_s29, %s3364_s15 }
  0x44   : > { %2893 = vrsqrt.f32 %v3626_v12  ;;  %vm246_vm8 = vcmp.eq.f32.partialorder %v3594_v4, inf  ;;  %vm248_vm9 = vcmp.eq.f32.partialorder %v3594_v4, 0.0  ;;  %v249_v19 = vand.u32 2147483648, %v3594_v4  ;;  %p3362_p0 = pneg %p3361_p11  ;;  %p3367_p13 = scmp.lt.s32.totalorder %s3365_s16, %s3359_s13 }
  0x45   : > { %2895 = vrsqrt.f32 %v3632_v14  ;;  %vm253_vm10 = vcmp.eq.f32.partialorder %v3598_v5, inf  ;;  %vm255_vm11 = vcmp.eq.f32.partialorder %v3598_v5, 0.0  ;;  %v256_v22 = vand.u32 2147483648, %v3598_v5 }
  0x46   : > { %v3657_v23 = vmul.f32 %v3626_v12, %v3626_v12  ;;  %v3661_v25 = vmul.f32 %v3632_v14, %v3632_v14  ;;  %vm260_vm12 = vcmp.eq.f32.partialorder %v3626_v12, inf  ;;  %2897 = vrsqrt.f32 %v3643_v18  ;;  %p3368_p2 = por %p3367_p13, %p3366_p6 }
  0x47   : > { %vm262_vm13 = vcmp.eq.f32.partialorder %v3626_v12, 0.0  ;;  %v263_v27 = vand.u32 2147483648, %v3626_v12  ;;  %vm267_vm14 = vcmp.eq.f32.partialorder %v3632_v14, inf  ;;  %2899 = vrsqrt.f32 %v3650_v20 }
  0x48   : > { %v2882_v21 = vpop.eup %2881  ;;  %vm269_vm15 = vcmp.eq.f32.partialorder %v3632_v14, 0.0  ;;  %v270_v31 = vand.u32 2147483648, %v3632_v14  ;;  %v3677_v35 = vmul.f32 %v3643_v18, %v3643_v18  ;;  %v3681_v36 = vmul.f32 %v3650_v20, %v3650_v20  ;;  %p3369_p5 = pnand %p3368_p2, %p3362_p0 }
  0x49   : > { %v217_v24 = vmul.f32 %v2882_v21, %v152_v0  ;;  %v2884_v26 = vpop.eup %2883  ;;  %v277_v40 = vand.u32 2147483648, %v3643_v18  ;;  %v284_v54 = vand.u32 2147483648, %v3650_v20  ;;  %2901 = vrsqrt.f32 %v3713_v55 }
  0x4a   : > { %v2886_v28 = vpop.eup %2885  ;;  %v224_v30 = vmul.f32 %v2884_v26, %v3585_v1 }
  0x4b   : > { %v219_v29 = vsel %vm218_vm0, %v152_v0, %v217_v24  ;;  %v2888_v32 = vpop.eup %2887  ;;  %v231_v34 = vmul.f32 %v2886_v28, %v3588_v2  ;;  %vm274_vm0 = vcmp.eq.f32.partialorder %v3643_v18, inf }
  0x4c   : > { %v222_v33 = vsel %vm220_vm1, %v221_v13, %v219_v29  ;;  %v2890_v37 = vpop.eup %2889  ;;  %v226_v38 = vsel %vm225_vm2, %v3585_v1, %v224_v30  ;;  %v238_v39 = vmul.f32 %v2888_v32, %v3591_v3  ;;  %vm276_vm1 = vcmp.eq.f32.partialorder %v3643_v18, 0.0 }
  0x4d   : > { %v2892_v41 = vpop.eup %2891  ;;  %v229_v42 = vsel %vm227_vm3, %v228_v15, %v226_v38  ;;  %v233_v43 = vsel %vm232_vm4, %v3588_v2, %v231_v34  ;;  %v245_v44 = vmul.f32 %v2890_v37, %v3594_v4  ;;  %v440_v45 = vmul.f32 %v222_v33, %v3600_v6 }
  0x4e   : > { %vm281_vm2 = vcmp.eq.f32.partialorder %v3650_v20, inf  ;;  %v236_v46 = vsel %vm234_vm5, %v235_v16, %v233_v43  ;;  %v240_v47 = vsel %vm239_vm6, %v3591_v3, %v238_v39  ;;  %v252_v48 = vmul.f32 %v2892_v41, %v3598_v5  ;;  %v2894_v50 = vpop.eup %2893 }
  0x4f   : > { %v441_v49 = vmul.f32 %v229_v42, %v3604_v7  ;;  %v243_v51 = vsel %vm241_vm7, %v242_v17, %v240_v47  ;;  %v247_v52 = vsel %vm246_vm8, %v3594_v4, %v245_v44  ;;  %v442_v53 = vmul.f32 %v236_v46, %v3609_v8  ;;  %v2896_v56 = vpop.eup %2895 }
  0x50   : > { %v250_v57 = vsel %vm248_vm9, %v249_v19, %v247_v52  ;;  %v254_v58 = vsel %vm253_vm10, %v3598_v5, %v252_v48  ;;  %v443_v59 = vmul.f32 %v243_v51, %v3613_v9  ;;  %v259_v60 = vmul.f32 %v2894_v50, %v3626_v12  ;;  %v2898_v1 = vpop.eup %2897 }
  0x51   : > { %v257_v61 = vsel %vm255_vm11, %v256_v22, %v254_v58  ;;  %v3725_v62 = vmul.f32 %v250_v57, %v3617_v10  ;;  %v266_v63 = vmul.f32 %v2896_v56, %v3632_v14  ;;  %v582_v0 = vadd.f32 %v442_v53, %v440_v45  ;;  %v2900_v5 = vpop.eup %2899 }
  0x52   : > { %v3729_v2 = vmul.f32 %v257_v61, %v3622_v11  ;;  %vm838_vm3 = vcmask 1046528   ;;  %vm951_vm4 = vcmask 1045504   ;;  %vm1064_vm5 = vcmask 1044480  }
  0x53   : > { %v261_v3 = vsel %vm260_vm12, %v3626_v12, %v259_v60  ;;  %v583_v4 = vadd.f32 %v443_v59, %v441_v49  ;;  %v3736_v6 = vadd.f32 %v3725_v62, %v442_v53  ;;  %vm1177_vm6 = vcmask 1043456  }
  0x54   : > { %v264_v7 = vsel %vm262_vm13, %v263_v27, %v261_v3  ;;  %v268_v8 = vsel %vm267_vm14, %v3632_v14, %v266_v63  ;;  %v646_v9 = vadd.f32 %v582_v0, %v442_v53  ;;  %v3744_v10 = vadd.f32 %v3729_v2, %v443_v59 }
  0x55   : > { %v271_v11 = vsel %vm269_vm15, %v270_v31, %v268_v8  ;;  %v3749_v13 = vmul.f32 %v264_v7, %v3657_v23  ;;  %v647_v15 = vadd.f32 %v583_v4, %v443_v59  ;;  %v644_v16 = vadd.f32 %v3736_v6, %v440_v45  ;;  %v2902_v45 = vpop.eup %2901 }
  0x56   : > { %v3753_v12 = vmul.f32 %v271_v11, %v3661_v25  ;;  %v711_v17 = vadd.f32 %v646_v9, %v3725_v62  ;;  %v273_v19 = vmul.f32 %v2898_v1, %v3643_v18  ;;  %vm283_vm7 = vcmp.eq.f32.partialorder %v3650_v20, 0.0 }
  0x57   : > { %v645_v21 = vadd.f32 %v3744_v10, %v441_v49  ;;  %v712_v14 = vadd.f32 %v647_v15, %v3729_v2  ;;  %v280_v22 = vmul.f32 %v2900_v5, %v3650_v20  ;;  %v648_v23 = vadd.f32 %v582_v0, %v3725_v62 }
  0x58   : > { %v709_v24 = vadd.f32 %v644_v16, %v442_v53  ;;  %v3763_v26 = vadd.f32 %v711_v17, %v3749_v13  ;;  %v275_v25 = vsel %vm274_vm0, %v3643_v18, %v273_v19  ;;  %v649_v27 = vadd.f32 %v583_v4, %v3729_v2 }
  0x59   : > { %v710_v28 = vadd.f32 %v645_v21, %v443_v59  ;;  %v3770_v29 = vadd.f32 %v712_v14, %v3753_v12  ;;  %v278_v30 = vsel %vm276_vm1, %v277_v40, %v275_v25  ;;  %v282_v31 = vsel %vm281_vm2, %v3650_v20, %v280_v22 }
  0x5a   : > { %v3778_v32 = vadd.f32 %v709_v24, %v3725_v62  ;;  %v5626_v33 = vrot.slane %v3763_v26, 1  ;;  %v5625_v34 = vrot.slane %v3763_v26, 2  ;;  %v1068_v37 = vrot.slane %v3763_v26, 3 }
  0x5b   : > { %5722 = vst [vmem:[#allocation9_spill] sm:$0xff] %v3770_v29  ;;  %v3784_v38 = vadd.f32 %v710_v28, %v3729_v2  ;;  %v3787_v39 = vrot.slane %v3770_v29, 1  ;;  %v3790_v18 = vrot.slane %v3770_v29, 2  ;;  %v1069_v40 = vrot.slane %v3770_v29, 3 }
  0x5c   : > { %v5628_v41 = vrot.slane %v3778_v32, 1  ;;  %v5627_v42 = vrot.slane %v3778_v32, 2  ;;  %v1065_v43 = vrot.slane %v3778_v32, 3  ;;  %v1178_v44 = vrot.slane %v3778_v32, 4 }
  0x5d   : > { %5723 = vst [vmem:[#allocation10_spill] sm:$0xff] %v3784_v38  ;;  %5724 = vst [vmem:[#allocation11_spill] sm:$0xff] %v3787_v39  ;;  %v3798_v46 = vrot.slane %v3784_v38, 1  ;;  %v3801_v47 = vrot.slane %v3784_v38, 2  ;;  %v1066_v48 = vrot.slane %v3784_v38, 3  ;;  %v1179_v49 = vrot.slane %v3784_v38, 4 }
  0x5e   : > { %v844_v50 = vsel %vm838_vm3, %v5626_v33, %v3787_v39  ;;  %v957_v51 = vsel %vm951_vm4, %v5625_v34, %v3790_v18  ;;  %v1070_v52 = vsel %vm1064_vm5, %v1068_v37, %v1069_v40  ;;  %v1181_v53 = vrot.slane %v3763_v26, 4  ;;  %v1299_v33 = vld [vmem:[%s3577_s4 + $0x4a] sm:$0xf] }
  0x5f   : > { %5725 = vst [vmem:[#allocation12_spill] sm:$0xff] %v3798_v46  ;;  %v841_v56 = vsel %vm838_vm3, %v5628_v41, %v3798_v46  ;;  %v954_v57 = vsel %vm951_vm4, %v5627_v42, %v3801_v47  ;;  %v1067_v58 = vsel %vm1064_vm5, %v1065_v43, %v1066_v48  ;;  %v1180_v59 = vsel %vm1177_vm6, %v1178_v44, %v1179_v49 }
  0x60   : > { %v919_v60 = vadd.f32 %v841_v56, %v3778_v32  ;;  %v920_v61 = vadd.f32 %v3798_v46, %v3784_v38  ;;  %v921_v63 = vadd.f32 %v844_v50, %v3763_v26  ;;  %v1182_v0 = vrot.slane %v3770_v29, 4 }
  0x61   : > { %v922_v1 = vadd.f32 %v3787_v39, %v3770_v29  ;;  %v285_v3 = vsel %vm283_vm7, %v284_v54, %v282_v31  ;;  %v3837_v4 = vmul.f32 %v278_v30, %v3677_v35  ;;  %v713_v5 = vadd.f32 %v648_v23, %v3749_v13  ;;  %v4454_v39 = vld [vmem:[%s3577_s4 + $0xc0] sm:$0xff] }
  0x62   : > { %v1032_v7 = vadd.f32 %v954_v57, %v919_v60  ;;  %v3841_v8 = vadd.f32 %v3801_v47, %v920_v61  ;;  %v1034_v9 = vadd.f32 %v957_v51, %v921_v63  ;;  %v1183_v11 = vsel %vm1177_vm6, %v1181_v53, %v1182_v0  ;;  %v1290_v57 = vld [vmem:[%s3577_s4 + $0x2] sm:$0xff]  ;;  %v1292_v61 = vld [vmem:[%s3577_s4 + $0x12] sm:$0xff] }
  0x63   : > { %v3845_v15 = vadd.f32 %v3790_v18, %v922_v1  ;;  %v3848_v16 = vmul.f32 %v285_v3, %v3681_v36  ;;  %v714_v20 = vadd.f32 %v649_v27, %v3753_v12  ;;  %v3852_v35 = vadd.f32 %v713_v5, %v3837_v4  ;;  %v1293_v3 = vld [vmem:[%s3577_s4 + $0x1a] sm:$0xf] }
  0x64   : > { %5726 = vst [vmem:[#allocation13_spill] sm:$0xff] %v3841_v8  ;;  %v1145_v54 = vadd.f32 %v1067_v58, %v1032_v7  ;;  %v3855_v17 = vadd.f32 %v1066_v48, %v3841_v8  ;;  %v1147_v19 = vadd.f32 %v1070_v52, %v1034_v9  ;;  %v287_v21 = vmul.f32 %v2902_v45, %v3713_v55  ;;  %v1291_v58 = vld [vmem:[%s3577_s4 + $0xa] sm:$0xf] }
  0x65   : > { %5727 = vst [vmem:[#allocation14_spill] sm:$0xff] %v3845_v15  ;;  %v3859_v14 = vadd.f32 %v1069_v40, %v3845_v15  ;;  %v3862_v22 = vadd.f32 %v714_v20, %v3848_v16  ;;  %v5624_v36 = vrot.slane %v3852_v35, 1  ;;  %v5623_v23 = vrot.slane %v3852_v35, 2 }
  0x66   : > { %v1258_v24 = vadd.f32 %v1180_v59, %v1145_v54  ;;  %v1259_v25 = vadd.f32 %v1179_v49, %v3855_v17  ;;  %v1260_v27 = vadd.f32 %v1183_v11, %v1147_v19  ;;  %v1071_v28 = vrot.slane %v3852_v35, 3  ;;  %v3888_v49 = vld [vmem:[%s3577_s4 + $0x58] sm:$0xff]  ;;  %v3914_v11 = vld [vmem:[%s3577_s4 + $0x60] sm:$0xff] }
  0x67   : > { %5728 = vst [vmem:[#allocation15_spill] sm:$0xff] %v3862_v22  ;;  %v1261_v30 = vadd.f32 %v1182_v0, %v3859_v14  ;;  %v3870_v31 = vrot.slane %v3862_v22, 1  ;;  %v3873_v37 = vrot.slane %v3862_v22, 2  ;;  %v1072_v40 = vrot.slane %v3862_v22, 3 }
  0x68   : > { %2903 = vlog2.f32 %v1258_v24  ;;  %v1184_v43 = vrot.slane %v3852_v35, 4  ;;  %vm288_vm8 = vcmp.eq.f32.partialorder %v3713_v55, inf  ;;  %v1185_v48 = vrot.slane %v3862_v22, 4 }
  0x69   : > { %5729 = vst [vmem:[#allocation16_spill] sm:$0xff] %v3870_v31  ;;  %2905 = vlog2.f32 %v1259_v25  ;;  %v847_v44 = vsel %vm838_vm3, %v5624_v36, %v3870_v31  ;;  %v960_v45 = vsel %vm951_vm4, %v5623_v23, %v3873_v37  ;;  %v1073_v51 = vsel %vm1064_vm5, %v1071_v28, %v1072_v40 }
  0x6a   : > { %2907 = vlog2.f32 %v1260_v27  ;;  %v923_v50 = vadd.f32 %v847_v44, %v3852_v35  ;;  %v924_v52 = vadd.f32 %v3870_v31, %v3862_v22  ;;  %v289_v53 = vsel %vm288_vm8, %v3713_v55, %v287_v21 }
  0x6b   : > { %2909 = vlog2.f32 %v1261_v30  ;;  %vm290_vm9 = vcmp.eq.f32.partialorder %v3713_v55, 0.0  ;;  %v291_v56 = vand.u32 2147483648, %v3713_v55  ;;  %v1186_v63 = vsel %vm1177_vm6, %v1184_v43, %v1185_v48  ;;  %v3933_v30 = vld [vmem:[%s3577_s4 + $0x68] sm:$0xff] }
  0x6c   : > { %v1036_v59 = vadd.f32 %v960_v45, %v923_v50  ;;  %v3900_v60 = vadd.f32 %v3873_v37, %v924_v52  ;;  %2911 = vrsqrt.f32 %v3888_v49  ;;  %v194_v0 = vmul.f32 %v3713_v55, %v3713_v55 }
  0x6d   : > { %v650_v1 = vadd.f32 %v3736_v6, %v3749_v13  ;;  %v292_v9 = vsel %vm290_vm9, %v291_v56, %v289_v53  ;;  %v3916_v20 = vmul.f32 0.5, %v1290_v57  ;;  %v3918_v54 = vmul.f32 0.5, %v1291_v58 }
  0x6e   : > { %5730 = vst [vmem:[#allocation17_spill] sm:$0xff] %v3900_v60  ;;  %v1149_v5 = vadd.f32 %v1073_v51, %v1036_v59  ;;  %v3911_v7 = vadd.f32 %v1072_v40, %v3900_v60  ;;  %v3921_v21 = vmul.f32 0.5, %v1292_v61  ;;  %v651_v24 = vadd.f32 %v3744_v10, %v3753_v12 }
  0x6f   : > { %v715_v19 = vadd.f32 %v650_v1, %v3837_v4  ;;  %v3926_v25 = vmul.f32 0.5, %v1293_v3  ;;  %v195_v27 = vmul.f32 %v3888_v49, %v3888_v49  ;;  %v3930_v28 = vmul.f32 %v292_v9, %v194_v0 }
  0x70   : > { %v1262_v55 = vadd.f32 %v1186_v63, %v1149_v5  ;;  %v1263_v6 = vadd.f32 %v1185_v48, %v3911_v7  ;;  %2913 = vrsqrt.f32 %v3914_v11  ;;  %vm295_vm10 = vcmp.eq.f32.partialorder %v3888_v49, inf }
  0x71   : > { %vm297_vm11 = vcmp.eq.f32.partialorder %v3888_v49, 0.0  ;;  %v298_v43 = vand.u32 2147483648, %v3888_v49  ;;  %v3940_v45 = vadd.f32 %v715_v19, %v3930_v28  ;;  %v3944_v48 = vmul.f32 %v3914_v11, %v3914_v11 }
  0x72   : > { %v2904_v40 = vpop.eup %2903  ;;  %2915 = vlog2.f32 %v1262_v55  ;;  %v716_v52 = vadd.f32 %v651_v24, %v3848_v16  ;;  %v3949_v53 = vmul.f32 %v3933_v30, %v3933_v30  ;;  %vm302_vm12 = vcmp.eq.f32.partialorder %v3914_v11, inf }
  0x73   : > { %v2906_v10 = vpop.eup %2905  ;;  %v1323_v44 = vmul.f32 0.6931472, %v2904_v40  ;;  %2917 = vlog2.f32 %v1263_v6  ;;  %vm304_vm13 = vcmp.eq.f32.partialorder %v3914_v11, 0.0  ;;  %v305_v0 = vand.u32 2147483648, %v3914_v11 }
  0x74   : > { %v2908_v50 = vpop.eup %2907  ;;  %v1325_v51 = vmul.f32 0.6931472, %v2906_v10  ;;  %2919 = vrsqrt.f32 %v3933_v30  ;;  %v588_v1 = vadd.f32 %v3749_v13, %v3725_v62  ;;  %v5620_v19 = vrot.slane %v3940_v45, 1 }
  0x75   : > { %v2910_v56 = vpop.eup %2909  ;;  %v1386_v57 = vmul.f32 0.4, %v1323_v44  ;;  %v1327_v58 = vmul.f32 0.6931472, %v2908_v50  ;;  %v5619_v24 = vrot.slane %v3940_v45, 2  ;;  %vm309_vm14 = vcmp.eq.f32.partialorder %v3933_v30, inf }
  0x76   : > { %v2912_v59 = vpop.eup %2911  ;;  %v1387_v61 = vmul.f32 0.4, %v1325_v51  ;;  %v1329_v63 = vmul.f32 0.6931472, %v2910_v56  ;;  %v589_v40 = vadd.f32 %v3753_v12, %v3729_v2  ;;  %v1074_v50 = vrot.slane %v3940_v45, 3 }
  0x77   : > { %v1418_v3 = vadd.f32 -1.9806975, %v1386_v57  ;;  %v1388_v5 = vmul.f32 0.4, %v1327_v58  ;;  %v294_v9 = vmul.f32 %v2912_v59, %v3888_v49  ;;  %vm311_vm15 = vcmp.eq.f32.partialorder %v3933_v30, 0.0 }
  0x78   : > { %v1419_v55 = vadd.f32 -1.9806975, %v1387_v61  ;;  %v1389_v6 = vmul.f32 0.4, %v1329_v63  ;;  %v652_v58 = vadd.f32 %v588_v1, %v3837_v4  ;;  %v1187_v63 = vrot.slane %v3940_v45, 4 }
  0x79   : > { %v1450_v10 = vmul.f32 1.442695, %v1418_v3  ;;  %v1420_v44 = vadd.f32 -1.9806975, %v1388_v5  ;;  %v296_v62 = vsel %vm295_vm10, %v3888_v49, %v294_v9  ;;  %v312_v1 = vand.u32 2147483648, %v3933_v30 }
  0x7a   : > { %v1452_v51 = vmul.f32 1.442695, %v1419_v55  ;;  %v1421_v56 = vadd.f32 -1.9806975, %v1389_v6  ;;  %v299_v57 = vsel %vm297_vm11, %v298_v43, %v296_v62  ;;  %v2914_v59 = vpop.eup %2913  ;;  %v653_v55 = vadd.f32 %v589_v40, %v3848_v16 }
  0x7b   : > { %2921 = vpow2.f32 %v1450_v10  ;;  %v1454_v2 = vmul.f32 1.442695, %v1420_v44  ;;  %v3971_v61 = vmul.f32 %v299_v57, %v195_v27  ;;  %v301_v9 = vmul.f32 %v2914_v59, %v3914_v11 }
  0x7c   : > { %v2916_v3 = vpop.eup %2915  ;;  %2923 = vpow2.f32 %v1452_v51  ;;  %v1456_v5 = vmul.f32 1.442695, %v1421_v56  ;;  %v717_v62 = vadd.f32 %v652_v58, %v3930_v28 }
  0x7d   : > { %v2918_v6 = vpop.eup %2917  ;;  %2925 = vpow2.f32 %v1454_v2  ;;  %v1331_v49 = vmul.f32 0.6931472, %v2916_v3  ;;  %v3977_v43 = vadd.f32 %v716_v52, %v3971_v61  ;;  %v303_v44 = vsel %vm302_vm12, %v3914_v11, %v301_v9 }
  0x7e   : > { %v2920_v27 = vpop.eup %2919  ;;  %2927 = vpow2.f32 %v1456_v5  ;;  %v1333_v10 = vmul.f32 0.6931472, %v2918_v6  ;;  %v306_v59 = vsel %vm304_vm13, %v305_v0, %v303_v44  ;;  %v718_v3 = vadd.f32 %v653_v55, %v3971_v61  ;;  %v3996_v5 = vld [vmem:[%s3577_s4 + $0x70] sm:$0xff] }
  0x7f   : > { %5731 = vst [vmem:[#allocation18_spill] sm:$0xff] %v3977_v43  ;;  %v1390_v51 = vmul.f32 0.4, %v1331_v49  ;;  %v3985_v40 = vrot.slane %v3977_v43, 1  ;;  %v3988_v56 = vrot.slane %v3977_v43, 2  ;;  %v1075_v52 = vrot.slane %v3977_v43, 3 }
  0x80   : > { %v1391_v57 = vmul.f32 0.4, %v1333_v10  ;;  %v308_v2 = vmul.f32 %v2920_v27, %v3933_v30  ;;  %v1188_v11 = vrot.slane %v3977_v43, 4  ;;  %2929 = vrsqrt.f32 %v3996_v5 }
  0x81   : > { %5732 = vst [vmem:[#allocation19_spill] sm:$0xff] %v3985_v40  ;;  %v1422_v58 = vadd.f32 -1.9806975, %v1390_v51  ;;  %v850_v9 = vsel %vm838_vm3, %v5620_v19, %v3985_v40  ;;  %v963_v6 = vsel %vm951_vm4, %v5619_v24, %v3988_v56  ;;  %v1076_v55 = vsel %vm1064_vm5, %v1074_v50, %v1075_v52 }
  0x82   : > { %v1423_v0 = vadd.f32 -1.9806975, %v1391_v57  ;;  %v925_v49 = vadd.f32 %v850_v9, %v3940_v45  ;;  %v926_v27 = vadd.f32 %v3985_v40, %v3977_v43  ;;  %v310_v44 = vsel %vm309_vm14, %v3933_v30, %v308_v2 }
  0x83   : > { %v1458_v10 = vmul.f32 1.442695, %v1422_v58  ;;  %v4015_v51 = vmul.f32 %v306_v59, %v3944_v48  ;;  %v313_v50 = vsel %vm311_vm15, %v312_v1, %v310_v44  ;;  %v1189_v19 = vsel %vm1177_vm6, %v1187_v63, %v1188_v11  ;;  %v1295_v63 = vld [vmem:[%s3577_s4 + $0x2a] sm:$0xf] }
  0x84   : > { %v1460_v24 = vmul.f32 1.442695, %v1423_v0  ;;  %v1038_v57 = vadd.f32 %v963_v6, %v925_v49  ;;  %v4019_v9 = vadd.f32 %v3988_v56, %v926_v27  ;;  %v4025_v48 = vmul.f32 %v313_v50, %v3949_v53  ;;  %v1294_v27 = vld [vmem:[%s3577_s4 + $0x22] sm:$0xff] }
  0x85   : > { %v2922_v58 = vpop.eup %2921  ;;  %2931 = vpow2.f32 %v1458_v10  ;;  %v4028_v59 = vadd.f32 %v717_v62, %v4015_v51  ;;  %vm316_vm0 = vcmp.eq.f32.partialorder %v3996_v5, inf  ;;  %vm318_vm1 = vcmp.eq.f32.partialorder %v3996_v5, 0.0 }
  0x86   : > { %5733 = vst [vmem:[#allocation20_spill] sm:$0xff] %v4019_v9  ;;  %v2924_v2 = vpop.eup %2923  ;;  %v1546_v6 = vadd.f32 %v2922_v58, %v3916_v20  ;;  %2933 = vpow2.f32 %v1460_v24  ;;  %v1151_v0 = vadd.f32 %v1076_v55, %v1038_v57  ;;  %v4032_v49 = vadd.f32 %v1075_v52, %v4019_v9  ;;  %v4060_v58 = vld [vmem:[%s3577_s4 + $0x78] sm:$0xff] }
  0x87   : > { %v2926_v30 = vpop.eup %2925  ;;  %v1547_v1 = vadd.f32 %v2924_v2, %v3918_v54  ;;  %v4038_v53 = vadd.f32 %v718_v3, %v4025_v48  ;;  %v5622_v62 = vrot.slane %v4028_v59, 1  ;;  %v5621_v10 = vrot.slane %v4028_v59, 2 }
  0x88   : > { %5734 = vst [vmem:[#allocation21_spill] sm:$0xff] %v4032_v49  ;;  %v2928_v44 = vpop.eup %2927  ;;  %1578 = vst [vmem:[%s4044_s18 + $0x2] sm:$0xff] %v1546_v6  ;;  %v1548_v20 = vadd.f32 %v2926_v30, %v3921_v21  ;;  %v1264_v54 = vadd.f32 %v1189_v19, %v1151_v0  ;;  %v1265_v24 = vadd.f32 %v1188_v11, %v4032_v49  ;;  %v1077_v52 = vrot.slane %v4028_v59, 3  ;;  %v1296_v0 = vld [vmem:[%s3577_s4 + $0x32] sm:$0xff]  ;;  %v1750_v49 = vld [vmem:[%s3577_s4 + $0xc0] sm:$0x1] }
  0x89   : > { %5735 = vst [vmem:[#allocation22_spill] sm:$0xff] %v4038_v53  ;;  %1579 = vst [vmem:[%s4044_s18 + $0xa] sm:$0xf] %v1547_v1  ;;  %v1549_v3 = vadd.f32 %v2928_v44, %v3926_v25  ;;  %v4053_v55 = vrot.slane %v4038_v53, 1  ;;  %v4056_v57 = vrot.slane %v4038_v53, 2  ;;  %v1078_v50 = vrot.slane %v4038_v53, 3 }
  0x8a   : > { %1580 = vst [vmem:[%s4044_s18 + $0x12] sm:$0xff] %v1548_v20  ;;  %v1518_v21 = vmul.f32 0.5, %v1294_v27  ;;  %v1519_v19 = vmul.f32 0.5, %v1295_v63  ;;  %2935 = vlog2.f32 %v1264_v54  ;;  %v1190_v11 = vrot.slane %v4028_v59, 4  ;;  %v2930_v27 = vpop.eup %2929  ;;  %v1297_v54 = vld [vmem:[%s3577_s4 + $0x3a] sm:$0xf] }
  0x8b   : > { %5736 = vst [vmem:[#allocation23_spill] sm:$0xff] %v4053_v55  ;;  %5737 = vst [vmem:[#allocation24_spill] sm:$0xff] %v4056_v57  ;;  %2937 = vlog2.f32 %v1265_v24  ;;  %v853_v25 = vsel %vm838_vm3, %v5622_v62, %v4053_v55  ;;  %v966_v2 = vsel %vm951_vm4, %v5621_v10, %v4056_v57  ;;  %v1191_v6 = vrot.slane %v4038_v53, 4 }
  0x8c   : > { %1581 = vst [vmem:[%s4044_s18 + $0x1a] sm:$0xf] %v1549_v3  ;;  %v927_v30 = vadd.f32 %v853_v25, %v4028_v59  ;;  %v928_v1 = vadd.f32 %v4053_v55, %v4038_v53  ;;  %2939 = vrsqrt.f32 %v4060_v58  ;;  %v1079_v63 = vsel %vm1064_vm5, %v1077_v52, %v1078_v50  ;;  %v1298_v3 = vld [vmem:[%s3577_s4 + $0x42] sm:$0xff] }
  0x8d   : > { %v319_v44 = vand.u32 2147483648, %v3996_v5  ;;  %v590_v20 = vadd.f32 %v3837_v4, %v3749_v13  ;;  %v315_v10 = vmul.f32 %v2930_v27, %v3996_v5  ;;  %v591_v52 = vadd.f32 %v3848_v16, %v3753_v12 }
  0x8e   : > { %v1040_v24 = vadd.f32 %v966_v2, %v927_v30  ;;  %v4088_v25 = vadd.f32 %v4056_v57, %v928_v1  ;;  %v4093_v23 = vmul.f32 0.5, %v1296_v0  ;;  %v1192_v36 = vsel %vm1177_vm6, %v1190_v11, %v1191_v6  ;;  %v4107_v0 = vld [vmem:[%s3577_s4 + $0x80] sm:$0xff] }
  0x8f   : > { %v2932_v62 = vpop.eup %2931  ;;  %v198_v13 = vmul.f32 %v3996_v5, %v3996_v5  ;;  %v654_v2 = vadd.f32 %v590_v20, %v3930_v28  ;;  %v317_v12 = vsel %vm316_vm0, %v3996_v5, %v315_v10  ;;  %v4109_v42 = vmul.f32 0.5, %v1297_v54 }
  0x90   : > { %5738 = vst [vmem:[#allocation25_spill] sm:$0xff] %v4088_v25  ;;  %v2934_v30 = vpop.eup %2933  ;;  %v1550_v1 = vadd.f32 %v2932_v62, %v1518_v21  ;;  %v1153_v34 = vadd.f32 %v1079_v63, %v1040_v24  ;;  %v4100_v27 = vadd.f32 %v1078_v50, %v4088_v25  ;;  %v4111_v41 = vmul.f32 0.5, %v1298_v3 }
  0x91   : > { %v1551_v11 = vadd.f32 %v2934_v30, %v1519_v19  ;;  %v320_v20 = vsel %vm318_vm1, %v319_v44, %v317_v12  ;;  %v655_v21 = vadd.f32 %v591_v52, %v3971_v61  ;;  %v719_v63 = vadd.f32 %v654_v2, %v4015_v51 }
  0x92   : > { %5739 = vst [vmem:[#allocation26_spill] sm:$0xff] %v4100_v27  ;;  %1582 = vst [vmem:[%s4044_s18 + $0x22] sm:$0xff] %v1550_v1  ;;  %v1266_v62 = vadd.f32 %v1192_v36, %v1153_v34  ;;  %v1267_v50 = vadd.f32 %v1191_v6, %v4100_v27  ;;  %v4120_v10 = vmul.f32 0.5, %v1299_v33  ;;  %v199_v19 = vmul.f32 %v4060_v58, %v4060_v58  ;;  %v4131_v6 = vld [vmem:[%s3577_s4 + $0x88] sm:$0xff] }
  0x93   : > { %1583 = vst [vmem:[%s4044_s18 + $0x2a] sm:$0xf] %v1551_v11  ;;  %vm323_vm2 = vcmp.eq.f32.partialorder %v4060_v58, inf  ;;  %2941 = vrsqrt.f32 %v4107_v0  ;;  %vm325_vm7 = vcmp.eq.f32.partialorder %v4060_v58, 0.0  ;;  %v326_v34 = vand.u32 2147483648, %v4060_v58 }
  0x94   : > { %v2936_v5 = vpop.eup %2935  ;;  %2943 = vlog2.f32 %v1266_v62  ;;  %v4128_v36 = vmul.f32 %v320_v20, %v198_v13  ;;  %v4135_v54 = vmul.f32 %v4107_v0, %v4107_v0  ;;  %v592_v24 = vadd.f32 %v3930_v28, %v3837_v4  ;;  %v4155_v62 = vld [vmem:[%s3577_s4 + $0x90] sm:$0xff] }
  0x95   : > { %v2938_v44 = vpop.eup %2937  ;;  %v1335_v33 = vmul.f32 0.6931472, %v2936_v5  ;;  %2945 = vlog2.f32 %v1267_v50  ;;  %v720_v2 = vadd.f32 %v655_v21, %v4025_v48  ;;  %v4145_v30 = vmul.f32 %v4131_v6, %v4131_v6 }
  0x96   : > { %v2940_v3 = vpop.eup %2939  ;;  %v1337_v52 = vmul.f32 0.6931472, %v2938_v44  ;;  %v4141_v13 = vadd.f32 %v719_v63, %v4128_v36  ;;  %vm330_vm8 = vcmp.eq.f32.partialorder %v4107_v0, inf  ;;  %2947 = vrsqrt.f32 %v4131_v6 }
  0x97   : > { %v1392_v1 = vmul.f32 0.4, %v1335_v33  ;;  %v322_v12 = vmul.f32 %v2940_v3, %v4060_v58  ;;  %vm332_vm9 = vcmp.eq.f32.partialorder %v4107_v0, 0.0  ;;  %v333_v4 = vand.u32 2147483648, %v4107_v0 }
  0x98   : > { %v1393_v11 = vmul.f32 0.4, %v1337_v52  ;;  %v593_v20 = vadd.f32 %v3971_v61, %v3848_v16  ;;  %v656_v5 = vadd.f32 %v592_v24, %v4015_v51  ;;  %vm337_vm10 = vcmp.eq.f32.partialorder %v4131_v6, inf }
  0x99   : > { %v1424_v50 = vadd.f32 -1.9806975, %v1392_v1  ;;  %v324_v21 = vsel %vm323_vm2, %v4060_v58, %v322_v12  ;;  %vm339_vm11 = vcmp.eq.f32.partialorder %v4131_v6, 0.0  ;;  %2949 = vrsqrt.f32 %v4155_v62 }
  0x9a   : > { %v1425_v44 = vadd.f32 -1.9806975, %v1393_v11  ;;  %v327_v33 = vsel %vm325_vm7, %v326_v34, %v324_v21  ;;  %v657_v16 = vadd.f32 %v593_v20, %v4025_v48  ;;  %v1080_v11 = vrot.slane %v4141_v13, 3  ;;  %v4175_v34 = vld [vmem:[%s3577_s4 + $0x98] sm:$0xff] }
  0x9b   : > { %v1462_v52 = vmul.f32 1.442695, %v1424_v50  ;;  %v4167_v1 = vmul.f32 %v327_v33, %v199_v19  ;;  %v1193_v58 = vrot.slane %v4141_v13, 4  ;;  %v4179_v21 = vmul.f32 %v4155_v62, %v4155_v62 }
  0x9c   : > { %v1464_v24 = vmul.f32 1.442695, %v1425_v44  ;;  %v721_v50 = vadd.f32 %v656_v5, %v4128_v36  ;;  %v4187_v44 = vmul.f32 %v4175_v34, %v4175_v34  ;;  %vm344_vm12 = vcmp.eq.f32.partialorder %v4155_v62, inf }
  0x9d   : > { %v2942_v20 = vpop.eup %2941  ;;  %2951 = vpow2.f32 %v1462_v52  ;;  %v4182_v19 = vadd.f32 %v720_v2, %v4167_v1  ;;  %v722_v12 = vadd.f32 %v657_v16, %v4167_v1  ;;  %v5743_v3 = vrot.slane %v4141_v13, 1 }
  0x9e   : > { %v2944_v33 = vpop.eup %2943  ;;  %2953 = vpow2.f32 %v1464_v24  ;;  %v329_v63 = vmul.f32 %v2942_v20, %v4107_v0  ;;  %v5744_v9 = vrot.slane %v4141_v13, 2  ;;  %vm346_vm13 = vcmp.eq.f32.partialorder %v4155_v62, 0.0 }
  0x9f   : > { %5740 = vst [vmem:[#allocation27_spill] sm:$0xff] %v4182_v19  ;;  %v2946_v53 = vpop.eup %2945  ;;  %v1339_v25 = vmul.f32 0.6931472, %v2944_v33  ;;  %v4193_v52 = vrot.slane %v4182_v19, 1  ;;  %v4196_v2 = vrot.slane %v4182_v19, 2  ;;  %v1081_v5 = vrot.slane %v4182_v19, 3 }
  0xa0   : > { %v1341_v55 = vmul.f32 0.6931472, %v2946_v53  ;;  %v1194_v24 = vrot.slane %v4182_v19, 4  ;;  %v331_v16 = vsel %vm330_vm8, %v4107_v0, %v329_v63  ;;  %2955 = vrsqrt.f32 %v4175_v34  ;;  %v2948_v20 = vpop.eup %2947 }
  0xa1   : > { %5741 = vst [vmem:[#allocation28_spill] sm:$0xff] %v4193_v52  ;;  %5742 = vst [vmem:[#allocation29_spill] sm:$0xff] %v4196_v2  ;;  %v1394_v33 = vmul.f32 0.4, %v1339_v25  ;;  %v856_v43 = vsel %vm838_vm3, %v5743_v3, %v4193_v52  ;;  %v969_v53 = vsel %vm951_vm4, %v5744_v9, %v4196_v2  ;;  %v1082_v29 = vsel %vm1064_vm5, %v1080_v11, %v1081_v5 }
  0xa2   : > { %v1395_v22 = vmul.f32 0.4, %v1341_v55  ;;  %v929_v63 = vadd.f32 %v856_v43, %v4141_v13  ;;  %v930_v25 = vadd.f32 %v4193_v52, %v4182_v19  ;;  %v1195_v3 = vsel %vm1177_vm6, %v1193_v58, %v1194_v24 }
  0xa3   : > { %v1426_v60 = vadd.f32 -1.9806975, %v1394_v33  ;;  %v334_v31 = vsel %vm332_vm9, %v333_v4, %v331_v16  ;;  %v336_v9 = vmul.f32 %v2948_v20, %v4131_v6  ;;  %vm351_vm14 = vcmp.eq.f32.partialorder %v4175_v34, inf  ;;  %v2950_v11 = vpop.eup %2949 }
  0xa4   : > { %v1427_v15 = vadd.f32 -1.9806975, %v1395_v22  ;;  %v1042_v40 = vadd.f32 %v969_v53, %v929_v63  ;;  %v4225_v55 = vadd.f32 %v4196_v2, %v930_v25  ;;  %vm353_vm15 = vcmp.eq.f32.partialorder %v4175_v34, 0.0  ;;  %v1746_v2 = vld [vmem:[%s3577_s4 + $0x80] sm:$0x1] }
  0xa5   : > { %v594_v43 = vadd.f32 %v4015_v51, %v3930_v28  ;;  %v1466_v33 = vmul.f32 1.442695, %v1426_v60  ;;  %v338_v0 = vsel %vm337_vm10, %v4131_v6, %v336_v9  ;;  %v4234_v4 = vmul.f32 %v334_v31, %v4135_v54 }
  0xa6   : > { %5745 = vst [vmem:[#allocation30_spill] sm:$0xff] %v4225_v55  ;;  %v595_v22 = vadd.f32 %v4025_v48, %v3971_v61  ;;  %v1468_v58 = vmul.f32 1.442695, %v1427_v15  ;;  %v1155_v16 = vadd.f32 %v1082_v29, %v1042_v40  ;;  %v4239_v20 = vadd.f32 %v1081_v5, %v4225_v55 }
  0xa7   : > { %v5747_v53 = vand.u32 2147483648, %v4131_v6  ;;  %v2952_v28 = vpop.eup %2951  ;;  %2957 = vpow2.f32 %v1466_v33  ;;  %v4249_v31 = vadd.f32 %v721_v50, %v4234_v4  ;;  %v343_v15 = vmul.f32 %v2950_v11, %v4155_v62 }
  0xa8   : > { %5746 = vst [vmem:[#allocation31_spill] sm:$0xff] %v4239_v20  ;;  %v2954_v29 = vpop.eup %2953  ;;  %v1552_v61 = vadd.f32 %v2952_v28, %v4093_v23  ;;  %2959 = vpow2.f32 %v1468_v58  ;;  %v1268_v40 = vadd.f32 %v1195_v3, %v1155_v16  ;;  %v1269_v6 = vadd.f32 %v1194_v24, %v4239_v20 }
  0xa9   : > { %v341_v60 = vsel %vm339_vm11, %v5747_v53, %v338_v0  ;;  %v1553_v54 = vadd.f32 %v2954_v29, %v4109_v42  ;;  %v5641_v50 = vrot.slane %v4249_v31, 2  ;;  %v1083_v9 = vrot.slane %v4249_v31, 3 }
  0xaa   : > { %v4246_v63 = vmul.f32 %v341_v60, %v4145_v30  ;;  %v5642_v30 = vrot.slane %v4249_v31, 1  ;;  %v2956_v25 = vpop.eup %2955  ;;  %1584 = vst [vmem:[%s4044_s18 + $0x32] sm:$0xff] %v1552_v61  ;;  %2961 = vlog2.f32 %v1268_v40  ;;  %v345_v23 = vsel %vm344_vm12, %v4155_v62, %v343_v15 }
  0xab   : > { %v658_v24 = vadd.f32 %v594_v43, %v4128_v36  ;;  %1585 = vst [vmem:[%s4044_s18 + $0x3a] sm:$0xf] %v1553_v54  ;;  %2963 = vlog2.f32 %v1269_v6  ;;  %v1196_v11 = vrot.slane %v4249_v31, 4  ;;  %v5751_v33 = vand.u32 2147483648, %v4155_v62 }
  0xac   : > { %v4256_v5 = vadd.f32 %v722_v12, %v4246_v63  ;;  %v350_v43 = vmul.f32 %v2956_v25, %v4175_v34  ;;  %v659_v58 = vadd.f32 %v595_v22, %v4167_v1  ;;  %v5753_v40 = vand.u32 2147483648, %v4175_v34 }
  0xad   : > { %v348_v0 = vsel %vm346_vm13, %v5751_v33, %v345_v23  ;;  %v723_v54 = vadd.f32 %v658_v24, %v4234_v4  ;;  %vm386_vm12 = vcmp.eq.f32.partialorder %v4454_v39, inf  ;;  %vm388_vm13 = vcmp.eq.f32.partialorder %v4454_v39, 0.0 }
  0xae   : > { %5748 = vst [vmem:[#allocation32_spill] sm:$0xff] %v4256_v5  ;;  %v4268_v42 = vrot.slane %v4256_v5, 1  ;;  %v4271_v12 = vrot.slane %v4256_v5, 2  ;;  %v1084_v3 = vrot.slane %v4256_v5, 3  ;;  %v1197_v60 = vrot.slane %v4256_v5, 4 }
  0xaf   : > { %v352_v22 = vsel %vm351_vm14, %v4175_v34, %v350_v43  ;;  %v4298_v29 = vmul.f32 %v348_v0, %v4179_v21  ;;  %v724_v25 = vadd.f32 %v659_v58, %v4246_v63 }
  0xb0   : > { %5749 = vst [vmem:[#allocation33_spill] sm:$0xff] %v4268_v42  ;;  %5750 = vst [vmem:[#allocation34_spill] sm:$0xff] %v4271_v12  ;;  %v859_v16 = vsel %vm838_vm3, %v5642_v30, %v4268_v42  ;;  %v972_v53 = vsel %vm951_vm4, %v5641_v50, %v4271_v12  ;;  %v932_v62 = vadd.f32 %v4268_v42, %v4256_v5 }
  0xb1   : > { %v931_v28 = vadd.f32 %v859_v16, %v4249_v31  ;;  %v1085_v15 = vsel %vm1064_vm5, %v1083_v9, %v1084_v3  ;;  %v355_v6 = vsel %vm353_vm15, %v5753_v40, %v352_v22  ;;  %v4310_v9 = vld [vmem:[%s3577_s4 + $0xa0] sm:$0xff]  ;;  %v2958_v21 = vpop.eup %2957  ;;  %v1198_v0 = vsel %vm1177_vm6, %v1196_v11, %v1197_v60 }
  0xb2   : > { %v4301_v61 = vadd.f32 %v4271_v12, %v932_v62  ;;  %v4313_v33 = vmul.f32 %v355_v6, %v4187_v44  ;;  %v4320_v34 = vadd.f32 %v723_v54, %v4298_v29  ;;  %v2960_v16 = vpop.eup %2959  ;;  %v1554_v24 = vadd.f32 %v2958_v21, %v4111_v41 }
  0xb3   : > { %v1044_v23 = vadd.f32 %v972_v53, %v931_v28  ;;  %2965 = vrsqrt.f32 %v4310_v9  ;;  %v1555_v44 = vadd.f32 %v2960_v16, %v4120_v10  ;;  %vm358_vm0 = vcmp.eq.f32.partialorder %v4310_v9, inf }
  0xb4   : > { %5752 = vst [vmem:[#allocation35_spill] sm:$0xff] %v4301_v61  ;;  %v4317_v43 = vadd.f32 %v1084_v3, %v4301_v61  ;;  %v4324_v53 = vadd.f32 %v724_v25, %v4313_v33  ;;  %v5640_v3 = vrot.slane %v4320_v34, 1  ;;  %v5643_v62 = vrot.slane %v4320_v34, 2  ;;  %v2962_v28 = vpop.eup %2961  ;;  %1586 = vst [vmem:[%s4044_s18 + $0x42] sm:$0xff] %v1554_v24  ;;  %v1300_v25 = vld [vmem:[%s3577_s4 + $0x52] sm:$0xff] }
  0xb5   : > { %v1157_v58 = vadd.f32 %v1085_v15, %v1044_v23  ;;  %v1086_v40 = vrot.slane %v4320_v34, 3  ;;  %v2964_v10 = vpop.eup %2963  ;;  %1587 = vst [vmem:[%s4044_s18 + $0x4a] sm:$0xf] %v1555_v44  ;;  %v1199_v54 = vrot.slane %v4320_v34, 4  ;;  %v1301_v23 = vld [vmem:[%s3577_s4 + $0x5a] sm:$0xf] }
  0xb6   : > { %5754 = vst [vmem:[#allocation36_spill] sm:$0xff] %v4317_v43  ;;  %5755 = vst [vmem:[#allocation37_spill] sm:$0xff] %v4324_v53  ;;  %v1271_v11 = vadd.f32 %v1197_v60, %v4317_v43  ;;  %v4333_v41 = vrot.slane %v4324_v53, 1  ;;  %v4336_v15 = vrot.slane %v4324_v53, 2  ;;  %v1343_v60 = vmul.f32 0.6931472, %v2962_v28 }
  0xb7   : > { %v1270_v22 = vadd.f32 %v1198_v0, %v1157_v58  ;;  %v1087_v6 = vrot.slane %v4324_v53, 3  ;;  %v1345_v21 = vmul.f32 0.6931472, %v2964_v10  ;;  %v1200_v44 = vrot.slane %v4324_v53, 4  ;;  %v1302_v10 = vld [vmem:[%s3577_s4 + $0x62] sm:$0xff] }
  0xb8   : > { %5756 = vst [vmem:[#allocation38_spill] sm:$0xff] %v4333_v41  ;;  %5757 = vst [vmem:[#allocation39_spill] sm:$0xff] %v4336_v15  ;;  %2967 = vlog2.f32 %v1271_v11  ;;  %v862_v0 = vsel %vm838_vm3, %v5640_v3, %v4333_v41  ;;  %v975_v16 = vsel %vm951_vm4, %v5643_v62, %v4336_v15  ;;  %v1396_v24 = vmul.f32 0.4, %v1343_v60  ;;  %v4355_v11 = vld [vmem:[%s3577_s4 + $0xa8] sm:$0xff] }
  0xb9   : > { %2969 = vlog2.f32 %v1270_v22  ;;  %v933_v58 = vadd.f32 %v862_v0, %v4320_v34  ;;  %v1397_v28 = vmul.f32 0.4, %v1345_v21  ;;  %v1088_v22 = vsel %vm1064_vm5, %v1086_v40, %v1087_v6 }
  0xba   : > { %v934_v3 = vadd.f32 %v4333_v41, %v4324_v53  ;;  %v1428_v50 = vadd.f32 -1.9806975, %v1396_v24  ;;  %v4361_v30 = vmul.f32 0.5, %v1300_v25  ;;  %v4363_v62 = vmul.f32 0.5, %v1301_v23  ;;  %v1303_v23 = vld [vmem:[%s3577_s4 + $0x6a] sm:$0xf] }
  0xbb   : > { %v1046_v60 = vadd.f32 %v975_v16, %v933_v58  ;;  %v1429_v0 = vadd.f32 -1.9806975, %v1397_v28  ;;  %v1201_v5 = vsel %vm1177_vm6, %v1199_v54, %v1200_v44  ;;  %2971 = vrsqrt.f32 %v4355_v11  ;;  %v1304_v41 = vld [vmem:[%s3577_s4 + $0x72] sm:$0xff]  ;;  %v1305_v58 = vld [vmem:[%s3577_s4 + $0x7a] sm:$0xf] }
  0xbc   : > { %v4367_v21 = vadd.f32 %v4336_v15, %v934_v3  ;;  %v1470_v40 = vmul.f32 1.442695, %v1428_v50  ;;  %v4370_v61 = vmul.f32 0.5, %v1302_v10  ;;  %v361_v54 = vand.u32 2147483648, %v4310_v9 }
  0xbd   : > { %v1159_v53 = vadd.f32 %v1088_v22, %v1046_v60  ;;  %v2966_v25 = vpop.eup %2965  ;;  %v1472_v24 = vmul.f32 1.442695, %v1429_v0  ;;  %v596_v3 = vadd.f32 %v4128_v36, %v4015_v51  ;;  %v597_v10 = vadd.f32 %v4167_v1, %v4025_v48  ;;  %v4396_v48 = vld [vmem:[%s3577_s4 + $0xb0] sm:$0xff] }
  0xbe   : > { %5758 = vst [vmem:[#allocation40_spill] sm:$0xff] %v4367_v21  ;;  %v4376_v16 = vadd.f32 %v1087_v6, %v4367_v21  ;;  %2973 = vpow2.f32 %v1470_v40  ;;  %v357_v28 = vmul.f32 %v2966_v25, %v4310_v9  ;;  %vm360_vm1 = vcmp.eq.f32.partialorder %v4310_v9, 0.0 }
  0xbf   : > { %v1272_v50 = vadd.f32 %v1201_v5, %v1159_v53  ;;  %2975 = vpow2.f32 %v1472_v24  ;;  %v660_v6 = vadd.f32 %v596_v3, %v4234_v4  ;;  %v4388_v0 = vmul.f32 0.5, %v1303_v23  ;;  %v4403_v24 = vld [vmem:[%s3577_s4 + $0xb8] sm:$0xff] }
  0xc0   : > { %5759 = vst [vmem:[#allocation41_spill] sm:$0xff] %v4376_v16  ;;  %v1273_v22 = vadd.f32 %v1200_v44, %v4376_v16  ;;  %v4390_v51 = vmul.f32 0.5, %v1304_v41  ;;  %v359_v5 = vsel %vm358_vm0, %v4310_v9, %v357_v28  ;;  %v4398_v44 = vmul.f32 0.5, %v1305_v58  ;;  %v1306_v28 = vld [vmem:[%s3577_s4 + $0x82] sm:$0xff] }
  0xc1   : > { %2977 = vlog2.f32 %v1272_v50  ;;  %v204_v25 = vmul.f32 %v4310_v9, %v4310_v9  ;;  %v205_v41 = vmul.f32 %v4355_v11, %v4355_v11  ;;  %v362_v3 = vsel %vm360_vm1, %v361_v54, %v359_v5 }
  0xc2   : > { %v2968_v60 = vpop.eup %2967  ;;  %2979 = vlog2.f32 %v1273_v22  ;;  %v661_v50 = vadd.f32 %v597_v10, %v4246_v63  ;;  %vm365_vm2 = vcmp.eq.f32.partialorder %v4355_v11, inf  ;;  %v725_v58 = vadd.f32 %v660_v6, %v4298_v29 }
  0xc3   : > { %v2970_v53 = vpop.eup %2969  ;;  %v1349_v40 = vmul.f32 0.6931472, %v2968_v60  ;;  %2981 = vrsqrt.f32 %v4396_v48  ;;  %vm367_vm7 = vcmp.eq.f32.partialorder %v4355_v11, 0.0  ;;  %v368_v60 = vand.u32 2147483648, %v4355_v11 }
  0xc4   : > { %v1347_v23 = vmul.f32 0.6931472, %v2970_v53  ;;  %2983 = vrsqrt.f32 %v4403_v24  ;;  %v4417_v54 = vmul.f32 %v362_v3, %v204_v25  ;;  %v4419_v10 = vmul.f32 0.5, %v1306_v28 }
  0xc5   : > { %v1399_v21 = vmul.f32 0.4, %v1349_v40  ;;  %v2972_v53 = vpop.eup %2971  ;;  %v4423_v5 = vmul.f32 %v4396_v48, %v4396_v48  ;;  %v4429_v42 = vmul.f32 %v4403_v24, %v4403_v24  ;;  %vm372_vm8 = vcmp.eq.f32.partialorder %v4396_v48, inf }
  0xc6   : > { %v1398_v22 = vmul.f32 0.4, %v1347_v23  ;;  %v364_v40 = vmul.f32 %v2972_v53, %v4355_v11  ;;  %v726_v23 = vadd.f32 %v661_v50, %v4313_v33  ;;  %v375_v25 = vand.u32 2147483648, %v4396_v48 }
  0xc7   : > { %v1431_v9 = vadd.f32 -1.9806975, %v1399_v21  ;;  %v4432_v21 = vadd.f32 %v725_v58, %v4417_v54  ;;  %v598_v3 = vadd.f32 %v4234_v4, %v4128_v36  ;;  %vm374_vm9 = vcmp.eq.f32.partialorder %v4396_v48, 0.0 }
  0xc8   : > { %v1430_v6 = vadd.f32 -1.9806975, %v1398_v22  ;;  %v2974_v28 = vpop.eup %2973  ;;  %v366_v50 = vsel %vm365_vm2, %v4355_v11, %v364_v40  ;;  %vm379_vm10 = vcmp.eq.f32.partialorder %v4403_v24, inf  ;;  %v599_v58 = vadd.f32 %v4246_v63, %v4167_v1 }
  0xc9   : > { %v1476_v19 = vmul.f32 1.442695, %v1431_v9  ;;  %v2976_v53 = vpop.eup %2975  ;;  %v1556_v9 = vadd.f32 %v2974_v28, %v4361_v30  ;;  %v369_v36 = vsel %vm367_vm7, %v368_v60, %v366_v50  ;;  %vm381_vm11 = vcmp.eq.f32.partialorder %v4403_v24, 0.0 }
  0xca   : > { %v1474_v22 = vmul.f32 1.442695, %v1430_v6  ;;  %v662_v6 = vadd.f32 %v598_v3, %v4298_v29  ;;  %v1557_v40 = vadd.f32 %v2976_v53, %v4363_v62  ;;  %v4450_v52 = vmul.f32 %v369_v36, %v205_v41 }
  0xcb   : > { %2985 = vpow2.f32 %v1476_v19  ;;  %v2978_v55 = vpop.eup %2977  ;;  %1588 = vst [vmem:[%s4044_s18 + $0x52] sm:$0xff] %v1556_v9  ;;  %v382_v60 = vand.u32 2147483648, %v4403_v24  ;;  %v1089_v41 = vrot.slane %v4432_v21, 3  ;;  %v663_v28 = vadd.f32 %v599_v58, %v4313_v33 }
  0xcc   : > { %2987 = vpow2.f32 %v1474_v22  ;;  %v2980_v1 = vpop.eup %2979  ;;  %v1351_v30 = vmul.f32 0.6931472, %v2978_v55  ;;  %1589 = vst [vmem:[%s4044_s18 + $0x5a] sm:$0xf] %v1557_v40  ;;  %v4462_v62 = vadd.f32 %v726_v23, %v4450_v52  ;;  %v1202_v53 = vrot.slane %v4432_v21, 4 }
  0xcd   : > { %v1353_v3 = vmul.f32 0.6931472, %v2980_v1  ;;  %v2982_v22 = vpop.eup %2981  ;;  %v727_v55 = vadd.f32 %v662_v6, %v4417_v54  ;;  %2989 = vrsqrt.f32 %v4454_v39  ;;  %v5763_v38 = vrot.slane %v4432_v21, 1 }
  0xce   : > { %5760 = vst [vmem:[#allocation42_spill] sm:$0xff] %v4462_v62  ;;  %v1400_v50 = vmul.f32 0.4, %v1351_v30  ;;  %v2984_v9 = vpop.eup %2983  ;;  %v4470_v40 = vrot.slane %v4462_v62, 1  ;;  %v4473_v23 = vrot.slane %v4462_v62, 2  ;;  %v1090_v1 = vrot.slane %v4462_v62, 3 }
  0xcf   : > { %v1401_v36 = vmul.f32 0.4, %v1353_v3  ;;  %v1203_v58 = vrot.slane %v4462_v62, 4  ;;  %v371_v30 = vmul.f32 %v2982_v22, %v4396_v48  ;;  %v378_v19 = vmul.f32 %v2984_v9, %v4403_v24 }
  0xd0   : > { %5761 = vst [vmem:[#allocation43_spill] sm:$0xff] %v4470_v40  ;;  %5762 = vst [vmem:[#allocation44_spill] sm:$0xff] %v4473_v23  ;;  %v1432_v11 = vadd.f32 -1.9806975, %v1400_v50  ;;  %v865_v3 = vsel %vm838_vm3, %v5763_v38, %v4470_v40  ;;  %v5764_v8 = vrot.slane %v4432_v21, 2  ;;  %v728_v50 = vadd.f32 %v663_v28, %v4450_v52 }
  0xd1   : > { %v1433_v6 = vadd.f32 -1.9806975, %v1401_v36  ;;  %v935_v15 = vadd.f32 %v865_v3, %v4432_v21  ;;  %v1091_v22 = vsel %vm1064_vm5, %v1089_v41, %v1090_v1  ;;  %v936_v9 = vadd.f32 %v4470_v40, %v4462_v62  ;;  %v4505_v3 = vld [vmem:[%s3577_s4 + $0xc8] sm:$0xff] }
  0xd2   : > { %v978_v46 = vsel %vm951_vm4, %v5764_v8, %v4473_v23  ;;  %v1478_v16 = vmul.f32 1.442695, %v1432_v11  ;;  %v1204_v43 = vsel %vm1177_vm6, %v1202_v53, %v1203_v58  ;;  %v373_v38 = vsel %vm372_vm8, %v4396_v48, %v371_v30 }
  0xd3   : > { %v1480_v36 = vmul.f32 1.442695, %v1433_v6  ;;  %v380_v8 = vsel %vm379_vm10, %v4403_v24, %v378_v19  ;;  %v1048_v28 = vadd.f32 %v978_v46, %v935_v15  ;;  %v4500_v41 = vadd.f32 %v4473_v23, %v936_v9 }
  0xd4   : > { %2991 = vpow2.f32 %v1478_v16  ;;  %v376_v6 = vsel %vm374_vm9, %v375_v25, %v373_v38  ;;  %v383_v19 = vsel %vm381_vm11, %v382_v60, %v380_v8  ;;  %v1307_v60 = vld [vmem:[%s3577_s4 + $0x8a] sm:$0xf]  ;;  %v600_v8 = vadd.f32 %v4298_v29, %v4234_v4 }
  0xd5   : > { %v2986_v11 = vpop.eup %2985  ;;  %5765 = vst [vmem:[#allocation45_spill] sm:$0xff] %v4500_v41  ;;  %2993 = vpow2.f32 %v1480_v36  ;;  %v4511_v62 = vmul.f32 %v376_v6, %v4423_v5  ;;  %v1161_v15 = vadd.f32 %v1091_v22, %v1048_v28  ;;  %v4515_v16 = vadd.f32 %v1090_v1, %v4500_v41 }
  0xd6   : > { %v2988_v53 = vpop.eup %2987  ;;  %v1559_v30 = vadd.f32 %v2986_v11, %v4388_v0  ;;  %v4518_v48 = vmul.f32 %v383_v19, %v4429_v42  ;;  %2995 = vrsqrt.f32 %v4505_v3  ;;  %v389_v42 = vand.u32 2147483648, %v4454_v39 }
  0xd7   : > { %v1558_v46 = vadd.f32 %v2988_v53, %v4370_v61  ;;  %5766 = vst [vmem:[#allocation46_spill] sm:$0xff] %v4515_v16  ;;  %v4522_v0 = vadd.f32 %v727_v55, %v4511_v62  ;;  %v2990_v24 = vpop.eup %2989  ;;  %v1274_v61 = vadd.f32 %v1204_v43, %v1161_v15  ;;  %v1275_v5 = vadd.f32 %v1203_v58, %v4515_v16 }
  0xd8   : > { %1591 = vst [vmem:[%s4044_s18 + $0x6a] sm:$0xf] %v1559_v30  ;;  %v4530_v25 = vadd.f32 %v728_v50, %v4518_v48  ;;  %v385_v38 = vmul.f32 %v2990_v24, %v4454_v39  ;;  %v4549_v11 = vmul.f32 0.5, %v1307_v60  ;;  %v208_v4 = vmul.f32 %v4454_v39, %v4454_v39 }
  0xd9   : > { %1590 = vst [vmem:[%s4044_s18 + $0x62] sm:$0xff] %v1558_v46  ;;  %v5662_v55 = vrot.slane %v4522_v0, 1  ;;  %v5661_v1 = vrot.slane %v4522_v0, 2  ;;  %v1092_v22 = vrot.slane %v4522_v0, 3  ;;  %v1205_v9 = vrot.slane %v4522_v0, 4 }
  0xda   : > { %5767 = vst [vmem:[#allocation47_spill] sm:$0xff] %v4530_v25  ;;  %2997 = vlog2.f32 %v1274_v61  ;;  %v4539_v36 = vrot.slane %v4530_v25, 1  ;;  %v4542_v43 = vrot.slane %v4530_v25, 2  ;;  %v1093_v58 = vrot.slane %v4530_v25, 3 }
  0xdb   : > { %2999 = vlog2.f32 %v1275_v5  ;;  %v1206_v50 = vrot.slane %v4530_v25, 4  ;;  %v387_v19 = vsel %vm386_vm12, %v4454_v39, %v385_v38  ;;  %v601_v46 = vadd.f32 %v4313_v33, %v4246_v63  ;;  %v1308_v39 = vld [vmem:[%s3577_s4 + $0x92] sm:$0xff] }
  0xdc   : > { %5768 = vst [vmem:[#allocation48_spill] sm:$0xff] %v4539_v36  ;;  %5769 = vst [vmem:[#allocation49_spill] sm:$0xff] %v4542_v43  ;;  %v868_v28 = vsel %vm838_vm3, %v5662_v55, %v4539_v36  ;;  %v981_v6 = vsel %vm951_vm4, %v5661_v1, %v4542_v43  ;;  %v938_v53 = vadd.f32 %v4539_v36, %v4530_v25  ;;  %vm393_vm14 = vcmp.eq.f32.partialorder %v4505_v3, inf }
  0xdd   : > { %v937_v30 = vadd.f32 %v868_v28, %v4522_v0  ;;  %v1094_v24 = vsel %vm1064_vm5, %v1092_v22, %v1093_v58  ;;  %v390_v5 = vsel %vm388_vm13, %v389_v42, %v387_v19  ;;  %v664_v60 = vadd.f32 %v600_v8, %v4417_v54  ;;  %v4581_v22 = vld [vmem:[%s3577_s4 + $0xd0] sm:$0xff]  ;;  %v1309_v8 = vld [vmem:[%s3577_s4 + $0x9a] sm:$0xf] }
  0xde   : > { %v2992_v15 = vpop.eup %2991  ;;  %v4571_v61 = vadd.f32 %v4542_v43, %v938_v53  ;;  %v1207_v55 = vsel %vm1177_vm6, %v1205_v9, %v1206_v50  ;;  %v209_v63 = vmul.f32 %v4505_v3, %v4505_v3  ;;  %v665_v19 = vadd.f32 %v601_v46, %v4450_v52 }
  0xdf   : > { %v2994_v28 = vpop.eup %2993  ;;  %v1560_v1 = vadd.f32 %v2992_v15, %v4390_v51  ;;  %v1050_v38 = vadd.f32 %v981_v6, %v937_v30  ;;  %v729_v51 = vadd.f32 %v664_v60, %v4511_v62  ;;  %v396_v30 = vand.u32 2147483648, %v4505_v3 }
  0xe0   : > { %5770 = vst [vmem:[#allocation50_spill] sm:$0xff] %v4571_v61  ;;  %v1561_v53 = vadd.f32 %v2994_v28, %v4398_v44  ;;  %v4586_v42 = vadd.f32 %v1093_v58, %v4571_v61  ;;  %v2996_v6 = vpop.eup %2995  ;;  %v4594_v15 = vmul.f32 %v390_v5, %v208_v4  ;;  %v1310_v44 = vld [vmem:[%s3577_s4 + $0xa2] sm:$0xff]  ;;  %vm395_vm15 = vcmp.eq.f32.partialorder %v4505_v3, 0.0  ;;  %v4610_v4 = vld [vmem:[%s3577_s4 + $0xd8] sm:$0xff] }
  0xe1   : > { %1592 = vst [vmem:[%s4044_s18 + $0x72] sm:$0xff] %v1560_v1  ;;  %v1163_v9 = vadd.f32 %v1094_v24, %v1050_v38  ;;  %v392_v28 = vmul.f32 %v2996_v6, %v4505_v3  ;;  %3001 = vrsqrt.f32 %v4581_v22  ;;  %v4602_v60 = vmul.f32 0.5, %v1308_v39 }
  0xe2   : > { %5771 = vst [vmem:[#allocation51_spill] sm:$0xff] %v4586_v42  ;;  %1593 = vst [vmem:[%s4044_s18 + $0x7a] sm:$0xf] %v1561_v53  ;;  %v1277_v58 = vadd.f32 %v1206_v50, %v4586_v42  ;;  %v4604_v1 = vmul.f32 0.5, %v1309_v8  ;;  %v4607_v24 = vadd.f32 %v729_v51, %v4594_v15  ;;  %v730_v38 = vadd.f32 %v665_v19, %v4518_v48  ;;  %v4664_v42 = vld [vmem:[%s3577_s4 + $0xe0] sm:$0xff] }
  0xe3   : > { %v1276_v46 = vadd.f32 %v1207_v55, %v1163_v9  ;;  %v394_v50 = vsel %vm393_vm14, %v4505_v3, %v392_v28  ;;  %v4616_v53 = vmul.f32 0.5, %v1310_v44  ;;  %v210_v51 = vmul.f32 %v4581_v22, %v4581_v22 }
  0xe4   : > { %v2998_v5 = vpop.eup %2997  ;;  %3003 = vlog2.f32 %v1277_v58  ;;  %v397_v8 = vsel %vm395_vm15, %v396_v30, %v394_v50  ;;  %v4624_v58 = vmul.f32 %v4610_v4, %v4610_v4  ;;  %vm400_vm0 = vcmp.eq.f32.partialorder %v4581_v22, inf }
  0xe5   : > { %v3000_v55 = vpop.eup %2999  ;;  %v1355_v39 = vmul.f32 0.6931472, %v2998_v5  ;;  %3005 = vlog2.f32 %v1276_v46  ;;  %v4620_v9 = vmul.f32 %v397_v8, %v209_v63  ;;  %vm402_vm1 = vcmp.eq.f32.partialorder %v4581_v22, 0.0 }
  0xe6   : > { %v1357_v6 = vmul.f32 0.6931472, %v3000_v55  ;;  %3007 = vrsqrt.f32 %v4610_v4  ;;  %v602_v28 = vadd.f32 %v4417_v54, %v4298_v29  ;;  %v1095_v5 = vrot.slane %v4607_v24, 3 }
  0xe7   : > { %v1402_v3 = vmul.f32 0.4, %v1355_v39  ;;  %v4631_v44 = vadd.f32 %v730_v38, %v4620_v9  ;;  %v403_v50 = vand.u32 2147483648, %v4581_v22  ;;  %v603_v55 = vadd.f32 %v4450_v52, %v4313_v33 }
  0xe8   : > { %v1403_v30 = vmul.f32 0.4, %v1357_v6  ;;  %v1208_v29 = vrot.slane %v4607_v24, 4  ;;  %vm407_vm2 = vcmp.eq.f32.partialorder %v4610_v4, inf  ;;  %v5775_v33 = vrot.slane %v4607_v24, 1 }
  0xe9   : > { %5772 = vst [vmem:[#allocation52_spill] sm:$0xff] %v4631_v44  ;;  %v1434_v46 = vadd.f32 -1.9806975, %v1402_v3  ;;  %v4641_v8 = vrot.slane %v4631_v44, 1  ;;  %v4644_v38 = vrot.slane %v4631_v44, 2  ;;  %v1096_v6 = vrot.slane %v4631_v44, 3 }
  0xea   : > { %v1435_v39 = vadd.f32 -1.9806975, %v1403_v30  ;;  %v1209_v3 = vrot.slane %v4631_v44, 4  ;;  %v5776_v61 = vrot.slane %v4607_v24, 2  ;;  %vm409_vm7 = vcmp.eq.f32.partialorder %v4610_v4, 0.0 }
  0xeb   : > { %5773 = vst [vmem:[#allocation53_spill] sm:$0xff] %v4641_v8  ;;  %5774 = vst [vmem:[#allocation54_spill] sm:$0xff] %v4644_v38  ;;  %v1482_v63 = vmul.f32 1.442695, %v1434_v46  ;;  %v3002_v19 = vpop.eup %3001  ;;  %v871_v30 = vsel %vm838_vm3, %v5775_v33, %v4641_v8  ;;  %v666_v46 = vadd.f32 %v602_v28, %v4511_v62  ;;  %v940_v40 = vadd.f32 %v4641_v8, %v4631_v44 }
  0xec   : > { %v1484_v25 = vmul.f32 1.442695, %v1435_v39  ;;  %v984_v36 = vsel %vm951_vm4, %v5776_v61, %v4644_v38  ;;  %v939_v41 = vadd.f32 %v871_v30, %v4607_v24  ;;  %v410_v39 = vand.u32 2147483648, %v4610_v4 }
  0xed   : > { %3009 = vpow2.f32 %v1482_v63  ;;  %v1097_v33 = vsel %vm1064_vm5, %v1095_v5, %v1096_v6  ;;  %v399_v16 = vmul.f32 %v3002_v19, %v4581_v22  ;;  %v667_v61 = vadd.f32 %v603_v55, %v4518_v48 }
  0xee   : > { %v3004_v43 = vpop.eup %3003  ;;  %3011 = vpow2.f32 %v1484_v25  ;;  %v1052_v23 = vadd.f32 %v984_v36, %v939_v41  ;;  %v1210_v30 = vsel %vm1177_vm6, %v1208_v29, %v1209_v3  ;;  %v4671_v44 = vadd.f32 %v4644_v38, %v940_v40  ;;  %v4684_v40 = vld [vmem:[%s3577_s4 + $0xe8] sm:$0xff] }
  0xef   : > { %v3006_v28 = vpop.eup %3005  ;;  %v1361_v63 = vmul.f32 0.6931472, %v3004_v43  ;;  %v401_v25 = vsel %vm400_vm0, %v4581_v22, %v399_v16  ;;  %v731_v5 = vadd.f32 %v666_v46, %v4594_v15  ;;  %3013 = vrsqrt.f32 %v4664_v42 }
  0xf0   : > { %5777 = vst [vmem:[#allocation55_spill] sm:$0xff] %v4671_v44  ;;  %v3008_v8 = vpop.eup %3007  ;;  %v1359_v12 = vmul.f32 0.6931472, %v3006_v28  ;;  %v1165_v55 = vadd.f32 %v1097_v33, %v1052_v23  ;;  %v4679_v43 = vadd.f32 %v1096_v6, %v4671_v44  ;;  %v404_v41 = vsel %vm402_vm1, %v403_v50, %v401_v25 }
  0xf1   : > { %v1405_v19 = vmul.f32 0.4, %v1361_v63  ;;  %v406_v29 = vmul.f32 %v3008_v8, %v4610_v4  ;;  %v4688_v16 = vmul.f32 %v404_v41, %v210_v51  ;;  %v732_v23 = vadd.f32 %v667_v61, %v4620_v9 }
  0xf2   : > { %5778 = vst [vmem:[#allocation56_spill] sm:$0xff] %v4679_v43  ;;  %v1404_v36 = vmul.f32 0.4, %v1359_v12  ;;  %v1278_v28 = vadd.f32 %v1210_v30, %v1165_v55  ;;  %v1279_v63 = vadd.f32 %v1209_v3, %v4679_v43  ;;  %3015 = vrsqrt.f32 %v4684_v40 }
  0xf3   : > { %v1437_v46 = vadd.f32 -1.9806975, %v1405_v19  ;;  %v408_v22 = vsel %vm407_vm2, %v4610_v4, %v406_v29  ;;  %v4696_v50 = vadd.f32 %v731_v5, %v4688_v16  ;;  %v212_v8 = vmul.f32 %v4664_v42, %v4664_v42 }
  0xf4   : > { %v1436_v6 = vadd.f32 -1.9806975, %v1404_v36  ;;  %3017 = vlog2.f32 %v1278_v28  ;;  %v411_v51 = vsel %vm409_vm7, %v410_v39, %v408_v22  ;;  %v4706_v61 = vmul.f32 %v4684_v40, %v4684_v40 }
  0xf5   : > { %v1488_v12 = vmul.f32 1.442695, %v1437_v46  ;;  %3019 = vlog2.f32 %v1279_v63  ;;  %v4702_v3 = vmul.f32 %v411_v51, %v4624_v58  ;;  %v5676_v30 = vrot.slane %v4696_v50, 1 }
  0xf6   : > { %v1486_v33 = vmul.f32 1.442695, %v1436_v6  ;;  %vm414_vm8 = vcmp.eq.f32.partialorder %v4664_v42, inf  ;;  %vm416_vm9 = vcmp.eq.f32.partialorder %v4664_v42, 0.0  ;;  %v5675_v5 = vrot.slane %v4696_v50, 2 }
  0xf7   : > { %v3010_v4 = vpop.eup %3009  ;;  %3021 = vpow2.f32 %v1488_v12  ;;  %v4713_v58 = vadd.f32 %v732_v23, %v4702_v3  ;;  %v417_v55 = vand.u32 2147483648, %v4664_v42  ;;  %v604_v41 = vadd.f32 %v4511_v62, %v4417_v54 }
  0xf8   : > { %v3012_v39 = vpop.eup %3011  ;;  %v1562_v25 = vadd.f32 %v3010_v4, %v4419_v10  ;;  %3023 = vpow2.f32 %v1486_v33  ;;  %v605_v36 = vadd.f32 %v4518_v48, %v4450_v52  ;;  %v1098_v28 = vrot.slane %v4696_v50, 3 }
  0xf9   : > { %5779 = vst [vmem:[#allocation57_spill] sm:$0xff] %v4713_v58  ;;  %v1563_v19 = vadd.f32 %v3012_v39, %v4549_v11  ;;  %v3014_v29 = vpop.eup %3013  ;;  %v4724_v10 = vrot.slane %v4713_v58, 1  ;;  %v4727_v46 = vrot.slane %v4713_v58, 2  ;;  %v1099_v11 = vrot.slane %v4713_v58, 3  ;;  %v4754_v39 = vld [vmem:[%s3577_s4 + $0xf0] sm:$0xff] }
  0xfa   : > { %1594 = vst [vmem:[%s4044_s18 + $0x82] sm:$0xff] %v1562_v25  ;;  %v1211_v63 = vrot.slane %v4696_v50, 4  ;;  %v1212_v54 = vrot.slane %v4713_v58, 4  ;;  %v413_v52 = vmul.f32 %v3014_v29, %v4664_v42  ;;  %v668_v23 = vadd.f32 %v604_v41, %v4594_v15 }
  0xfb   : > { %5780 = vst [vmem:[#allocation58_spill] sm:$0xff] %v4724_v10  ;;  %5781 = vst [vmem:[#allocation59_spill] sm:$0xff] %v4727_v46  ;;  %v874_v6 = vsel %vm838_vm3, %v5676_v30, %v4724_v10  ;;  %v987_v22 = vsel %vm951_vm4, %v5675_v5, %v4727_v46  ;;  %vm421_vm10 = vcmp.eq.f32.partialorder %v4684_v40, inf  ;;  %v669_v12 = vadd.f32 %v605_v36, %v4620_v9 }
  0xfc   : > { %1595 = vst [vmem:[%s4044_s18 + $0x8a] sm:$0xf] %v1563_v19  ;;  %v941_v51 = vadd.f32 %v874_v6, %v4696_v50  ;;  %v942_v33 = vadd.f32 %v4724_v10, %v4713_v58  ;;  %v415_v4 = vsel %vm414_vm8, %v4664_v42, %v413_v52  ;;  %vm423_vm11 = vcmp.eq.f32.partialorder %v4684_v40, 0.0  ;;  %v3016_v25 = vpop.eup %3015 }
  0xfd   : > { %v1100_v19 = vsel %vm1064_vm5, %v1098_v28, %v1099_v11  ;;  %v418_v41 = vsel %vm416_vm9, %v417_v55, %v415_v4  ;;  %v424_v36 = vand.u32 2147483648, %v4684_v40  ;;  %v733_v29 = vadd.f32 %v668_v23, %v4688_v16  ;;  %v1311_v23 = vld [vmem:[%s3577_s4 + $0xaa] sm:$0xf] }
  0xfe   : > { %v3018_v6 = vpop.eup %3017  ;;  %v1054_v5 = vadd.f32 %v987_v22, %v941_v51  ;;  %v1213_v52 = vsel %vm1177_vm6, %v1211_v63, %v1212_v54  ;;  %v4763_v30 = vadd.f32 %v4727_v46, %v942_v33  ;;  %v420_v58 = vmul.f32 %v3016_v25, %v4684_v40  ;;  %v1312_v51 = vld [vmem:[%s3577_s4 + $0xb2] sm:$0xff] }
  0xff   : > { %v3020_v10 = vpop.eup %3019  ;;  %v1363_v44 = vmul.f32 0.6931472, %v3018_v6  ;;  %v4766_v28 = vmul.f32 %v418_v41, %v212_v8  ;;  %v734_v42 = vadd.f32 %v669_v12, %v4702_v3  ;;  %3025 = vrsqrt.f32 %v4754_v39 }
 0x100   : > { %5782 = vst [vmem:[#allocation60_spill] sm:$0xff] %v4763_v30  ;;  %v1365_v4 = vmul.f32 0.6931472, %v3020_v10  ;;  %v1167_v22 = vadd.f32 %v1100_v19, %v1054_v5  ;;  %v4773_v63 = vadd.f32 %v1099_v11, %v4763_v30  ;;  %v422_v33 = vsel %vm421_vm10, %v4684_v40, %v420_v58 }
 0x101   : > { %v3022_v55 = vpop.eup %3021  ;;  %v1406_v25 = vmul.f32 0.4, %v1363_v44  ;;  %v425_v41 = vsel %vm423_vm11, %v424_v36, %v422_v33  ;;  %v4782_v10 = vadd.f32 %v733_v29, %v4766_v28  ;;  %v4787_v58 = vmul.f32 0.5, %v1311_v23  ;;  %v4795_v44 = vld [vmem:[%s3577_s4 + $0xf8] sm:$0xff] }
 0x102   : > { %5783 = vst [vmem:[#allocation61_spill] sm:$0xff] %v4773_v63  ;;  %v3024_v8 = vpop.eup %3023  ;;  %v1565_v12 = vadd.f32 %v3022_v55, %v4604_v1  ;;  %v1407_v11 = vmul.f32 0.4, %v1365_v4  ;;  %v1280_v19 = vadd.f32 %v1213_v52, %v1167_v22  ;;  %v1281_v6 = vadd.f32 %v1212_v54, %v4773_v63 }
 0x103   : > { %v1564_v5 = vadd.f32 %v3024_v8, %v4602_v60  ;;  %v1438_v30 = vadd.f32 -1.9806975, %v1406_v25  ;;  %v4789_v46 = vmul.f32 0.5, %v1312_v51  ;;  %v4792_v1 = vmul.f32 %v425_v41, %v4706_v61 }
 0x104   : > { %1597 = vst [vmem:[%s4044_s18 + $0x9a] sm:$0xf] %v1565_v12  ;;  %v1439_v40 = vadd.f32 -1.9806975, %v1407_v11  ;;  %3027 = vlog2.f32 %v1280_v19  ;;  %v5683_v60 = vrot.slane %v4782_v10, 1  ;;  %v214_v36 = vmul.f32 %v4754_v39, %v4754_v39 }
 0x105   : > { %1596 = vst [vmem:[%s4044_s18 + $0x92] sm:$0xff] %v1564_v5  ;;  %v1490_v54 = vmul.f32 1.442695, %v1438_v30  ;;  %3029 = vlog2.f32 %v1281_v6  ;;  %v4802_v29 = vadd.f32 %v734_v42, %v4792_v1  ;;  %v5682_v52 = vrot.slane %v4782_v10, 2 }
 0x106   : > { %v1492_v55 = vmul.f32 1.442695, %v1439_v40  ;;  %v1101_v61 = vrot.slane %v4782_v10, 3  ;;  %v4808_v23 = vmul.f32 %v4795_v44, %v4795_v44  ;;  %3031 = vrsqrt.f32 %v4795_v44 }
 0x107   : > { %5784 = vst [vmem:[#allocation62_spill] sm:$0xff] %v4802_v29  ;;  %3033 = vpow2.f32 %v1490_v54  ;;  %v4812_v4 = vrot.slane %v4802_v29, 1  ;;  %v4815_v30 = vrot.slane %v4802_v29, 2  ;;  %v1102_v42 = vrot.slane %v4802_v29, 3 }
 0x108   : > { %3035 = vpow2.f32 %v1492_v55  ;;  %v1214_v22 = vrot.slane %v4782_v10, 4  ;;  %vm428_vm12 = vcmp.eq.f32.partialorder %v4754_v39, inf  ;;  %v431_v51 = vand.u32 2147483648, %v4754_v39 }
 0x109   : > { %5785 = vst [vmem:[#allocation63_spill] sm:$0xff] %v4812_v4  ;;  %5786 = vst [vmem:[#allocation64_spill] sm:$0xff] %v4815_v30  ;;  %v3026_v33 = vpop.eup %3025  ;;  %v877_v8 = vsel %vm838_vm3, %v5683_v60, %v4812_v4  ;;  %v990_v12 = vsel %vm951_vm4, %v5682_v52, %v4815_v30  ;;  %v1215_v25 = vrot.slane %v4802_v29, 4  ;;  %v944_v41 = vadd.f32 %v4812_v4, %v4802_v29 }
 0x10a   : > { %v943_v5 = vadd.f32 %v877_v8, %v4782_v10  ;;  %v427_v11 = vmul.f32 %v3026_v33, %v4754_v39  ;;  %vm430_vm13 = vcmp.eq.f32.partialorder %v4754_v39, 0.0  ;;  %v606_v19 = vadd.f32 %v4594_v15, %v4511_v62 }
 0x10b   : > { %v1103_v6 = vsel %vm1064_vm5, %v1101_v61, %v1102_v42  ;;  %v4839_v40 = vadd.f32 %v4815_v30, %v944_v41  ;;  %vm435_vm14 = vcmp.eq.f32.partialorder %v4795_v44, inf  ;;  %v607_v54 = vadd.f32 %v4620_v9, %v4518_v48 }
 0x10c   : > { %v1056_v55 = vadd.f32 %v990_v12, %v943_v5  ;;  %v429_v33 = vsel %vm428_vm12, %v4754_v39, %v427_v11  ;;  %v670_v8 = vadd.f32 %v606_v19, %v4688_v16  ;;  %v608_v62 = vadd.f32 %v4688_v16, %v4594_v15 }
 0x10d   : > { %5787 = vst [vmem:[#allocation65_spill] sm:$0xff] %v4839_v40  ;;  %v1216_v61 = vsel %vm1177_vm6, %v1214_v22, %v1215_v25  ;;  %v4852_v41 = vadd.f32 %v1102_v42, %v4839_v40  ;;  %v432_v52 = vsel %vm430_vm13, %v431_v51, %v429_v33  ;;  %v671_v60 = vadd.f32 %v607_v54, %v4702_v3  ;;  %v1313_v33 = vld [vmem:[%s3577_s4 + $0xba] sm:$0xf] }
 0x10e   : > { %v3028_v29 = vpop.eup %3027  ;;  %v1169_v48 = vadd.f32 %v1103_v6, %v1056_v55  ;;  %v470_v12 = vmul.f32 %v432_v52, %v214_v36  ;;  %v735_v5 = vadd.f32 %v670_v8, %v4766_v28  ;;  %v672_v39 = vadd.f32 %v608_v62, %v4766_v28 }
 0x10f   : > { %5788 = vst [vmem:[#allocation66_spill] sm:$0xff] %v4852_v41  ;;  %v3030_v11 = vpop.eup %3029  ;;  %v1367_v19 = vmul.f32 0.6931472, %v3028_v29  ;;  %v1283_v15 = vadd.f32 %v1215_v25, %v4852_v41  ;;  %vm437_vm15 = vcmp.eq.f32.partialorder %v4795_v44, 0.0  ;;  %v609_v42 = vadd.f32 %v4702_v3, %v4620_v9 }
 0x110   : > { %v3032_v22 = vpop.eup %3031  ;;  %v1369_v51 = vmul.f32 0.6931472, %v3030_v11  ;;  %v1282_v54 = vadd.f32 %v1216_v61, %v1169_v48  ;;  %v438_v6 = vand.u32 2147483648, %v4795_v44  ;;  %v4862_v55 = vadd.f32 %v735_v5, %v470_v12 }
 0x111   : > { %v3034_v36 = vpop.eup %3033  ;;  %v1408_v52 = vmul.f32 0.4, %v1367_v19  ;;  %3037 = vlog2.f32 %v1283_v15  ;;  %v434_v29 = vmul.f32 %v3032_v22, %v4795_v44  ;;  %v737_v25 = vadd.f32 %v672_v39, %v470_v12 }
 0x112   : > { %v3036_v8 = vpop.eup %3035  ;;  %v1566_v62 = vadd.f32 %v3034_v36, %v4616_v53  ;;  %v1409_v9 = vmul.f32 0.4, %v1369_v51  ;;  %3039 = vlog2.f32 %v1282_v54  ;;  %v736_v61 = vadd.f32 %v671_v60, %v4792_v1 }
 0x113   : > { %v1567_v48 = vadd.f32 %v3036_v8, %v4787_v58  ;;  %v1440_v5 = vadd.f32 -1.9806975, %v1408_v52  ;;  %v436_v11 = vsel %vm435_vm14, %v4795_v44, %v434_v29  ;;  %v673_v19 = vadd.f32 %v609_v42, %v4792_v1 }
 0x114   : > { %1598 = vst [vmem:[%s4044_s18 + $0xa2] sm:$0xff] %v1566_v62  ;;  %v1441_v15 = vadd.f32 -1.9806975, %v1409_v9  ;;  %v4874_v22 = vmul.f32 0.5, %v1313_v33  ;;  %v439_v53 = vsel %vm437_vm15, %v438_v6, %v436_v11  ;;  %v5686_v39 = vrot.slane %v4862_v55, 1 }
 0x115   : > { %1599 = vst [vmem:[%s4044_s18 + $0xaa] sm:$0xf] %v1567_v48  ;;  %v1494_v60 = vmul.f32 1.442695, %v1440_v5  ;;  %v471_v58 = vmul.f32 %v439_v53, %v4808_v23  ;;  %v5687_v51 = vrot.slane %v4862_v55, 2  ;;  %v4883_v54 = vadd.f32 %v737_v25, %v4766_v28 }
 0x116   : > { %v1496_v36 = vmul.f32 1.442695, %v1441_v15  ;;  %v1104_v42 = vrot.slane %v4862_v55, 3  ;;  %v610_v52 = vadd.f32 %v4766_v28, %v4688_v16  ;;  %v611_v44 = vadd.f32 %v4792_v1, %v4702_v3 }
 0x117   : > { %3041 = vpow2.f32 %v1494_v60  ;;  %v4890_v6 = vadd.f32 %v736_v61, %v471_v58  ;;  %v1217_v33 = vrot.slane %v4862_v55, 4  ;;  %v738_v23 = vadd.f32 %v673_v19, %v471_v58 }
 0x118   : > { %3043 = vpow2.f32 %v1496_v36  ;;  %v1107_v8 = vrot.slane %v4883_v54, 3  ;;  %v1220_v11 = vrot.slane %v4883_v54, 4  ;;  %v674_v19 = vadd.f32 %v610_v52, %v470_v12 }
 0x119   : > { %5789 = vst [vmem:[#allocation67_spill] sm:$0xff] %v4890_v6  ;;  %v4897_v62 = vrot.slane %v4890_v6, 1  ;;  %v4900_v9 = vrot.slane %v4890_v6, 2  ;;  %v1105_v48 = vrot.slane %v4890_v6, 3  ;;  %v1218_v61 = vrot.slane %v4890_v6, 4 }
 0x11a   : > { %v4905_v5 = vadd.f32 %v738_v23, %v4792_v1  ;;  %v675_v15 = vadd.f32 %v611_v44, %v471_v58  ;;  %v5797_v41 = vrot.slane %v4883_v54, 2  ;;  %v739_v43 = vadd.f32 %v674_v19, %v4766_v28 }
 0x11b   : > { %5790 = vst [vmem:[#allocation68_spill] sm:$0xff] %v4897_v62  ;;  %5791 = vst [vmem:[#allocation69_spill] sm:$0xff] %v4900_v9  ;;  %v3038_v53 = vpop.eup %3037  ;;  %v880_v60 = vsel %vm838_vm3, %v5686_v39, %v4897_v62  ;;  %v993_v36 = vsel %vm951_vm4, %v5687_v51, %v4900_v9  ;;  %v1106_v25 = vsel %vm1064_vm5, %v1104_v42, %v1105_v48  ;;  %v1658_v19 = vrot.slane %v3778_v32, 6 }
 0x11c   : > { %5792 = vst [vmem:[#allocation70_spill] sm:$0xff] %v4905_v5  ;;  %v1219_v23 = vsel %vm1177_vm6, %v1217_v33, %v1218_v61  ;;  %v3040_v29 = vpop.eup %3039  ;;  %v1373_v40 = vmul.f32 0.6931472, %v3038_v53  ;;  %v945_v12 = vadd.f32 %v880_v60, %v4862_v55  ;;  %v946_v58 = vadd.f32 %v4897_v62, %v4890_v6 }
 0x11d   : > { %v4922_v52 = vrot.slane %v4905_v5, 1  ;;  %v1371_v44 = vmul.f32 0.6931472, %v3040_v29  ;;  %v4925_v39 = vrot.slane %v4905_v5, 2  ;;  %v1108_v51 = vrot.slane %v4905_v5, 3 }
 0x11e   : > { %v1221_v42 = vrot.slane %v4905_v5, 4  ;;  %v1411_v4 = vmul.f32 0.4, %v1373_v40  ;;  %v1058_v33 = vadd.f32 %v993_v36, %v945_v12  ;;  %v4930_v53 = vadd.f32 %v4900_v9, %v946_v58 }
 0x11f   : > { %5793 = vst [vmem:[#allocation71_spill] sm:$0xff] %v4922_v52  ;;  %5794 = vst [vmem:[#allocation72_spill] sm:$0xff] %v4925_v39  ;;  %v5796_v60 = vrot.slane %v4883_v54, 1  ;;  %v1410_v62 = vmul.f32 0.4, %v1371_v44  ;;  %v996_v30 = vsel %vm951_vm4, %v5797_v41, %v4925_v39  ;;  %v1109_v63 = vsel %vm1064_vm5, %v1107_v8, %v1108_v51 }
 0x120   : > { %5795 = vst [vmem:[#allocation73_spill] sm:$0xff] %v4930_v53  ;;  %v1443_v40 = vadd.f32 -1.9806975, %v1411_v4  ;;  %v1171_v36 = vadd.f32 %v1106_v25, %v1058_v33  ;;  %v4943_v12 = vadd.f32 %v1105_v48, %v4930_v53  ;;  %v1222_v58 = vsel %vm1177_vm6, %v1220_v11, %v1221_v42 }
 0x121   : > { %v883_v6 = vsel %vm838_vm3, %v5796_v60, %v4922_v52  ;;  %v3042_v9 = vpop.eup %3041  ;;  %v1442_v60 = vadd.f32 -1.9806975, %v1410_v62  ;;  %v4958_v28 = vadd.f32 %v739_v43, %v4688_v16 }
 0x122   : > { %v947_v29 = vadd.f32 %v883_v6, %v4883_v54  ;;  %5798 = vst [vmem:[#allocation74_spill] sm:$0xff] %v4943_v12  ;;  %v948_v6 = vadd.f32 %v4922_v52, %v4905_v5  ;;  %v3044_v41 = vpop.eup %3043  ;;  %v1568_v8 = vadd.f32 %v3042_v9, %v4789_v46  ;;  %v1500_v4 = vmul.f32 1.442695, %v1443_v40 }
 0x123   : > { %v1284_v25 = vadd.f32 %v1219_v23, %v1171_v36  ;;  %v1285_v48 = vadd.f32 %v1218_v61, %v4943_v12  ;;  %v1569_v33 = vadd.f32 %v3044_v41, %v4874_v22  ;;  %v1498_v53 = vmul.f32 1.442695, %v1442_v60 }
 0x124   : > { %v1060_v44 = vadd.f32 %v996_v30, %v947_v29  ;;  %v4953_v62 = vadd.f32 %v4925_v39, %v948_v6  ;;  %1600 = vst [vmem:[%s4044_s18 + $0xb2] sm:$0xff] %v1568_v8  ;;  %3045 = vpow2.f32 %v1500_v4  ;;  %v740_v30 = vadd.f32 %v675_v15, %v4792_v1  ;;  %v1314_v15 = vld [vmem:[%s3577_s4 + $0xc2] sm:$0xff] }
 0x125   : > { %1601 = vst [vmem:[%s4044_s18 + $0xba] sm:$0xf] %v1569_v33  ;;  %3047 = vpow2.f32 %v1498_v53  ;;  %v5698_v61 = vrot.slane %v4958_v28, 1  ;;  %v5697_v1 = vrot.slane %v4958_v28, 2  ;;  %v1110_v16 = vrot.slane %v4958_v28, 3 }
 0x126   : > { %v1173_v11 = vadd.f32 %v1109_v63, %v1060_v44  ;;  %5799 = vst [vmem:[#allocation75_spill] sm:$0xff] %v4953_v62  ;;  %v4962_v9 = vadd.f32 %v1108_v51, %v4953_v62  ;;  %v1610_v63 = vrot.slane %v3778_v32, 7  ;;  %3049 = vlog2.f32 %v1284_v25  ;;  %v1315_v51 = vld [vmem:[%s3577_s4 + $0xca] sm:$0xf] }
 0x127   : > { %v4966_v22 = vadd.f32 %v740_v30, %v4702_v3  ;;  %3051 = vlog2.f32 %v1285_v48  ;;  %v1223_v29 = vrot.slane %v4958_v28, 4  ;;  %v1538_v44 = vmul.f32 0.5, %v1314_v15 }
 0x128   : > { %v1286_v46 = vadd.f32 %v1222_v58, %v1173_v11  ;;  %5800 = vst [vmem:[#allocation76_spill] sm:$0xff] %v4962_v9  ;;  %v1287_v43 = vadd.f32 %v1221_v42, %v4962_v9  ;;  %v4984_v42 = vadd.f32 %v1610_v63, %v3778_v32  ;;  %v1539_v6 = vmul.f32 0.5, %v1315_v51 }
 0x129   : > { %5801 = vst [vmem:[#allocation77_spill] sm:$0xff] %v4966_v22  ;;  %v4976_v23 = vrot.slane %v4966_v22, 1  ;;  %v4979_v3 = vrot.slane %v4966_v22, 2  ;;  %v1111_v53 = vrot.slane %v4966_v22, 3  ;;  %v1224_v58 = vrot.slane %v4966_v22, 4 }
 0x12a   : > { %3053 = vlog2.f32 %v1286_v46  ;;  %v1690_v8 = vadd.f32 %v1658_v19, %v4984_v42  ;;  %v1611_v48 = vrot.slane %v3763_v26, 7  ;;  %v1659_v33 = vrot.slane %v3763_v26, 6 }
 0x12b   : > { %5802 = vst [vmem:[#allocation78_spill] sm:$0xff] %v4976_v23  ;;  %5803 = vst [vmem:[#allocation79_spill] sm:$0xff] %v4979_v3  ;;  %3055 = vlog2.f32 %v1287_v43  ;;  %v886_v40 = vsel %vm838_vm3, %v5698_v61, %v4976_v23  ;;  %v999_v36 = vsel %vm951_vm4, %v5697_v1, %v4979_v3  ;;  %v950_v60 = vadd.f32 %v4976_v23, %v4966_v22 }
 0x12c   : > { %v949_v41 = vadd.f32 %v886_v40, %v4958_v28  ;;  %v1112_v4 = vsel %vm1064_vm5, %v1110_v16, %v1111_v53  ;;  %v1706_v30 = vadd.f32 %v1690_v8, %v1610_v63  ;;  %v1612_v46 = vrot.slane %v3852_v35, 7 }
 0x12d   : > { %v5001_v25 = vadd.f32 %v4979_v3, %v950_v60  ;;  %v1660_v43 = vrot.slane %v3852_v35, 6  ;;  %v1225_v51 = vsel %vm1177_vm6, %v1223_v29, %v1224_v58  ;;  %v5012_v16 = vadd.f32 %v1611_v48, %v3763_v26 }
 0x12e   : > { %v1062_v11 = vadd.f32 %v999_v36, %v949_v41  ;;  %v3046_v15 = vpop.eup %3045  ;;  %v1722_v63 = vadd.f32 %v1706_v30, %v3778_v32  ;;  %v5016_v36 = vadd.f32 %v1612_v46, %v3852_v35  ;;  %v1613_v30 = vrot.slane %v3940_v45, 7 }
 0x12f   : > { %5804 = vst [vmem:[#allocation80_spill] sm:$0xff] %v5001_v25  ;;  %v5009_v19 = vadd.f32 %v1111_v53, %v5001_v25  ;;  %v3048_v40 = vpop.eup %3047  ;;  %v1571_v60 = vadd.f32 %v3046_v15, %v1539_v6  ;;  %v1691_v29 = vadd.f32 %v1659_v33, %v5012_v16  ;;  %v1616_v62 = vrot.slane %v4249_v31, 7 }
 0x130   : > { %v1175_v1 = vadd.f32 %v1112_v4, %v1062_v11  ;;  %v3050_v41 = vpop.eup %3049  ;;  %v1570_v8 = vadd.f32 %v3048_v40, %v1538_v44  ;;  %3057 = vlog2.f32 %v1722_v63  ;;  %v1692_v23 = vadd.f32 %v1660_v43, %v5016_v36 }
 0x131   : > { %5805 = vst [vmem:[#allocation81_spill] sm:$0xff] %v5009_v19  ;;  %v1289_v61 = vadd.f32 %v1224_v58, %v5009_v19  ;;  %v3052_v53 = vpop.eup %3051  ;;  %1603 = vst [vmem:[%s4044_s18 + $0xca] sm:$0xf] %v1571_v60  ;;  %v1375_v22 = vmul.f32 0.6931472, %v3050_v41  ;;  %v1707_v11 = vadd.f32 %v1691_v29, %v1611_v48  ;;  %v1661_v48 = vrot.slane %v3940_v45, 6 }
 0x132   : > { %v1288_v25 = vadd.f32 %v1225_v51, %v1175_v1  ;;  %1602 = vst [vmem:[%s4044_s18 + $0xc2] sm:$0xff] %v1570_v8  ;;  %v1377_v4 = vmul.f32 0.6931472, %v3052_v53  ;;  %v1708_v33 = vadd.f32 %v1692_v23, %v1612_v46  ;;  %v5026_v51 = vadd.f32 %v1613_v30, %v3940_v45 }
 0x133   : > { %3059 = vlog2.f32 %v1289_v61  ;;  %v1412_v44 = vmul.f32 0.4, %v1375_v22  ;;  %v1723_v1 = vadd.f32 %v1707_v11, %v3763_v26  ;;  %v1316_v22 = vld [vmem:[%s3577_s4 + $0xd2] sm:$0xff]  ;;  %v5053_v19 = vadd.f32 %v1616_v62, %v4249_v31 }
 0x134   : > { %v3054_v6 = vpop.eup %3053  ;;  %3061 = vlog2.f32 %v1288_v25  ;;  %v1413_v40 = vmul.f32 0.4, %v1377_v4  ;;  %v1724_v61 = vadd.f32 %v1708_v33, %v3852_v35  ;;  %v1693_v46 = vadd.f32 %v1661_v48, %v5026_v51  ;;  %v1317_v4 = vld [vmem:[%s3577_s4 + $0xda] sm:$0xf]  ;;  %v1318_v33 = vld [vmem:[%s3577_s4 + $0xe2] sm:$0xff] }
 0x135   : > { %v3056_v15 = vpop.eup %3055  ;;  %v1379_v58 = vmul.f32 0.6931472, %v3054_v6  ;;  %v1444_v43 = vadd.f32 -1.9806975, %v1412_v44  ;;  %3063 = vlog2.f32 %v1723_v1  ;;  %v1614_v6 = vrot.slane %v4028_v59, 7 }
 0x136   : > { %v1381_v60 = vmul.f32 0.6931472, %v3056_v15  ;;  %v1445_v41 = vadd.f32 -1.9806975, %v1413_v40  ;;  %3065 = vlog2.f32 %v1724_v61  ;;  %v1709_v15 = vadd.f32 %v1693_v46, %v1613_v30 }
 0x137   : > { %v1414_v63 = vmul.f32 0.4, %v1379_v58  ;;  %v1502_v23 = vmul.f32 1.442695, %v1444_v43  ;;  %v1662_v44 = vrot.slane %v4028_v59, 6  ;;  %v1540_v58 = vmul.f32 0.5, %v1316_v22 }
 0x138   : > { %v1415_v8 = vmul.f32 0.4, %v1381_v60  ;;  %v1504_v29 = vmul.f32 1.442695, %v1445_v41  ;;  %v5037_v60 = vadd.f32 %v1614_v6, %v4028_v59  ;;  %v1725_v43 = vadd.f32 %v1709_v15, %v3940_v45  ;;  %v1319_v41 = vld [vmem:[%s3577_s4 + $0xea] sm:$0xf] }
 0x139   : > { %v1446_v25 = vadd.f32 -1.9806975, %v1414_v63  ;;  %3067 = vpow2.f32 %v1502_v23  ;;  %v1615_v63 = vrot.slane %v4141_v13, 7  ;;  %v1663_v61 = vrot.slane %v4141_v13, 6 }
 0x13a   : > { %v1447_v53 = vadd.f32 -1.9806975, %v1415_v8  ;;  %3069 = vpow2.f32 %v1504_v29  ;;  %v3058_v1 = vpop.eup %3057  ;;  %v1541_v30 = vmul.f32 0.5, %v1317_v4  ;;  %v1694_v22 = vadd.f32 %v1662_v44, %v5037_v60 }
 0x13b   : > { %v1506_v11 = vmul.f32 1.442695, %v1446_v25  ;;  %v1755_v8 = vmul.f32 0.6931472, %v3058_v1  ;;  %v1542_v25 = vmul.f32 0.5, %v1318_v33  ;;  %v5045_v29 = vadd.f32 %v1615_v63, %v4141_v13 }
 0x13c   : > { %v1508_v40 = vmul.f32 1.442695, %v1447_v53  ;;  %v1320_v53 = vld [vmem:[%s3577_s4 + $0xf2] sm:$0xff]  ;;  %v1710_v5 = vadd.f32 %v1694_v22, %v1614_v6  ;;  %v1543_v52 = vmul.f32 0.5, %v1319_v41  ;;  %v1664_v1 = vrot.slane %v4249_v31, 6 }
 0x13d   : > { %3071 = vpow2.f32 %v1506_v11  ;;  %v3060_v48 = vpop.eup %3059  ;;  %v1786_v15 = vmul.f32 0.4, %v1755_v8  ;;  %v5055_v8 = vmul.f32 0.5, %v1320_v53 }
 0x13e   : > { %3073 = vpow2.f32 %v1508_v40  ;;  %v3062_v23 = vpop.eup %3061  ;;  %v1385_v46 = vmul.f32 0.6931472, %v3060_v48  ;;  %v1695_v40 = vadd.f32 %v1663_v61, %v5045_v29  ;;  %v1696_v12 = vadd.f32 %v1664_v1, %v5053_v19 }
 0x13f   : > { %3075 = vlog2.f32 %v1725_v43  ;;  %v1383_v11 = vmul.f32 0.6931472, %v3062_v23  ;;  %v3064_v44 = vpop.eup %3063  ;;  %v1802_v48 = vadd.f32 -1.9806975, %v1786_v15  ;;  %v1726_v43 = vadd.f32 %v1710_v5, %v4028_v59 }
 0x140   : > { %v1417_v4 = vmul.f32 0.4, %v1385_v46  ;;  %v3066_v23 = vpop.eup %3065  ;;  %v1757_v22 = vmul.f32 0.6931472, %v3064_v44  ;;  %v1711_v41 = vadd.f32 %v1695_v40, %v1615_v63 }
 0x141   : > { %v1416_v33 = vmul.f32 0.4, %v1383_v11  ;;  %v1818_v3 = vmul.f32 1.442695, %v1802_v48  ;;  %v1759_v61 = vmul.f32 0.6931472, %v3066_v23  ;;  %3077 = vlog2.f32 %v1726_v43 }
 0x142   : > { %v1449_v6 = vadd.f32 -1.9806975, %v1417_v4  ;;  %v1738_v11 = vld [vmem:[%s3577_s4] sm:$0x1]  ;;  %v1787_v15 = vmul.f32 0.4, %v1757_v22  ;;  %v1727_v5 = vadd.f32 %v1711_v41, %v4141_v13 }
 0x143   : > { %v1448_v46 = vadd.f32 -1.9806975, %v1416_v33  ;;  %v3068_v9 = vpop.eup %3067  ;;  %3079 = vpow2.f32 %v1818_v3  ;;  %v1788_v63 = vmul.f32 0.4, %v1759_v61  ;;  %v1712_v33 = vadd.f32 %v1696_v12, %v1616_v62  ;;  %v1739_v23 = vld [vmem:[%s3577_s4 + $0x10] sm:$0x1] }
 0x144   : > { %v1512_v39 = vmul.f32 1.442695, %v1449_v6  ;;  %v3070_v38 = vpop.eup %3069  ;;  %v1572_v53 = vadd.f32 %v3068_v9, %v1540_v58  ;;  %v1803_v44 = vadd.f32 -1.9806975, %v1787_v15  ;;  %v1850_v1 = vmul.f32 0.5, %v1738_v11 }
 0x145   : > { %v1510_v20 = vmul.f32 1.442695, %v1448_v46  ;;  %v1573_v40 = vadd.f32 %v3070_v38, %v1541_v30  ;;  %v1804_v9 = vadd.f32 -1.9806975, %v1788_v63  ;;  %v1740_v22 = vld [vmem:[%s3577_s4 + $0x20] sm:$0x1]  ;;  %v1728_v38 = vadd.f32 %v1712_v33, %v4249_v31 }
 0x146   : > { %3081 = vpow2.f32 %v1512_v39  ;;  %1604 = vst [vmem:[%s4044_s18 + $0xd2] sm:$0xff] %v1572_v53  ;;  %v1820_v6 = vmul.f32 1.442695, %v1803_v44  ;;  %v1617_v62 = vrot.slane %v4320_v34, 7  ;;  %v1321_v30 = vld [vmem:[%s3577_s4 + $0xfa] sm:$0xf] }
 0x147   : > { %v3072_v4 = vpop.eup %3071  ;;  %3083 = vpow2.f32 %v1510_v20  ;;  %1605 = vst [vmem:[%s4044_s18 + $0xda] sm:$0xf] %v1573_v40  ;;  %v1822_v39 = vmul.f32 1.442695, %v1804_v9  ;;  %v1665_v20 = vrot.slane %v4320_v34, 6  ;;  %v1618_v41 = vrot.slane %v4432_v21, 7 }
 0x148   : > { %v3074_v48 = vpop.eup %3073  ;;  %v1574_v43 = vadd.f32 %v3072_v4, %v1542_v25  ;;  %3085 = vlog2.f32 %v1727_v5  ;;  %v1851_v25 = vmul.f32 0.5, %v1739_v23  ;;  %v1852_v46 = vmul.f32 0.5, %v1740_v22 }
 0x149   : > { %v3076_v58 = vpop.eup %3075  ;;  %v1575_v3 = vadd.f32 %v3074_v48, %v1543_v52  ;;  %3087 = vpow2.f32 %v1820_v6  ;;  %v1666_v52 = vrot.slane %v4432_v21, 6  ;;  %v5073_v11 = vadd.f32 %v1617_v62, %v4320_v34 }
 0x14a   : > { %1606 = vst [vmem:[%s4044_s18 + $0xe2] sm:$0xff] %v1574_v43  ;;  %v1761_v12 = vmul.f32 0.6931472, %v3076_v58  ;;  %3089 = vpow2.f32 %v1822_v39  ;;  %v1882_v15 = vrot.slane %v1850_v1, 6  ;;  %v5076_v5 = vadd.f32 %v1618_v41, %v4432_v21 }
 0x14b   : > { %1607 = vst [vmem:[%s4044_s18 + $0xea] sm:$0xf] %v1575_v3  ;;  %3091 = vlog2.f32 %v1728_v38  ;;  %v1619_v53 = vrot.slane %v4522_v0, 7  ;;  %v3078_v63 = vpop.eup %3077  ;;  %v1545_v4 = vmul.f32 0.5, %v1321_v30  ;;  %v1697_v44 = vadd.f32 %v1665_v20, %v5073_v11 }
 0x14c   : > { %v1789_v61 = vmul.f32 0.4, %v1761_v12  ;;  %v1667_v33 = vrot.slane %v4522_v0, 6  ;;  %v1883_v48 = vrot.slane %v1851_v25, 6  ;;  %v1763_v43 = vmul.f32 0.6931472, %v3078_v63 }
 0x14d   : > { %v1698_v23 = vadd.f32 %v1666_v52, %v5076_v5  ;;  %v5083_v1 = vadd.f32 %v1619_v53, %v4522_v0  ;;  %v3080_v9 = vpop.eup %3079  ;;  %v1884_v58 = vrot.slane %v1852_v46, 6  ;;  %v1713_v6 = vadd.f32 %v1697_v44, %v1617_v62  ;;  %v1741_v12 = vld [vmem:[%s3577_s4 + $0x30] sm:$0x1]  ;;  %v1742_v44 = vld [vmem:[%s3577_s4 + $0x40] sm:$0x1] }
 0x14e   : > { %v1805_v40 = vadd.f32 -1.9806975, %v1789_v61  ;;  %v1620_v22 = vrot.slane %v4607_v24, 7  ;;  %v1914_v39 = vadd.f32 %v3080_v9, %v1882_v15  ;;  %v1790_v20 = vmul.f32 0.4, %v1763_v43 }
 0x14f   : > { %v1714_v30 = vadd.f32 %v1698_v23, %v1618_v41  ;;  %v1699_v25 = vadd.f32 %v1667_v33, %v5083_v1  ;;  %v1729_v46 = vadd.f32 %v1713_v6, %v4320_v34  ;;  %v1668_v63 = vrot.slane %v4607_v24, 6 }
 0x150   : > { %v1824_v3 = vmul.f32 1.442695, %v1805_v40  ;;  %v3082_v38 = vpop.eup %3081  ;;  %1930 = vst [vmem:[%s4044_s18 - $0x2] sm:$0x4] %v1914_v39  ;;  %v1806_v15 = vadd.f32 -1.9806975, %v1790_v20 }
 0x151   : > { %v3084_v52 = vpop.eup %3083  ;;  %v1577_v61 = vadd.f32 %v3082_v38, %v1545_v4  ;;  %v1730_v9 = vadd.f32 %v1714_v30, %v4432_v21  ;;  %v1715_v43 = vadd.f32 %v1699_v25, %v1619_v53  ;;  %v1853_v41 = vmul.f32 0.5, %v1741_v12 }
 0x152   : > { %3093 = vpow2.f32 %v1824_v3  ;;  %v3086_v62 = vpop.eup %3085  ;;  %v1576_v40 = vadd.f32 %v3084_v52, %v5055_v8  ;;  %v5096_v4 = vadd.f32 %v1620_v22, %v4607_v24  ;;  %v1826_v3 = vmul.f32 1.442695, %v1806_v15  ;;  %v1743_v52 = vld [vmem:[%s3577_s4 + $0x50] sm:$0x1] }
 0x153   : > { %1609 = vst [vmem:[%s4044_s18 + $0xfa] sm:$0xf] %v1577_v61  ;;  %v1765_v33 = vmul.f32 0.6931472, %v3086_v62  ;;  %3095 = vlog2.f32 %v1729_v46  ;;  %v3088_v23 = vpop.eup %3087  ;;  %v1731_v8 = vadd.f32 %v1715_v43, %v4522_v0  ;;  %v1621_v6 = vrot.slane %v4696_v50, 7 }
 0x154   : > { %1608 = vst [vmem:[%s4044_s18 + $0xf2] sm:$0xff] %v1576_v40  ;;  %3097 = vlog2.f32 %v1730_v9  ;;  %v3090_v38 = vpop.eup %3089  ;;  %v1915_v53 = vadd.f32 %v3088_v23, %v1883_v48  ;;  %v1854_v39 = vmul.f32 0.5, %v1742_v44  ;;  %v1700_v20 = vadd.f32 %v1668_v63, %v5096_v4  ;;  %v1744_v44 = vld [vmem:[%s3577_s4 + $0x60] sm:$0x1] }
 0x155   : > { %v1791_v12 = vmul.f32 0.4, %v1765_v33  ;;  %v3092_v30 = vpop.eup %3091  ;;  %v1916_v25 = vadd.f32 %v3090_v38, %v1884_v58  ;;  %3099 = vpow2.f32 %v1826_v3  ;;  %v5104_v61 = vadd.f32 %v1621_v6, %v4696_v50 }
 0x156   : > { %v1669_v46 = vrot.slane %v4696_v50, 6  ;;  %1931 = vst [vmem:[%s4044_s18 + $0xe] sm:$0x4] %v1915_v53  ;;  %v1767_v40 = vmul.f32 0.6931472, %v3092_v30  ;;  %3101 = vlog2.f32 %v1731_v8  ;;  %v1716_v15 = vadd.f32 %v1700_v20, %v1620_v22 }
 0x157   : > { %v1807_v62 = vadd.f32 -1.9806975, %v1791_v12  ;;  %1932 = vst [vmem:[%s4044_s18 + $0x1e] sm:$0x4] %v1916_v25  ;;  %v1885_v48 = vrot.slane %v1853_v41, 6  ;;  %v1622_v63 = vrot.slane %v4782_v10, 7 }
 0x158   : > { %v1701_v9 = vadd.f32 %v1669_v46, %v5104_v61  ;;  %v1670_v58 = vrot.slane %v4782_v10, 6  ;;  %v5113_v33 = vmul.f32 0.5, %v1743_v52  ;;  %v1792_v23 = vmul.f32 0.4, %v1767_v40  ;;  %v1745_v40 = vld [vmem:[%s3577_s4 + $0x70] sm:$0x1] }
 0x159   : > { %v1828_v43 = vmul.f32 1.442695, %v1807_v62  ;;  %v1732_v3 = vadd.f32 %v1716_v15, %v4607_v24  ;;  %v1886_v38 = vrot.slane %v1854_v39, 6  ;;  %v5117_v22 = vadd.f32 %v1622_v63, %v4782_v10 }
 0x15a   : > { %v1717_v53 = vadd.f32 %v1701_v9, %v1621_v6  ;;  %v1623_v41 = vrot.slane %v4862_v55, 7  ;;  %v1808_v12 = vadd.f32 -1.9806975, %v1792_v23  ;;  %v5120_v20 = vmul.f32 0.5, %v1744_v44 }
 0x15b   : > { %3103 = vpow2.f32 %v1828_v43  ;;  %v1671_v30 = vrot.slane %v4862_v55, 6  ;;  %v1702_v39 = vadd.f32 %v1670_v58, %v5117_v22  ;;  %v1887_v46 = vrot.slane %v5113_v33, 6 }
 0x15c   : > { %v3094_v8 = vpop.eup %3093  ;;  %3105 = vlog2.f32 %v1732_v3  ;;  %v1733_v52 = vadd.f32 %v1717_v53, %v4696_v50  ;;  %v1830_v62 = vmul.f32 1.442695, %v1808_v12  ;;  %v5128_v15 = vadd.f32 %v1623_v41, %v4862_v55 }
 0x15d   : > { %v1917_v25 = vadd.f32 %v3094_v8, %v1885_v48  ;;  %v3096_v6 = vpop.eup %3095  ;;  %v1624_v44 = vrot.slane %v4883_v54, 7  ;;  %v1718_v48 = vadd.f32 %v1702_v39, %v1622_v63  ;;  %v1672_v23 = vrot.slane %v4883_v54, 6 }
 0x15e   : > { %v3098_v9 = vpop.eup %3097  ;;  %v1769_v43 = vmul.f32 0.6931472, %v3096_v6  ;;  %3107 = vlog2.f32 %v1733_v52  ;;  %v1888_v58 = vrot.slane %v5120_v20, 6  ;;  %v1703_v33 = vadd.f32 %v1671_v30, %v5128_v15 }
 0x15f   : > { %1933 = vst [vmem:[%s4044_s18 + $0x2e] sm:$0x4] %v1917_v25  ;;  %3109 = vpow2.f32 %v1830_v62  ;;  %v1771_v3 = vmul.f32 0.6931472, %v3098_v9  ;;  %v3100_v53 = vpop.eup %3099  ;;  %v5135_v12 = vmul.f32 0.5, %v1745_v40  ;;  %v1734_v27 = vadd.f32 %v1718_v48, %v4782_v10 }
 0x160   : > { %v1793_v8 = vmul.f32 0.4, %v1769_v43  ;;  %v5140_v25 = vadd.f32 %v1624_v44, %v4883_v54  ;;  %v3102_v63 = vpop.eup %3101  ;;  %v1918_v52 = vadd.f32 %v3100_v53, %v1886_v38  ;;  %v1719_v6 = vadd.f32 %v1703_v33, %v1623_v41 }
 0x161   : > { %v1794_v39 = vmul.f32 0.4, %v1771_v3  ;;  %v1625_v20 = vrot.slane %v4958_v28, 7  ;;  %v1773_v30 = vmul.f32 0.6931472, %v3102_v63  ;;  %3111 = vlog2.f32 %v1734_v27 }
 0x162   : > { %v1809_v62 = vadd.f32 -1.9806975, %v1793_v8  ;;  %v1704_v9 = vadd.f32 %v1672_v23, %v5140_v25  ;;  %1934 = vst [vmem:[%s4044_s18 + $0x3e] sm:$0x4] %v1918_v52  ;;  %v5145_v43 = vmul.f32 0.5, %v1746_v2  ;;  %v1735_v48 = vadd.f32 %v1719_v6, %v4862_v55 }
 0x163   : > { %v1810_v40 = vadd.f32 -1.9806975, %v1794_v39  ;;  %v5149_v57 = vadd.f32 %v1625_v20, %v4958_v28  ;;  %v1795_v3 = vmul.f32 0.4, %v1773_v30  ;;  %v1673_v33 = vrot.slane %v4958_v28, 6 }
 0x164   : > { %v1832_v38 = vmul.f32 1.442695, %v1809_v62  ;;  %v1720_v41 = vadd.f32 %v1704_v9, %v1624_v44  ;;  %v1889_v27 = vrot.slane %v5135_v12, 6  ;;  %v1747_v8 = vld [vmem:[%s3577_s4 + $0x90] sm:$0x1]  ;;  %3113 = vlog2.f32 %v1735_v48 }
 0x165   : > { %v3104_v53 = vpop.eup %3103  ;;  %v1834_v23 = vmul.f32 1.442695, %v1810_v40  ;;  %v1946_v2 = vadd.f32 %v4984_v42, %v3778_v32  ;;  %v1811_v39 = vadd.f32 -1.9806975, %v1795_v3  ;;  %v1890_v44 = vrot.slane %v5145_v43, 6 }
 0x166   : > { %v3106_v63 = vpop.eup %3105  ;;  %v1919_v52 = vadd.f32 %v3104_v53, %v1887_v46  ;;  %3115 = vpow2.f32 %v1832_v38  ;;  %v1736_v6 = vadd.f32 %v1720_v41, %v4883_v54  ;;  %v1748_v62 = vld [vmem:[%s3577_s4 + $0xa0] sm:$0x1]  ;;  %v1705_v12 = vadd.f32 %v1673_v33, %v5149_v57  ;;  %v1749_v41 = vld [vmem:[%s3577_s4 + $0xb0] sm:$0x1] }
 0x167   : > { %3117 = vpow2.f32 %v1834_v23  ;;  %v1775_v30 = vmul.f32 0.6931472, %v3106_v63  ;;  %v1836_v40 = vmul.f32 1.442695, %v1811_v39  ;;  %v5161_v48 = vmul.f32 0.5, %v1747_v8 }
 0x168   : > { %v3108_v9 = vpop.eup %3107  ;;  %1935 = vst [vmem:[%s4044_s18 + $0x4e] sm:$0x4] %v1919_v52  ;;  %3119 = vlog2.f32 %v1736_v6  ;;  %v5806_v42 = vrot.slane %v3778_v32, 1  ;;  %v1721_v43 = vadd.f32 %v1705_v12, %v1625_v20  ;;  %v1947_v23 = vadd.f32 %v5012_v16, %v3763_v26 }
 0x169   : > { %v3110_v38 = vpop.eup %3109  ;;  %v1796_v3 = vmul.f32 0.4, %v1775_v30  ;;  %v1777_v53 = vmul.f32 0.6931472, %v3108_v9  ;;  %3121 = vpow2.f32 %v1836_v40  ;;  %v5168_v63 = vmul.f32 0.5, %v1748_v62 }
 0x16a   : > { %v1978_v46 = vadd.f32 %v1946_v2, %v5806_v42  ;;  %v1920_v33 = vadd.f32 %v3110_v38, %v1888_v58  ;;  %v5807_v8 = vrot.slane %v3778_v32, 2  ;;  %v1737_v2 = vadd.f32 %v1721_v43, %v4958_v28 }
 0x16b   : > { %v1812_v39 = vadd.f32 -1.9806975, %v1796_v3  ;;  %v1797_v6 = vmul.f32 0.4, %v1777_v53  ;;  %v5808_v30 = vrot.slane %v3763_v26, 1  ;;  %v3112_v9 = vpop.eup %3111  ;;  %v1891_v20 = vrot.slane %v5161_v48, 6 }
 0x16c   : > { %v2010_v52 = vadd.f32 %v1978_v46, %v5807_v8  ;;  %1936 = vst [vmem:[%s4044_s18 + $0x5e] sm:$0x4] %v1920_v33  ;;  %v5178_v16 = vmul.f32 0.5, %v1749_v41  ;;  %v1948_v32 = vadd.f32 %v5016_v36, %v3852_v35  ;;  %v1779_v12 = vmul.f32 0.6931472, %v3112_v9 }
 0x16d   : > { %v1979_v42 = vadd.f32 %v1947_v23, %v5808_v30  ;;  %v1838_v58 = vmul.f32 1.442695, %v1812_v39  ;;  %v1813_v62 = vadd.f32 -1.9806975, %v1797_v6  ;;  %v1892_v40 = vrot.slane %v5168_v63, 6 }
 0x16e   : > { %3123 = vlog2.f32 %v2010_v52  ;;  %v5183_v46 = vmul.f32 0.5, %v1750_v49  ;;  %v5809_v38 = vrot.slane %v3763_v26, 2  ;;  %v5810_v48 = vrot.slane %v3852_v35, 1  ;;  %v3114_v41 = vpop.eup %3113  ;;  %v1751_v36 = vld [vmem:[%s3577_s4 + $0xd0] sm:$0x1] }
 0x16f   : > { %3125 = vlog2.f32 %v1737_v2  ;;  %v1840_v43 = vmul.f32 1.442695, %v1813_v62  ;;  %v1798_v23 = vmul.f32 0.4, %v1779_v12  ;;  %v1949_v33 = vadd.f32 %v5026_v51, %v3940_v45 }
 0x170   : > { %v2011_v3 = vadd.f32 %v1979_v42, %v5809_v38  ;;  %v1980_v53 = vadd.f32 %v1948_v32, %v5810_v48  ;;  %3127 = vpow2.f32 %v1838_v58  ;;  %v3116_v8 = vpop.eup %3115  ;;  %v1893_v49 = vrot.slane %v5178_v16, 6  ;;  %v1752_v42 = vld [vmem:[%s3577_s4 + $0xe0] sm:$0x1] }
 0x171   : > { %v1781_v52 = vmul.f32 0.6931472, %v3114_v41  ;;  %v5811_v26 = vrot.slane %v3852_v35, 2  ;;  %v3118_v6 = vpop.eup %3117  ;;  %v1921_v2 = vadd.f32 %v3116_v8, %v1889_v27  ;;  %v1814_v30 = vadd.f32 -1.9806975, %v1798_v23 }
 0x172   : > { %3129 = vlog2.f32 %v2011_v3  ;;  %v5812_v9 = vrot.slane %v3940_v45, 1  ;;  %v3120_v51 = vpop.eup %3119  ;;  %v1922_v58 = vadd.f32 %v3118_v6, %v1890_v44  ;;  %v5198_v12 = vmul.f32 0.5, %v1751_v36  ;;  %v1753_v23 = vld [vmem:[%s3577_s4 + $0xf0] sm:$0x1] }
 0x173   : > { %v2012_v39 = vadd.f32 %v1980_v53, %v5811_v26  ;;  %3131 = vpow2.f32 %v1840_v43  ;;  %v1799_v62 = vmul.f32 0.4, %v1781_v52  ;;  %1937 = vst [vmem:[%s4044_s18 + $0x6e] sm:$0x4] %v1921_v2  ;;  %v1842_v38 = vmul.f32 1.442695, %v1814_v30  ;;  %v3122_v53 = vpop.eup %3121 }
 0x174   : > { %v1981_v32 = vadd.f32 %v1949_v33, %v5812_v9  ;;  %v1783_v35 = vmul.f32 0.6931472, %v3120_v51  ;;  %v5813_v3 = vrot.slane %v3940_v45, 2  ;;  %v1950_v48 = vadd.f32 %v5037_v60, %v4028_v59  ;;  %1938 = vst [vmem:[%s4044_s18 + $0x7e] sm:$0x4] %v1922_v58 }
 0x175   : > { %3133 = vlog2.f32 %v2012_v39  ;;  %v1894_v41 = vrot.slane %v5183_v46, 6  ;;  %v1815_v43 = vadd.f32 -1.9806975, %v1799_v62  ;;  %v5207_v44 = vmul.f32 0.5, %v1752_v42  ;;  %v2029_v46 = vld [vmem:[%s3577_s4 + $0x31] sm:$0x1] }
 0x176   : > { %v2013_v27 = vadd.f32 %v1981_v32, %v5813_v3  ;;  %v1951_v36 = vadd.f32 %v5045_v29, %v4141_v13  ;;  %v1923_v33 = vadd.f32 %v3122_v53, %v1891_v20  ;;  %3135 = vpow2.f32 %v1842_v38 }
 0x177   : > { %v1800_v8 = vmul.f32 0.4, %v1783_v35  ;;  %v5814_v45 = vrot.slane %v4028_v59, 1  ;;  %v1844_v60 = vmul.f32 1.442695, %v1815_v43  ;;  %v1895_v39 = vrot.slane %v5198_v12, 6 }
 0x178   : > { %v3124_v26 = vpop.eup %3123  ;;  %3137 = vlog2.f32 %v2013_v27  ;;  %v5815_v6 = vrot.slane %v4141_v13, 1  ;;  %1939 = vst [vmem:[%s4044_s18 + $0x8e] sm:$0x4] %v1923_v33  ;;  %v5218_v9 = vmul.f32 0.5, %v1753_v23  ;;  %v5816_v20 = vrot.slane %v4028_v59, 2 }
 0x179   : > { %v1982_v52 = vadd.f32 %v1950_v48, %v5814_v45  ;;  %v3126_v30 = vpop.eup %3125  ;;  %v1816_v42 = vadd.f32 -1.9806975, %v1800_v8  ;;  %v2043_v29 = vmul.f32 0.6931472, %v3124_v26  ;;  %3139 = vpow2.f32 %v1844_v60  ;;  %v2026_v23 = vld [vmem:[%s3577_s4 + $0x1] sm:$0x1] }
 0x17a   : > { %v1983_v2 = vadd.f32 %v1951_v36, %v5815_v6  ;;  %v1785_v51 = vmul.f32 0.6931472, %v3126_v30  ;;  %v5817_v58 = vrot.slane %v4141_v13, 2  ;;  %v1952_v38 = vadd.f32 %v5053_v19, %v4249_v31  ;;  %v3128_v35 = vpop.eup %3127 }
 0x17b   : > { %v2014_v32 = vadd.f32 %v1982_v52, %v5816_v20  ;;  %v1846_v3 = vmul.f32 1.442695, %v1816_v42  ;;  %v1896_v27 = vrot.slane %v5207_v44, 6  ;;  %v2074_v48 = vmul.f32 0.4, %v2043_v29 }
 0x17c   : > { %v2015_v62 = vadd.f32 %v1983_v2, %v5817_v58  ;;  %v3130_v53 = vpop.eup %3129  ;;  %v1924_v59 = vadd.f32 %v3128_v35, %v1892_v40  ;;  %v1801_v43 = vmul.f32 0.4, %v1785_v51  ;;  %v5818_v13 = vrot.slane %v4249_v31, 1  ;;  %v2027_v40 = vld [vmem:[%s3577_s4 + $0x11] sm:$0x1] }
 0x17d   : > { %3141 = vlog2.f32 %v2014_v32  ;;  %v3132_v33 = vpop.eup %3131  ;;  %v1897_v19 = vrot.slane %v5218_v9, 6  ;;  %v2090_v8 = vadd.f32 -1.9806975, %v2074_v48  ;;  %v2045_v45 = vmul.f32 0.6931472, %v3130_v53 }
 0x17e   : > { %3143 = vlog2.f32 %v2015_v62  ;;  %v1984_v36 = vadd.f32 %v1952_v38, %v5818_v13  ;;  %1940 = vst [vmem:[%s4044_s18 + $0x9e] sm:$0x4] %v1924_v59  ;;  %v1925_v26 = vadd.f32 %v3132_v33, %v1893_v49  ;;  %v1817_v63 = vadd.f32 -1.9806975, %v1801_v43  ;;  %v2028_v62 = vld [vmem:[%s3577_s4 + $0x21] sm:$0x1] }
 0x17f   : > { %3145 = vpow2.f32 %v1846_v3  ;;  %v3134_v52 = vpop.eup %3133  ;;  %v5819_v60 = vrot.slane %v4249_v31, 2  ;;  %v1953_v2 = vadd.f32 %v5073_v11, %v4320_v34  ;;  %v2106_v30 = vmul.f32 1.442695, %v2090_v8 }
 0x180   : > { %v2075_v42 = vmul.f32 0.4, %v2045_v45  ;;  %v2047_v29 = vmul.f32 0.6931472, %v3134_v52  ;;  %v1954_v20 = vadd.f32 %v5076_v5, %v4432_v21  ;;  %1941 = vst [vmem:[%s4044_s18 + $0xae] sm:$0x4] %v1925_v26  ;;  %v3136_v58 = vpop.eup %3135 }
 0x181   : > { %v2016_v6 = vadd.f32 %v1984_v36, %v5819_v60  ;;  %v1848_v32 = vmul.f32 1.442695, %v1817_v63  ;;  %v5244_v51 = vmul.f32 0.5, %v2026_v23  ;;  %v5820_v16 = vrot.slane %v4320_v34, 1 }
 0x182   : > { %v2091_v31 = vadd.f32 -1.9806975, %v2075_v42  ;;  %v2076_v11 = vmul.f32 0.4, %v2047_v29  ;;  %v5821_v38 = vrot.slane %v4432_v21, 1  ;;  %v3138_v3 = vpop.eup %3137  ;;  %v1926_v5 = vadd.f32 %v3136_v58, %v1894_v41 }
 0x183   : > { %3147 = vlog2.f32 %v2016_v6  ;;  %v1985_v49 = vadd.f32 %v1953_v2, %v5820_v16  ;;  %v5253_v48 = vmul.f32 0.5, %v2027_v40  ;;  %v5822_v53 = vrot.slane %v4320_v34, 2  ;;  %v3140_v8 = vpop.eup %3139  ;;  %v2030_v6 = vld [vmem:[%s3577_s4 + $0x41] sm:$0x1] }
 0x184   : > { %3149 = vpow2.f32 %v2106_v30  ;;  %v1986_v35 = vadd.f32 %v1954_v20, %v5821_v38  ;;  %v2108_v43 = vmul.f32 1.442695, %v2091_v31  ;;  %v2092_v23 = vadd.f32 -1.9806975, %v2076_v11  ;;  %1942 = vst [vmem:[%s4044_s18 + $0xbe] sm:$0x4] %v1926_v5 }
 0x185   : > { %3151 = vpow2.f32 %v1848_v32  ;;  %v2017_v59 = vadd.f32 %v1985_v49, %v5822_v53  ;;  %v2049_v13 = vmul.f32 0.6931472, %v3138_v3  ;;  %v5823_v36 = vrot.slane %v4432_v21, 2 }
 0x186   : > { %v2170_v45 = vrot.slane %v5244_v51, 7  ;;  %v5261_v52 = vmul.f32 0.5, %v2028_v62  ;;  %v1955_v34 = vadd.f32 %v5083_v1, %v4522_v0  ;;  %v1927_v26 = vadd.f32 %v3140_v8, %v1895_v39 }
 0x187   : > { %v2018_v33 = vadd.f32 %v1986_v35, %v5823_v36  ;;  %3153 = vlog2.f32 %v2017_v59  ;;  %v3142_v41 = vpop.eup %3141  ;;  %v2110_v21 = vmul.f32 1.442695, %v2092_v23  ;;  %v2077_v63 = vmul.f32 0.4, %v2049_v13  ;;  %v2032_v23 = vld [vmem:[%s3577_s4 + $0x61] sm:$0x1] }
 0x188   : > { %3155 = vpow2.f32 %v2108_v43  ;;  %v3144_v40 = vpop.eup %3143  ;;  %v2171_v60 = vrot.slane %v5253_v48, 7  ;;  %v2051_v2 = vmul.f32 0.6931472, %v3142_v41  ;;  %v5824_v30 = vrot.slane %v4522_v0, 1  ;;  %1943 = vst [vmem:[%s4044_s18 + $0xce] sm:$0x4] %v1927_v26 }
 0x189   : > { %3157 = vlog2.f32 %v2018_v33  ;;  %v3146_v29 = vpop.eup %3145  ;;  %v2093_v1 = vadd.f32 -1.9806975, %v2077_v63  ;;  %v5273_v12 = vmul.f32 0.5, %v2029_v46  ;;  %v2053_v39 = vmul.f32 0.6931472, %v3144_v40 }
 0x18a   : > { %v1987_v42 = vadd.f32 %v1955_v34, %v5824_v30  ;;  %3159 = vpow2.f32 %v2110_v21  ;;  %v1928_v20 = vadd.f32 %v3146_v29, %v1896_v27  ;;  %v2078_v32 = vmul.f32 0.4, %v2051_v2  ;;  %v2031_v27 = vld [vmem:[%s3577_s4 + $0x51] sm:$0x1] }
 0x18b   : > { %v5825_v51 = vrot.slane %v4522_v0, 2  ;;  %v1956_v49 = vadd.f32 %v5096_v4, %v4607_v24  ;;  %v2172_v58 = vrot.slane %v5261_v52, 7  ;;  %v2112_v31 = vmul.f32 1.442695, %v2093_v1  ;;  %v2033_v29 = vld [vmem:[%s3577_s4 + $0x71] sm:$0x1] }
 0x18c   : > { %v2079_v62 = vmul.f32 0.4, %v2053_v39  ;;  %v1957_v11 = vadd.f32 %v5104_v61, %v4696_v50  ;;  %1944 = vst [vmem:[%s4044_s18 + $0xde] sm:$0x4] %v1928_v20  ;;  %v2094_v35 = vadd.f32 -1.9806975, %v2078_v32  ;;  %v1958_v63 = vadd.f32 %v5117_v22, %v4782_v10 }
 0x18d   : > { %v2019_v16 = vadd.f32 %v1987_v42, %v5825_v51  ;;  %v3148_v38 = vpop.eup %3147  ;;  %v5285_v44 = vmul.f32 0.5, %v2030_v6  ;;  %v5826_v0 = vrot.slane %v4607_v24, 1  ;;  %v2173_v4 = vrot.slane %v5273_v12, 7 }
 0x18e   : > { %v3150_v5 = vpop.eup %3149  ;;  %v2095_v48 = vadd.f32 -1.9806975, %v2079_v62  ;;  %v2055_v53 = vmul.f32 0.6931472, %v3148_v38  ;;  %v2114_v43 = vmul.f32 1.442695, %v2094_v35  ;;  %v1959_v6 = vadd.f32 %v5128_v15, %v4862_v55 }
 0x18f   : > { %3161 = vlog2.f32 %v2019_v16  ;;  %v1988_v3 = vadd.f32 %v1956_v49, %v5826_v0  ;;  %v3152_v59 = vpop.eup %3151  ;;  %v2202_v61 = vadd.f32 %v3150_v5, %v2170_v45  ;;  %v5827_v13 = vrot.slane %v4607_v24, 2  ;;  %v2034_v62 = vld [vmem:[%s3577_s4 + $0x81] sm:$0x1] }
 0x190   : > { %3163 = vpow2.f32 %v2112_v31  ;;  %v5828_v33 = vrot.slane %v4696_v50, 1  ;;  %v1929_v52 = vadd.f32 %v3152_v59, %v1897_v19  ;;  %v2116_v46 = vmul.f32 1.442695, %v2095_v48 }
 0x191   : > { %v2020_v36 = vadd.f32 %v1988_v3, %v5827_v13  ;;  %v5298_v34 = vmul.f32 0.5, %v2031_v27  ;;  %v2080_v41 = vmul.f32 0.4, %v2055_v53  ;;  %v3154_v26 = vpop.eup %3153  ;;  %2218 = vst [vmem:[%s4044_s18] sm:$0x2] %v2202_v61  ;;  %3165 = vpow2.f32 %v2114_v43  ;;  %v2035_v27 = vld [vmem:[%s3577_s4 + $0x91] sm:$0x1] }
 0x192   : > { %v1989_v8 = vadd.f32 %v1957_v11, %v5828_v33  ;;  %v2174_v45 = vrot.slane %v5285_v44, 7  ;;  %v5829_v21 = vrot.slane %v4696_v50, 2  ;;  %v3156_v40 = vpop.eup %3155  ;;  %1945 = vst [vmem:[%s4044_s18 + $0xee] sm:$0x4] %v1929_v52  ;;  %3167 = vpow2.f32 %v2116_v46 }
 0x193   : > { %v2096_v9 = vadd.f32 -1.9806975, %v2080_v41  ;;  %v2057_v19 = vmul.f32 0.6931472, %v3154_v26  ;;  %v3158_v2 = vpop.eup %3157  ;;  %v2203_v30 = vadd.f32 %v3156_v40, %v2171_v60  ;;  %v5309_v42 = vmul.f32 0.5, %v2032_v23 }
 0x194   : > { %v2021_v24 = vadd.f32 %v1989_v8, %v5829_v21  ;;  %3169 = vlog2.f32 %v2020_v36  ;;  %v5830_v50 = vrot.slane %v4782_v10, 1  ;;  %v3160_v22 = vpop.eup %3159  ;;  %v2059_v20 = vmul.f32 0.6931472, %v3158_v2  ;;  %v2036_v23 = vld [vmem:[%s3577_s4 + $0xa1] sm:$0x1] }
 0x195   : > { %v2118_v12 = vmul.f32 1.442695, %v2096_v9  ;;  %v2081_v39 = vmul.f32 0.4, %v2057_v19  ;;  %2219 = vst [vmem:[%s4044_s18 + $0x10] sm:$0x2] %v2203_v30  ;;  %v2204_v32 = vadd.f32 %v3160_v22, %v2172_v58  ;;  %v1960_v38 = vadd.f32 %v5140_v25, %v4883_v54 }
 0x196   : > { %v1990_v1 = vadd.f32 %v1958_v63, %v5830_v50  ;;  %3171 = vlog2.f32 %v2021_v24  ;;  %v2175_v15 = vrot.slane %v5298_v34, 7  ;;  %v5831_v60 = vrot.slane %v4782_v10, 2  ;;  %v2037_v9 = vld [vmem:[%s3577_s4 + $0xb1] sm:$0x1]  ;;  %v2038_v50 = vld [vmem:[%s3577_s4 + $0xc1] sm:$0x1] }
 0x197   : > { %v5832_v16 = vrot.slane %v4862_v55, 1  ;;  %3173 = vpow2.f32 %v2118_v12  ;;  %v2097_v31 = vadd.f32 -1.9806975, %v2081_v39  ;;  %v2082_v11 = vmul.f32 0.4, %v2059_v20  ;;  %v5838_v12 = vld [vmem:[#allocation21_spill] sm:$0xff] }
 0x198   : > { %v2022_v51 = vadd.f32 %v1990_v1, %v5831_v60  ;;  %2220 = vst [vmem:[%s4044_s18 + $0x20] sm:$0x2] %v2204_v32  ;;  %v2176_v58 = vrot.slane %v5309_v42, 7  ;;  %v5325_v44 = vmul.f32 0.5, %v2033_v29  ;;  %v5833_v10 = vrot.slane %v4862_v55, 2 }
 0x199   : > { %v1991_v49 = vadd.f32 %v1959_v6, %v5832_v16  ;;  %v3162_v35 = vpop.eup %3161  ;;  %v2120_v5 = vmul.f32 1.442695, %v2097_v31  ;;  %v2098_v48 = vadd.f32 -1.9806975, %v2082_v11  ;;  %v5834_v59 = vrot.slane %v4883_v54, 1  ;;  %v5839_v11 = vld [vmem:[#allocation24_spill] sm:$0xff] }
 0x19a   : > { %3175 = vlog2.f32 %v2022_v51  ;;  %v3164_v3 = vpop.eup %3163  ;;  %v2061_v53 = vmul.f32 0.6931472, %v3162_v35  ;;  %v5332_v43 = vmul.f32 0.5, %v2034_v62  ;;  %v1961_v13 = vadd.f32 %v5149_v57, %v4958_v28  ;;  %v2039_v22 = vld [vmem:[%s3577_s4 + $0xd1] sm:$0x1] }
 0x19b   : > { %v2023_v0 = vadd.f32 %v1991_v49, %v5833_v10  ;;  %v1992_v61 = vadd.f32 %v1960_v38, %v5834_v59  ;;  %v2205_v25 = vadd.f32 %v3164_v3, %v2173_v4  ;;  %v2122_v36 = vmul.f32 1.442695, %v2098_v48  ;;  %v3166_v52 = vpop.eup %3165  ;;  %v2040_v51 = vld [vmem:[%s3577_s4 + $0xe1] sm:$0x1] }
 0x19c   : > { %v2083_v55 = vmul.f32 0.4, %v2061_v53  ;;  %v5835_v33 = vrot.slane %v4883_v54, 2  ;;  %v2177_v46 = vrot.slane %v5325_v44, 7  ;;  %v5341_v4 = vmul.f32 0.5, %v2035_v27  ;;  %v3168_v26 = vpop.eup %3167  ;;  %v5841_v10 = vld [vmem:[#allocation29_spill] sm:$0xff] }
 0x19d   : > { %3177 = vlog2.f32 %v2023_v0  ;;  %2221 = vst [vmem:[%s4044_s18 + $0x30] sm:$0x2] %v2205_v25  ;;  %v5836_v34 = vrot.slane %v4958_v28, 1  ;;  %v2234_v57 = vadd.f32 %v3855_v17, %v3801_v47  ;;  %v2206_v21 = vadd.f32 %v3166_v52, %v2174_v45  ;;  %v5842_v0 = vld [vmem:[#allocation31_spill] sm:$0xff] }
 0x19e   : > { %3179 = vpow2.f32 %v2120_v5  ;;  %v2024_v8 = vadd.f32 %v1992_v61, %v5835_v33  ;;  %v2099_v24 = vadd.f32 -1.9806975, %v2083_v55  ;;  %v5347_v54 = vmul.f32 0.5, %v2036_v23  ;;  %v3170_v63 = vpop.eup %3169  ;;  %v2041_v55 = vld [vmem:[%s3577_s4 + $0xf1] sm:$0x1]  ;;  %v5843_v33 = vld [vmem:[#allocation34_spill] sm:$0xff] }
 0x19f   : > { %v1993_v41 = vadd.f32 %v1961_v13, %v5836_v34  ;;  %3181 = vpow2.f32 %v2122_v36  ;;  %v2207_v40 = vadd.f32 %v3168_v26, %v2175_v15  ;;  %v5837_v19 = vrot.slane %v4958_v28, 2  ;;  %2222 = vst [vmem:[%s4044_s18 + $0x40] sm:$0x2] %v2206_v21 }
 0x1a0   : > { %3183 = vlog2.f32 %v2024_v8  ;;  %v2235_v2 = vadd.f32 %v3859_v14, %v3790_v18  ;;  %v3172_v30 = vpop.eup %3171  ;;  %v2178_v47 = vrot.slane %v5332_v43, 7  ;;  %v2124_v17 = vmul.f32 1.442695, %v2099_v24  ;;  %v5844_v8 = vld [vmem:[#allocation36_spill] sm:$0xff] }
 0x1a1   : > { %v2025_v6 = vadd.f32 %v1993_v41, %v5837_v19  ;;  %v2063_v45 = vmul.f32 0.6931472, %v3170_v63  ;;  %3185 = vlog2.f32 %v2234_v57  ;;  %2223 = vst [vmem:[%s4044_s18 + $0x50] sm:$0x2] %v2207_v40  ;;  %v2179_v42 = vrot.slane %v5341_v4, 7  ;;  %v3174_v1 = vpop.eup %3173 }
 0x1a2   : > { %v2065_v29 = vmul.f32 0.6931472, %v3172_v30  ;;  %v2236_v28 = vadd.f32 %v3911_v7, %v3873_v37  ;;  %v5361_v14 = vmul.f32 0.5, %v2037_v9  ;;  %v2237_v39 = vadd.f32 %v5838_v12, %v3988_v56  ;;  %v5840_v56 = vld [vmem:[#allocation26_spill] sm:$0xff] }
 0x1a3   : > { %3187 = vlog2.f32 %v2025_v6  ;;  %v2084_v18 = vmul.f32 0.4, %v2063_v45  ;;  %v2208_v32 = vadd.f32 %v3174_v1, %v2176_v58  ;;  %v2180_v15 = vrot.slane %v5347_v54, 7  ;;  %v2250_v63 = vld [vmem:[%s3577_s4 + $0xe] sm:$0x1] }
 0x1a4   : > { %3189 = vpow2.f32 %v2124_v17  ;;  %v3176_v20 = vpop.eup %3175  ;;  %v2085_v60 = vmul.f32 0.4, %v2065_v29  ;;  %v5368_v37 = vmul.f32 0.5, %v2038_v50  ;;  %v5371_v62 = vmul.f32 0.5, %v2039_v22  ;;  %v5845_v29 = vld [vmem:[#allocation39_spill] sm:$0xff]  ;;  %v5846_v50 = vld [vmem:[#allocation41_spill] sm:$0xff] }
 0x1a5   : > { %3191 = vlog2.f32 %v2235_v2  ;;  %v2100_v16 = vadd.f32 -1.9806975, %v2084_v18  ;;  %v2067_v49 = vmul.f32 0.6931472, %v3176_v20  ;;  %2224 = vst [vmem:[%s4044_s18 + $0x60] sm:$0x2] %v2208_v32  ;;  %v2238_v38 = vadd.f32 %v5840_v56, %v5839_v11 }
 0x1a6   : > { %3193 = vlog2.f32 %v2236_v28  ;;  %v2101_v31 = vadd.f32 -1.9806975, %v2085_v60  ;;  %v2239_v3 = vadd.f32 %v5842_v0, %v5841_v10  ;;  %v5377_v53 = vmul.f32 0.5, %v2040_v51  ;;  %v5848_v11 = vld [vmem:[#allocation46_spill] sm:$0xff] }
 0x1a7   : > { %v3178_v7 = vpop.eup %3177  ;;  %3195 = vlog2.f32 %v2237_v39  ;;  %v2126_v58 = vmul.f32 1.442695, %v2100_v16  ;;  %v2086_v44 = vmul.f32 0.4, %v2067_v49  ;;  %v2181_v61 = vrot.slane %v5361_v14, 7 }
 0x1a8   : > { %v3180_v35 = vpop.eup %3179  ;;  %v2069_v27 = vmul.f32 0.6931472, %v3178_v7  ;;  %v2128_v48 = vmul.f32 1.442695, %v2101_v31  ;;  %3197 = vlog2.f32 %v2238_v38  ;;  %v2182_v36 = vrot.slane %v5368_v37, 7  ;;  %v5847_v31 = vld [vmem:[#allocation44_spill] sm:$0xff] }
 0x1a9   : > { %v2209_v5 = vadd.f32 %v3180_v35, %v2177_v46  ;;  %v3182_v59 = vpop.eup %3181  ;;  %3199 = vpow2.f32 %v2126_v58  ;;  %v2102_v25 = vadd.f32 -1.9806975, %v2086_v44  ;;  %v2240_v52 = vadd.f32 %v5844_v8, %v5843_v33 }
 0x1aa   : > { %v2087_v43 = vmul.f32 0.4, %v2069_v27  ;;  %v3184_v23 = vpop.eup %3183  ;;  %v2210_v13 = vadd.f32 %v3182_v59, %v2178_v47  ;;  %3201 = vpow2.f32 %v2128_v48  ;;  %v2183_v21 = vrot.slane %v5371_v62, 7  ;;  %v2251_v59 = vld [vmem:[%s3577_s4 + $0x1e] sm:$0x1] }
 0x1ab   : > { %2225 = vst [vmem:[%s4044_s18 + $0x70] sm:$0x2] %v2209_v5  ;;  %v3186_v46 = vpop.eup %3185  ;;  %v2130_v34 = vmul.f32 1.442695, %v2102_v25  ;;  %v2071_v57 = vmul.f32 0.6931472, %v3184_v23  ;;  %3203 = vlog2.f32 %v2239_v3  ;;  %v2241_v28 = vadd.f32 %v5846_v50, %v5845_v29 }
 0x1ac   : > { %v2103_v41 = vadd.f32 -1.9806975, %v2087_v43  ;;  %2226 = vst [vmem:[%s4044_s18 + $0x80] sm:$0x2] %v2210_v13  ;;  %v2184_v24 = vrot.slane %v5377_v53, 7  ;;  %3205 = vlog2.f32 %v2240_v52  ;;  %v5391_v17 = vmul.f32 0.5, %v2041_v55 }
 0x1ad   : > { %v3188_v26 = vpop.eup %3187  ;;  %v2267_v40 = vmul.f32 0.6931472, %v3186_v46  ;;  %3207 = vpow2.f32 %v2130_v34  ;;  %v2088_v6 = vmul.f32 0.4, %v2071_v57  ;;  %v5396_v20 = vmul.f32 0.5, %v2250_v63  ;;  %v5849_v46 = vld [vmem:[#allocation49_spill] sm:$0xff] }
 0x1ae   : > { %v3190_v9 = vpop.eup %3189  ;;  %v2132_v19 = vmul.f32 1.442695, %v2103_v41  ;;  %v2073_v2 = vmul.f32 0.6931472, %v3188_v26  ;;  %v2242_v56 = vadd.f32 %v5848_v11, %v5847_v31  ;;  %v2253_v57 = vld [vmem:[%s3577_s4 + $0x3e] sm:$0x1] }
 0x1af   : > { %v3192_v30 = vpop.eup %3191  ;;  %v2211_v47 = vadd.f32 %v3190_v9, %v2179_v42  ;;  %v2298_v45 = vmul.f32 0.4, %v2267_v40  ;;  %v2104_v18 = vadd.f32 -1.9806975, %v2088_v6  ;;  %v2185_v9 = vrot.slane %v5391_v17, 7 }
 0x1b0   : > { %v3194_v1 = vpop.eup %3193  ;;  %3209 = vpow2.f32 %v2132_v19  ;;  %v2089_v14 = vmul.f32 0.4, %v2073_v2  ;;  %v2269_v22 = vmul.f32 0.6931472, %v3192_v30  ;;  %v2363_v19 = vmul.f32 0.5, %v2251_v59  ;;  %v5858_v59 = vld [vmem:[#allocation74_spill] sm:$0xff] }
 0x1b1   : > { %v3196_v12 = vpop.eup %3195  ;;  %2227 = vst [vmem:[%s4044_s18 + $0x90] sm:$0x2] %v2211_v47  ;;  %v2314_v39 = vadd.f32 -1.9806975, %v2298_v45  ;;  %v2271_v32 = vmul.f32 0.6931472, %v3194_v1  ;;  %3211 = vlog2.f32 %v2241_v28 }
 0x1b2   : > { %v2134_v4 = vmul.f32 1.442695, %v2104_v18  ;;  %v2105_v42 = vadd.f32 -1.9806975, %v2089_v14  ;;  %v2299_v60 = vmul.f32 0.4, %v2269_v22  ;;  %v3198_v51 = vpop.eup %3197 }
 0x1b3   : > { %v2330_v16 = vmul.f32 1.442695, %v2314_v39  ;;  %v2300_v49 = vmul.f32 0.4, %v2271_v32  ;;  %v2273_v7 = vmul.f32 0.6931472, %v3196_v12  ;;  %v3200_v38 = vpop.eup %3199 }
 0x1b4   : > { %3213 = vpow2.f32 %v2134_v4  ;;  %v2136_v35 = vmul.f32 1.442695, %v2105_v42  ;;  %v2315_v58 = vadd.f32 -1.9806975, %v2299_v60  ;;  %v2275_v44 = vmul.f32 0.6931472, %v3198_v51  ;;  %v3202_v27 = vpop.eup %3201 }
 0x1b5   : > { %v2212_v10 = vadd.f32 %v3200_v38, %v2180_v15  ;;  %3215 = vpow2.f32 %v2330_v16  ;;  %v2316_v0 = vadd.f32 -1.9806975, %v2300_v49  ;;  %v2301_v3 = vmul.f32 0.4, %v2273_v7  ;;  %v3204_v5 = vpop.eup %3203  ;;  %v2252_v15 = vld [vmem:[%s3577_s4 + $0x2e] sm:$0x1] }
 0x1b6   : > { %v2213_v48 = vadd.f32 %v3202_v27, %v2181_v61  ;;  %3217 = vpow2.f32 %v2136_v35  ;;  %v2332_v25 = vmul.f32 1.442695, %v2315_v58  ;;  %v2302_v43 = vmul.f32 0.4, %v2275_v44  ;;  %v3206_v23 = vpop.eup %3205  ;;  %v5850_v61 = vld [vmem:[#allocation51_spill] sm:$0xff]  ;;  %v5851_v14 = vld [vmem:[#allocation54_spill] sm:$0xff] }
 0x1b7   : > { %2228 = vst [vmem:[%s4044_s18 + $0xa0] sm:$0x2] %v2212_v10  ;;  %v2334_v13 = vmul.f32 1.442695, %v2316_v0  ;;  %v2317_v55 = vadd.f32 -1.9806975, %v2301_v3  ;;  %3219 = vlog2.f32 %v2242_v56  ;;  %v3208_v54 = vpop.eup %3207  ;;  %v2243_v34 = vadd.f32 %v5850_v61, %v5849_v46 }
 0x1b8   : > { %v2277_v33 = vmul.f32 0.6931472, %v3204_v5  ;;  %2229 = vst [vmem:[%s4044_s18 + $0xb0] sm:$0x2] %v2213_v48  ;;  %3221 = vpow2.f32 %v2332_v25  ;;  %v2318_v8 = vadd.f32 -1.9806975, %v2302_v43  ;;  %v2214_v41 = vadd.f32 %v3208_v54, %v2182_v36 }
 0x1b9   : > { %v2279_v52 = vmul.f32 0.6931472, %v3206_v23  ;;  %3223 = vpow2.f32 %v2334_v13  ;;  %v2336_v26 = vmul.f32 1.442695, %v2317_v55  ;;  %v2394_v37 = vrot.slane %v5396_v20, 4  ;;  %v5852_v22 = vld [vmem:[#allocation56_spill] sm:$0xff] }
 0x1ba   : > { %v2303_v63 = vmul.f32 0.4, %v2277_v33  ;;  %v3210_v40 = vpop.eup %3209  ;;  %v2338_v6 = vmul.f32 1.442695, %v2318_v8  ;;  %2230 = vst [vmem:[%s4044_s18 + $0xc0] sm:$0x2] %v2214_v41  ;;  %v2244_v12 = vadd.f32 %v5852_v22, %v5851_v14 }
 0x1bb   : > { %v2304_v2 = vmul.f32 0.4, %v2279_v52  ;;  %v3212_v30 = vpop.eup %3211  ;;  %v2215_v47 = vadd.f32 %v3210_v40, %v2183_v21  ;;  %3225 = vpow2.f32 %v2336_v26  ;;  %v2254_v36 = vld [vmem:[%s3577_s4 + $0x4e] sm:$0x1]  ;;  %v2364_v29 = vmul.f32 0.5, %v2252_v15  ;;  %v5853_v32 = vld [vmem:[#allocation59_spill] sm:$0xff] }
 0x1bc   : > { %v2319_v45 = vadd.f32 -1.9806975, %v2303_v63  ;;  %3227 = vpow2.f32 %v2338_v6  ;;  %v2281_v28 = vmul.f32 0.6931472, %v3212_v30  ;;  %v2365_v17 = vmul.f32 0.5, %v2253_v57  ;;  %v5854_v4 = vld [vmem:[#allocation61_spill] sm:$0xff] }
 0x1bd   : > { %v2320_v50 = vadd.f32 -1.9806975, %v2304_v2  ;;  %2231 = vst [vmem:[%s4044_s18 + $0xd0] sm:$0x2] %v2215_v47  ;;  %v2255_v1 = vld [vmem:[%s3577_s4 + $0x5e] sm:$0x1]  ;;  %3229 = vlog2.f32 %v2243_v34  ;;  %v2245_v42 = vadd.f32 %v5854_v4, %v5853_v32 }
 0x1be   : > { %v2340_v18 = vmul.f32 1.442695, %v2319_v45  ;;  %v3214_v62 = vpop.eup %3213  ;;  %v2395_v21 = vrot.slane %v2363_v19, 4  ;;  %v2305_v20 = vmul.f32 0.4, %v2281_v28  ;;  %v2366_v16 = vmul.f32 0.5, %v2254_v36 }
 0x1bf   : > { %v2342_v39 = vmul.f32 1.442695, %v2320_v50  ;;  %v3216_v60 = vpop.eup %3215  ;;  %v2216_v51 = vadd.f32 %v3214_v62, %v2184_v24  ;;  %v5855_v49 = vld [vmem:[#allocation64_spill] sm:$0xff]  ;;  %v5856_v7 = vld [vmem:[#allocation66_spill] sm:$0xff]  ;;  %v2396_v38 = vrot.slane %v2364_v29, 4  ;;  %v2397_v53 = vrot.slane %v2365_v17, 4 }
 0x1c0   : > { %3231 = vpow2.f32 %v2340_v18  ;;  %v2246_v31 = vadd.f32 %v5856_v7, %v5855_v49  ;;  %v3218_v11 = vpop.eup %3217  ;;  %v2426_v56 = vadd.f32 %v3216_v60, %v2394_v37  ;;  %v2256_v35 = vld [vmem:[%s3577_s4 + $0x6e] sm:$0x1]  ;;  %v2321_v58 = vadd.f32 -1.9806975, %v2305_v20  ;;  %v2257_v0 = vld [vmem:[%s3577_s4 + $0x7e] sm:$0x1] }
 0x1c1   : > { %3233 = vpow2.f32 %v2342_v39  ;;  %v3220_v44 = vpop.eup %3219  ;;  %2232 = vst [vmem:[%s4044_s18 + $0xe0] sm:$0x2] %v2216_v51  ;;  %v2217_v27 = vadd.f32 %v3218_v11, %v2185_v9  ;;  %v2367_v24 = vmul.f32 0.5, %v2255_v1  ;;  %v5857_v48 = vld [vmem:[#allocation69_spill] sm:$0xff]  ;;  %v2398_v13 = vrot.slane %v2366_v16, 4  ;;  %v5859_v8 = vld [vmem:[#allocation72_spill] sm:$0xff] }
 0x1c2   : > { %3235 = vlog2.f32 %v2244_v12  ;;  %v3222_v10 = vpop.eup %3221  ;;  %2442 = vst [vmem:[%s4044_s18 + $0xa] sm:$0x10] %v2426_v56  ;;  %v2344_v3 = vmul.f32 1.442695, %v2321_v58  ;;  %v2283_v5 = vmul.f32 0.6931472, %v3220_v44  ;;  %v2247_v25 = vadd.f32 %v5858_v59, %v5857_v48 }
 0x1c3   : > { %3237 = vlog2.f32 %v2245_v42  ;;  %v3224_v43 = vpop.eup %3223  ;;  %2233 = vst [vmem:[%s4044_s18 + $0xf0] sm:$0x2] %v2217_v27  ;;  %v2427_v23 = vadd.f32 %v3222_v10, %v2395_v21  ;;  %v2368_v55 = vmul.f32 0.5, %v2256_v35  ;;  %v2258_v33 = vld [vmem:[%s3577_s4 + $0x8e] sm:$0x1]  ;;  %v5860_v52 = vld [vmem:[#allocation76_spill] sm:$0xff] }
 0x1c4   : > { %3239 = vlog2.f32 %v2246_v31  ;;  %v2428_v54 = vadd.f32 %v3224_v43, %v2396_v38  ;;  %v2306_v15 = vmul.f32 0.4, %v2283_v5  ;;  %v2248_v46 = vadd.f32 %v5860_v52, %v5859_v8  ;;  %v2259_v57 = vld [vmem:[%s3577_s4 + $0x9e] sm:$0x1]  ;;  %v5861_v26 = vld [vmem:[#allocation79_spill] sm:$0xff]  ;;  %v5862_v63 = vld [vmem:[#allocation81_spill] sm:$0xff] }
 0x1c5   : > { %3241 = vpow2.f32 %v2344_v3  ;;  %v3226_v61 = vpop.eup %3225  ;;  %2443 = vst [vmem:[%s4044_s18 + $0x1a] sm:$0x10] %v2427_v23  ;;  %v2399_v34 = vrot.slane %v2367_v24, 4  ;;  %v2369_v41 = vmul.f32 0.5, %v2257_v0  ;;  %v2249_v40 = vadd.f32 %v5862_v63, %v5861_v26  ;;  %v2260_v36 = vld [vmem:[%s3577_s4 + $0xae] sm:$0x1] }
 0x1c6   : > { %3243 = vlog2.f32 %v2247_v25  ;;  %v3228_v9 = vpop.eup %3227  ;;  %2444 = vst [vmem:[%s4044_s18 + $0x2a] sm:$0x10] %v2428_v54  ;;  %v2429_v19 = vadd.f32 %v3226_v61, %v2397_v53  ;;  %v2322_v6 = vadd.f32 -1.9806975, %v2306_v15  ;;  %v5442_v2 = vmul.f32 0.5, %v2258_v33  ;;  %v5863_v45 = vld [vmem:[#allocation12_spill] sm:$0xff] }
 0x1c7   : > { %3245 = vlog2.f32 %v2248_v46  ;;  %v3230_v30 = vpop.eup %3229  ;;  %v2430_v47 = vadd.f32 %v3228_v9, %v2398_v13  ;;  %v2400_v37 = vrot.slane %v2368_v55, 4  ;;  %v5864_v29 = vld [vmem:[#allocation13_spill] sm:$0xff]  ;;  %v5448_v1 = vmul.f32 0.5, %v2259_v57  ;;  %v5865_v22 = vld [vmem:[#allocation10_spill] sm:$0xff]  ;;  %v5866_v62 = vld [vmem:[#allocation11_spill] sm:$0xff] }
 0x1c8   : > { %3247 = vlog2.f32 %v2249_v40  ;;  %v2458_v50 = vadd.f32 %v5864_v29, %v5863_v45  ;;  %2445 = vst [vmem:[%s4044_s18 + $0x3a] sm:$0x10] %v2429_v19  ;;  %v2346_v28 = vmul.f32 1.442695, %v2322_v6  ;;  %v2285_v17 = vmul.f32 0.6931472, %v3230_v30 }
 0x1c9   : > { %2446 = vst [vmem:[%s4044_s18 + $0x4a] sm:$0x10] %v2430_v47  ;;  %v2401_v14 = vrot.slane %v2369_v41, 4  ;;  %v5867_v21 = vld [vmem:[#allocation14_spill] sm:$0xff]  ;;  %v5868_v20 = vld [vmem:[#allocation16_spill] sm:$0xff]  ;;  %v5869_v32 = vld [vmem:[#allocation17_spill] sm:$0xff] }
 0x1ca   : > { %v3232_v18 = vpop.eup %3231  ;;  %v2474_v12 = vadd.f32 %v2458_v50, %v5865_v22  ;;  %v2459_v39 = vadd.f32 %v5867_v21, %v5866_v62  ;;  %v2460_v4 = vadd.f32 %v5869_v32, %v5868_v20  ;;  %3249 = vpow2.f32 %v2346_v28  ;;  %v2261_v49 = vld [vmem:[%s3577_s4 + $0xbe] sm:$0x1]  ;;  %v5870_v56 = vld [vmem:[#allocation9_spill] sm:$0xff]  ;;  %v5871_v53 = vld [vmem:[#allocation15_spill] sm:$0xff] }
 0x1cb   : > { %v3234_v42 = vpop.eup %3233  ;;  %v2431_v60 = vadd.f32 %v3232_v18, %v2399_v34  ;;  %v2402_v51 = vrot.slane %v5442_v2, 4  ;;  %v2307_v16 = vmul.f32 0.4, %v2285_v17  ;;  %v5458_v11 = vmul.f32 0.5, %v2260_v36  ;;  %v2262_v5 = vld [vmem:[%s3577_s4 + $0xce] sm:$0x1] }
 0x1cc   : > { %v3236_v7 = vpop.eup %3235  ;;  %v2432_v31 = vadd.f32 %v3234_v42, %v2400_v37  ;;  %3251 = vlog2.f32 %v2474_v12  ;;  %v2475_v38 = vadd.f32 %v2459_v39, %v5870_v56  ;;  %v2403_v44 = vrot.slane %v5448_v1, 4  ;;  %v5872_v48 = vld [vmem:[#allocation19_spill] sm:$0xff]  ;;  %v5873_v59 = vld [vmem:[#allocation20_spill] sm:$0xff]  ;;  %v5874_v52 = vld [vmem:[#allocation18_spill] sm:$0xff] }
 0x1cd   : > { %v3238_v35 = vpop.eup %3237  ;;  %2447 = vst [vmem:[%s4044_s18 + $0x5a] sm:$0x10] %v2431_v60  ;;  %v2323_v58 = vadd.f32 -1.9806975, %v2307_v16  ;;  %v2287_v27 = vmul.f32 0.6931472, %v3236_v7  ;;  %v2476_v24 = vadd.f32 %v2460_v4, %v5871_v53  ;;  %v2461_v25 = vadd.f32 %v5873_v59, %v5872_v48 }
 0x1ce   : > { %v3240_v10 = vpop.eup %3239  ;;  %2448 = vst [vmem:[%s4044_s18 + $0x6a] sm:$0x10] %v2432_v31  ;;  %v2289_v0 = vmul.f32 0.6931472, %v3238_v35  ;;  %v5465_v3 = vmul.f32 0.5, %v2261_v49  ;;  %3253 = vlog2.f32 %v2475_v38  ;;  %v2404_v15 = vrot.slane %v5458_v11, 4 }
 0x1cf   : > { %v3242_v43 = vpop.eup %3241  ;;  %v2348_v23 = vmul.f32 1.442695, %v2323_v58  ;;  %v2308_v13 = vmul.f32 0.4, %v2287_v27  ;;  %v2291_v55 = vmul.f32 0.6931472, %v3240_v10  ;;  %3255 = vlog2.f32 %v2476_v24 }
 0x1d0   : > { %v3244_v33 = vpop.eup %3243  ;;  %v2433_v54 = vadd.f32 %v3242_v43, %v2401_v14  ;;  %v2309_v8 = vmul.f32 0.4, %v2289_v0  ;;  %v2477_v46 = vadd.f32 %v2461_v25, %v5874_v52  ;;  %v5473_v40 = vmul.f32 0.5, %v2262_v5  ;;  %v5875_v30 = vld [vmem:[#allocation23_spill] sm:$0xff]  ;;  %v5876_v47 = vld [vmem:[#allocation25_spill] sm:$0xff]  ;;  %v5877_v50 = vld [vmem:[#allocation28_spill] sm:$0xff] }
 0x1d1   : > { %v3246_v61 = vpop.eup %3245  ;;  %3257 = vpow2.f32 %v2348_v23  ;;  %v2324_v34 = vadd.f32 -1.9806975, %v2308_v13  ;;  %v2310_v41 = vmul.f32 0.4, %v2291_v55  ;;  %v2293_v57 = vmul.f32 0.6931472, %v3244_v33 }
 0x1d2   : > { %v3248_v26 = vpop.eup %3247  ;;  %2449 = vst [vmem:[%s4044_s18 + $0x7a] sm:$0x10] %v2433_v54  ;;  %v2325_v63 = vadd.f32 -1.9806975, %v2309_v8  ;;  %v2295_v9 = vmul.f32 0.6931472, %v3246_v61  ;;  %3259 = vlog2.f32 %v2477_v46  ;;  %v2462_v37 = vadd.f32 %v5876_v47, %v5875_v30 }
 0x1d3   : > { %v2350_v19 = vmul.f32 1.442695, %v2324_v34  ;;  %v2326_v6 = vadd.f32 -1.9806975, %v2310_v41  ;;  %v2311_v2 = vmul.f32 0.4, %v2293_v57 }
 0x1d4   : > { %v2352_v36 = vmul.f32 1.442695, %v2325_v63  ;;  %v2312_v45 = vmul.f32 0.4, %v2295_v9  ;;  %v2297_v29 = vmul.f32 0.6931472, %v3248_v26  ;;  %v3250_v18 = vpop.eup %3249 }
 0x1d5   : > { %v5878_v28 = vld [vmem:[#allocation30_spill] sm:$0xff]  ;;  %3261 = vpow2.f32 %v2350_v19  ;;  %v2354_v14 = vmul.f32 1.442695, %v2326_v6  ;;  %v2327_v22 = vadd.f32 -1.9806975, %v2311_v2  ;;  %v2434_v39 = vadd.f32 %v3250_v18, %v2402_v51  ;;  %v5880_v38 = vld [vmem:[#allocation27_spill] sm:$0xff] }
 0x1d6   : > { %v2463_v17 = vadd.f32 %v5878_v28, %v5877_v50  ;;  %v5879_v12 = vld [vmem:[#allocation22_spill] sm:$0xff]  ;;  %v3252_v21 = vpop.eup %3251  ;;  %3263 = vpow2.f32 %v2352_v36  ;;  %v2263_v20 = vld [vmem:[%s3577_s4 + $0xde] sm:$0x1]  ;;  %v2328_v32 = vadd.f32 -1.9806975, %v2312_v45  ;;  %v2405_v42 = vrot.slane %v5465_v3, 4 }
 0x1d7   : > { %v2478_v62 = vadd.f32 %v2462_v37, %v5879_v12  ;;  %v2313_v4 = vmul.f32 0.4, %v2297_v29  ;;  %3265 = vpow2.f32 %v2354_v14  ;;  %v2356_v60 = vmul.f32 1.442695, %v2327_v22  ;;  %2450 = vst [vmem:[%s4044_s18 + $0x8a] sm:$0x10] %v2434_v39 }
 0x1d8   : > { %v2507_v16 = vmul.f32 0.6931472, %v3252_v21  ;;  %v3254_v49 = vpop.eup %3253  ;;  %v2264_v7 = vld [vmem:[%s3577_s4 + $0xee] sm:$0x1]  ;;  %v2358_v31 = vmul.f32 1.442695, %v2328_v32  ;;  %v2479_v35 = vadd.f32 %v2463_v17, %v5880_v38 }
 0x1d9   : > { %v2329_v56 = vadd.f32 -1.9806975, %v2313_v4  ;;  %3267 = vlog2.f32 %v2478_v62  ;;  %v3256_v58 = vpop.eup %3255  ;;  %v2406_v51 = vrot.slane %v5473_v40, 4  ;;  %v2509_v53 = vmul.f32 0.6931472, %v3254_v49  ;;  %v5881_v25 = vld [vmem:[#allocation33_spill] sm:$0xff] }
 0x1da   : > { %3269 = vpow2.f32 %v2356_v60  ;;  %v2538_v27 = vmul.f32 0.4, %v2507_v16  ;;  %v2375_v24 = vmul.f32 0.5, %v2263_v20  ;;  %v2511_v0 = vmul.f32 0.6931472, %v3256_v58  ;;  %v5882_v43 = vld [vmem:[#allocation35_spill] sm:$0xff] }
 0x1db   : > { %3271 = vpow2.f32 %v2358_v31  ;;  %v2360_v10 = vmul.f32 1.442695, %v2329_v56  ;;  %v3258_v3 = vpop.eup %3257  ;;  %v2265_v5 = vld [vmem:[%s3577_s4 + $0xfe] sm:$0x1]  ;;  %v2539_v59 = vmul.f32 0.4, %v2509_v53  ;;  %v2464_v23 = vadd.f32 %v5882_v43, %v5881_v25 }
 0x1dc   : > { %v2554_v48 = vadd.f32 -1.9806975, %v2538_v27  ;;  %3273 = vlog2.f32 %v2479_v35  ;;  %v3260_v13 = vpop.eup %3259  ;;  %v2435_v55 = vadd.f32 %v3258_v3, %v2403_v44  ;;  %v2376_v33 = vmul.f32 0.5, %v2264_v7  ;;  %v5883_v61 = vld [vmem:[#allocation32_spill] sm:$0xff]  ;;  %v5884_v63 = vld [vmem:[#allocation38_spill] sm:$0xff]  ;;  %v5886_v2 = vld [vmem:[#allocation43_spill] sm:$0xff] }
 0x1dd   : > { %3275 = vpow2.f32 %v2360_v10  ;;  %v2540_v54 = vmul.f32 0.4, %v2511_v0  ;;  %v2555_v52 = vadd.f32 -1.9806975, %v2539_v59  ;;  %v2513_v46 = vmul.f32 0.6931472, %v3260_v13 }
 0x1de   : > { %v2570_v8 = vmul.f32 1.442695, %v2554_v48  ;;  %v2480_v34 = vadd.f32 %v2464_v23, %v5883_v61  ;;  %2451 = vst [vmem:[%s4044_s18 + $0x9a] sm:$0x10] %v2435_v55  ;;  %v2407_v41 = vrot.slane %v2375_v24, 4  ;;  %v2377_v57 = vmul.f32 0.5, %v2265_v5 }
 0x1df   : > { %v2556_v26 = vadd.f32 -1.9806975, %v2540_v54  ;;  %v5885_v40 = vld [vmem:[#allocation40_spill] sm:$0xff]  ;;  %v3262_v19 = vpop.eup %3261  ;;  %v2490_v6 = vld [vmem:[%s3577_s4 + $0xf] sm:$0x1]  ;;  %v5887_v30 = vld [vmem:[#allocation45_spill] sm:$0xff] }
 0x1e0   : > { %v2465_v9 = vadd.f32 %v5885_v40, %v5884_v63  ;;  %3277 = vpow2.f32 %v2570_v8  ;;  %v2572_v1 = vmul.f32 1.442695, %v2555_v52  ;;  %v2541_v44 = vmul.f32 0.4, %v2513_v46  ;;  %v3264_v37 = vpop.eup %3263  ;;  %v2491_v17 = vld [vmem:[%s3577_s4 + $0x1f] sm:$0x1] }
 0x1e1   : > { %v2466_v47 = vadd.f32 %v5887_v30, %v5886_v2  ;;  %v2436_v36 = vadd.f32 %v3262_v19, %v2404_v15  ;;  %v2408_v45 = vrot.slane %v2376_v33, 4  ;;  %v2574_v29 = vmul.f32 1.442695, %v2556_v26  ;;  %v3266_v50 = vpop.eup %3265  ;;  %v5888_v14 = vld [vmem:[#allocation37_spill] sm:$0xff]  ;;  %v2492_v39 = vld [vmem:[%s3577_s4 + $0x2f] sm:$0x1] }
 0x1e2   : > { %3279 = vlog2.f32 %v2480_v34  ;;  %v2437_v28 = vadd.f32 %v3264_v37, %v2405_v42  ;;  %v2557_v18 = vadd.f32 -1.9806975, %v2541_v44  ;;  %v2481_v22 = vadd.f32 %v2465_v9, %v5888_v14  ;;  %v5889_v11 = vld [vmem:[#allocation42_spill] sm:$0xff]  ;;  %v2493_v7 = vld [vmem:[%s3577_s4 + $0x3f] sm:$0x1]  ;;  %v5892_v0 = vld [vmem:[#allocation47_spill] sm:$0xff] }
 0x1e3   : > { %3281 = vpow2.f32 %v2572_v1  ;;  %v3268_v12 = vpop.eup %3267  ;;  %2452 = vst [vmem:[%s4044_s18 + $0xaa] sm:$0x10] %v2436_v36  ;;  %v2438_v62 = vadd.f32 %v3266_v50, %v2406_v51  ;;  %v2602_v21 = vmul.f32 0.5, %v2490_v6  ;;  %v2482_v15 = vadd.f32 %v2466_v47, %v5889_v11  ;;  %v5890_v31 = vld [vmem:[#allocation48_spill] sm:$0xff]  ;;  %v5891_v56 = vld [vmem:[#allocation50_spill] sm:$0xff]  ;;  %v5893_v5 = vld [vmem:[#allocation53_spill] sm:$0xff] }
 0x1e4   : > { %3283 = vpow2.f32 %v2574_v29  ;;  %v3270_v20 = vpop.eup %3269  ;;  %2453 = vst [vmem:[%s4044_s18 + $0xba] sm:$0x10] %v2437_v28  ;;  %v2409_v32 = vrot.slane %v2377_v57, 4  ;;  %v2576_v4 = vmul.f32 1.442695, %v2557_v18  ;;  %v2603_v49 = vmul.f32 0.5, %v2491_v17 }
 0x1e5   : > { %v2515_v42 = vmul.f32 0.6931472, %v3268_v12  ;;  %3285 = vlog2.f32 %v2481_v22  ;;  %v3272_v60 = vpop.eup %3271  ;;  %2454 = vst [vmem:[%s4044_s18 + $0xca] sm:$0x10] %v2438_v62  ;;  %v2439_v16 = vadd.f32 %v3270_v20, %v2407_v41  ;;  %v2467_v38 = vadd.f32 %v5891_v56, %v5890_v31  ;;  %v5894_v48 = vld [vmem:[#allocation55_spill] sm:$0xff]  ;;  %v5895_v13 = vld [vmem:[#allocation58_spill] sm:$0xff] }
 0x1e6   : > { %3287 = vlog2.f32 %v2482_v15  ;;  %v3274_v35 = vpop.eup %3273  ;;  %v2440_v58 = vadd.f32 %v3272_v60, %v2408_v45  ;;  %v2604_v51 = vmul.f32 0.5, %v2492_v39  ;;  %v2634_v24 = vrot.slane %v2602_v21, 3  ;;  %v5896_v55 = vld [vmem:[#allocation60_spill] sm:$0xff]  ;;  %v5898_v57 = vld [vmem:[#allocation57_spill] sm:$0xff]  ;;  %v5899_v63 = vld [vmem:[#allocation63_spill] sm:$0xff] }
 0x1e7   : > { %3289 = vpow2.f32 %v2576_v4  ;;  %v2542_v27 = vmul.f32 0.4, %v2515_v42  ;;  %v3276_v53 = vpop.eup %3275  ;;  %2455 = vst [vmem:[%s4044_s18 + $0xda] sm:$0x10] %v2439_v16  ;;  %v2517_v10 = vmul.f32 0.6931472, %v3274_v35  ;;  %v2483_v3 = vadd.f32 %v2467_v38, %v5892_v0 }
 0x1e8   : > { %v2468_v59 = vadd.f32 %v5894_v48, %v5893_v5  ;;  %2456 = vst [vmem:[%s4044_s18 + $0xea] sm:$0x10] %v2440_v58  ;;  %v2441_v25 = vadd.f32 %v3276_v53, %v2409_v32  ;;  %v2605_v43 = vmul.f32 0.5, %v2493_v7  ;;  %v2469_v33 = vadd.f32 %v5896_v55, %v5895_v13  ;;  %v5897_v52 = vld [vmem:[#allocation52_spill] sm:$0xff]  ;;  %v5900_v40 = vld [vmem:[#allocation65_spill] sm:$0xff]  ;;  %v5901_v37 = vld [vmem:[#allocation62_spill] sm:$0xff] }
 0x1e9   : > { %v2558_v23 = vadd.f32 -1.9806975, %v2542_v27  ;;  %v2635_v54 = vrot.slane %v2603_v49, 3  ;;  %v2543_v8 = vmul.f32 0.4, %v2517_v10  ;;  %3291 = vlog2.f32 %v2483_v3  ;;  %v5902_v28 = vld [vmem:[#allocation68_spill] sm:$0xff] }
 0x1ea   : > { %v2484_v46 = vadd.f32 %v2468_v59, %v5897_v52  ;;  %v3278_v61 = vpop.eup %3277  ;;  %2457 = vst [vmem:[%s4044_s18 + $0xfa] sm:$0x10] %v2441_v25  ;;  %v2636_v34 = vrot.slane %v2604_v51, 3  ;;  %v2485_v26 = vadd.f32 %v2469_v33, %v5898_v57  ;;  %v2470_v9 = vadd.f32 %v5900_v40, %v5899_v63  ;;  %v2494_v30 = vld [vmem:[%s3577_s4 + $0x4f] sm:$0x1]  ;;  %v5903_v17 = vld [vmem:[#allocation73_spill] sm:$0xff] }
 0x1eb   : > { %v2578_v41 = vmul.f32 1.442695, %v2558_v23  ;;  %v2666_v6 = vadd.f32 %v3278_v61, %v2634_v24  ;;  %v2559_v1 = vadd.f32 -1.9806975, %v2543_v8  ;;  %v2637_v2 = vrot.slane %v2605_v43, 3  ;;  %v5904_v15 = vld [vmem:[#allocation67_spill] sm:$0xff] }
 0x1ec   : > { %v3280_v19 = vpop.eup %3279  ;;  %3293 = vlog2.f32 %v2484_v46  ;;  %v2486_v36 = vadd.f32 %v2470_v9, %v5901_v37  ;;  %v2471_v18 = vadd.f32 %v5903_v17, %v5902_v28  ;;  %v2495_v12 = vld [vmem:[%s3577_s4 + $0x5f] sm:$0x1]  ;;  %v2606_v39 = vmul.f32 0.5, %v2494_v30  ;;  %v5905_v60 = vld [vmem:[#allocation71_spill] sm:$0xff]  ;;  %v5907_v58 = vld [vmem:[#allocation70_spill] sm:$0xff] }
 0x1ed   : > { %v3282_v44 = vpop.eup %3281  ;;  %3295 = vpow2.f32 %v2578_v41  ;;  %v2519_v47 = vmul.f32 0.6931472, %v3280_v19  ;;  %2682 = vst [vmem:[%s4044_s18 + $0xa] sm:$0x20] %v2666_v6  ;;  %v2580_v50 = vmul.f32 1.442695, %v2559_v1 }
 0x1ee   : > { %v3284_v45 = vpop.eup %3283  ;;  %v2667_v29 = vadd.f32 %v3282_v44, %v2635_v54  ;;  %3297 = vlog2.f32 %v2485_v26  ;;  %v2487_v20 = vadd.f32 %v2471_v18, %v5904_v15  ;;  %v5906_v16 = vld [vmem:[#allocation75_spill] sm:$0xff]  ;;  %v2607_v31 = vmul.f32 0.5, %v2495_v12  ;;  %v5908_v10 = vld [vmem:[#allocation78_spill] sm:$0xff]  ;;  %v5909_v0 = vld [vmem:[#allocation80_spill] sm:$0xff] }
 0x1ef   : > { %v3286_v14 = vpop.eup %3285  ;;  %v2668_v22 = vadd.f32 %v3284_v45, %v2636_v34  ;;  %v2544_v62 = vmul.f32 0.4, %v2519_v47  ;;  %3299 = vlog2.f32 %v2486_v36  ;;  %v2472_v49 = vadd.f32 %v5906_v16, %v5905_v60  ;;  %v2496_v5 = vld [vmem:[%s3577_s4 + $0x6f] sm:$0x1]  ;;  %v2497_v23 = vld [vmem:[%s3577_s4 + $0x7f] sm:$0x1] }
 0x1f0   : > { %v3288_v21 = vpop.eup %3287  ;;  %2683 = vst [vmem:[%s4044_s18 + $0x1a] sm:$0x20] %v2667_v29  ;;  %3301 = vpow2.f32 %v2580_v50  ;;  %v2521_v11 = vmul.f32 0.6931472, %v3286_v14  ;;  %v2638_v53 = vrot.slane %v2606_v39, 3  ;;  %v2473_v3 = vadd.f32 %v5909_v0, %v5908_v10  ;;  %v5910_v55 = vld [vmem:[#allocation77_spill] sm:$0xff] }
 0x1f1   : > { %v3290_v32 = vpop.eup %3289  ;;  %2684 = vst [vmem:[%s4044_s18 + $0x2a] sm:$0x20] %v2668_v22  ;;  %v2560_v4 = vadd.f32 -1.9806975, %v2544_v62  ;;  %v2523_v42 = vmul.f32 0.6931472, %v3288_v21  ;;  %3303 = vlog2.f32 %v2487_v20  ;;  %v2488_v51 = vadd.f32 %v2472_v49, %v5907_v58 }
 0x1f2   : > { %v2669_v7 = vadd.f32 %v3290_v32, %v2637_v2  ;;  %v2545_v56 = vmul.f32 0.4, %v2521_v11  ;;  %v2639_v43 = vrot.slane %v2607_v31, 3  ;;  %v2489_v33 = vadd.f32 %v2473_v3, %v5910_v55  ;;  %v2498_v57 = vld [vmem:[%s3577_s4 + $0x8f] sm:$0x1] }
 0x1f3   : > { %v2582_v38 = vmul.f32 1.442695, %v2560_v4  ;;  %v2546_v35 = vmul.f32 0.4, %v2523_v42  ;;  %v3292_v27 = vpop.eup %3291  ;;  %v2608_v41 = vmul.f32 0.5, %v2496_v5  ;;  %v2609_v6 = vmul.f32 0.5, %v2497_v23 }
 0x1f4   : > { %2685 = vst [vmem:[%s4044_s18 + $0x3a] sm:$0x20] %v2669_v7  ;;  %v2561_v24 = vadd.f32 -1.9806975, %v2545_v56  ;;  %v2525_v59 = vmul.f32 0.6931472, %v3292_v27 }
 0x1f5   : > { %3305 = vpow2.f32 %v2582_v38  ;;  %v2562_v48 = vadd.f32 -1.9806975, %v2546_v35  ;;  %v2640_v36 = vrot.slane %v2608_v41, 3  ;;  %v2610_v45 = vmul.f32 0.5, %v2498_v57  ;;  %v2499_v29 = vld [vmem:[%s3577_s4 + $0x9f] sm:$0x1] }
 0x1f6   : > { %v3294_v25 = vpop.eup %3293  ;;  %v2584_v13 = vmul.f32 1.442695, %v2561_v24  ;;  %3307 = vlog2.f32 %v2488_v51  ;;  %v2547_v52 = vmul.f32 0.4, %v2525_v59  ;;  %v2500_v14 = vld [vmem:[%s3577_s4 + $0xaf] sm:$0x1] }
 0x1f7   : > { %v3296_v54 = vpop.eup %3295  ;;  %v2586_v8 = vmul.f32 1.442695, %v2562_v48  ;;  %v2527_v46 = vmul.f32 0.6931472, %v3294_v25  ;;  %v2641_v62 = vrot.slane %v2609_v6, 3  ;;  %v2642_v20 = vrot.slane %v2610_v45, 3 }
 0x1f8   : > { %v3298_v61 = vpop.eup %3297  ;;  %v2670_v34 = vadd.f32 %v3296_v54, %v2638_v53  ;;  %3309 = vpow2.f32 %v2584_v13  ;;  %v2563_v63 = vadd.f32 -1.9806975, %v2547_v52  ;;  %v2611_v32 = vmul.f32 0.5, %v2499_v29  ;;  %v2501_v42 = vld [vmem:[%s3577_s4 + $0xbf] sm:$0x1] }
 0x1f9   : > { %v3300_v26 = vpop.eup %3299  ;;  %3311 = vpow2.f32 %v2586_v8  ;;  %v2548_v40 = vmul.f32 0.4, %v2527_v46  ;;  %v2529_v9 = vmul.f32 0.6931472, %v3298_v61  ;;  %v2612_v7 = vmul.f32 0.5, %v2500_v14 }
 0x1fa   : > { %v3302_v19 = vpop.eup %3301  ;;  %2686 = vst [vmem:[%s4044_s18 + $0x4a] sm:$0x20] %v2670_v34  ;;  %v2531_v1 = vmul.f32 0.6931472, %v3300_v26  ;;  %3313 = vlog2.f32 %v2489_v33  ;;  %v2588_v2 = vmul.f32 1.442695, %v2563_v63 }
 0x1fb   : > { %v2671_v44 = vadd.f32 %v3302_v19, %v2639_v43  ;;  %v2564_v30 = vadd.f32 -1.9806975, %v2548_v40  ;;  %v2549_v47 = vmul.f32 0.4, %v2529_v9  ;;  %v3304_v37 = vpop.eup %3303  ;;  %v2502_v31 = vld [vmem:[%s3577_s4 + $0xcf] sm:$0x1] }
 0x1fc   : > { %v2550_v50 = vmul.f32 0.4, %v2531_v1  ;;  %3315 = vpow2.f32 %v2588_v2  ;;  %v2533_v18 = vmul.f32 0.6931472, %v3304_v37  ;;  %v2643_v53 = vrot.slane %v2611_v32, 3 }
 0x1fd   : > { %2687 = vst [vmem:[%s4044_s18 + $0x5a] sm:$0x20] %v2671_v44  ;;  %v2590_v28 = vmul.f32 1.442695, %v2564_v30  ;;  %v2565_v17 = vadd.f32 -1.9806975, %v2549_v47 }
 0x1fe   : > { %v2566_v22 = vadd.f32 -1.9806975, %v2550_v50  ;;  %v2551_v39 = vmul.f32 0.4, %v2533_v18  ;;  %v2613_v24 = vmul.f32 0.5, %v2501_v42  ;;  %v2614_v0 = vmul.f32 0.5, %v2502_v31 }
 0x1ff   : > { %v3306_v12 = vpop.eup %3305  ;;  %3317 = vpow2.f32 %v2590_v28  ;;  %v2592_v21 = vmul.f32 1.442695, %v2565_v17  ;;  %v2503_v10 = vld [vmem:[%s3577_s4 + $0xdf] sm:$0x1]  ;;  %v2644_v48 = vrot.slane %v2612_v7, 3 }
 0x200   : > { %v3308_v11 = vpop.eup %3307  ;;  %v2672_v15 = vadd.f32 %v3306_v12, %v2640_v36  ;;  %v2594_v4 = vmul.f32 1.442695, %v2566_v22  ;;  %v2567_v60 = vadd.f32 -1.9806975, %v2551_v39  ;;  %v2645_v13 = vrot.slane %v2613_v24, 3 }
 0x201   : > { %3319 = vpow2.f32 %v2592_v21  ;;  %v2535_v16 = vmul.f32 0.6931472, %v3308_v11  ;;  %v2615_v55 = vmul.f32 0.5, %v2503_v10  ;;  %v2646_v54 = vrot.slane %v2614_v0, 3  ;;  %v2504_v8 = vld [vmem:[%s3577_s4 + $0xef] sm:$0x1] }
 0x202   : > { %v3310_v49 = vpop.eup %3309  ;;  %2688 = vst [vmem:[%s4044_s18 + $0x6a] sm:$0x20] %v2672_v15  ;;  %3321 = vpow2.f32 %v2594_v4  ;;  %v2596_v35 = vmul.f32 1.442695, %v2567_v60  ;;  %v2616_v63 = vmul.f32 0.5, %v2504_v8 }
 0x203   : > { %v3312_v56 = vpop.eup %3311  ;;  %v2673_v38 = vadd.f32 %v3310_v49, %v2641_v62  ;;  %v2552_v58 = vmul.f32 0.4, %v2535_v16  ;;  %v2647_v26 = vrot.slane %v2615_v55, 3  ;;  %v2505_v9 = vld [vmem:[%s3577_s4 + $0xff] sm:$0x1] }
 0x204   : > { %v3314_v51 = vpop.eup %3313  ;;  %v2674_v27 = vadd.f32 %v3312_v56, %v2642_v20  ;;  %3323 = vpow2.f32 %v2596_v35  ;;  %v2648_v1 = vrot.slane %v2616_v63, 3  ;;  %v2617_v44 = vmul.f32 0.5, %v2505_v9 }
 0x205   : > { %2689 = vst [vmem:[%s4044_s18 + $0x7a] sm:$0x20] %v2673_v38  ;;  %v2568_v3 = vadd.f32 -1.9806975, %v2552_v58  ;;  %v2537_v5 = vmul.f32 0.6931472, %v3314_v51 }
 0x206   : > { %2690 = vst [vmem:[%s4044_s18 + $0x8a] sm:$0x20] %v2674_v27  ;;  %v3316_v59 = vpop.eup %3315  ;;  %v2649_v47 = vrot.slane %v2617_v44, 3 }
 0x207   : > { %v2598_v25 = vmul.f32 1.442695, %v2568_v3  ;;  %v2553_v43 = vmul.f32 0.4, %v2537_v5  ;;  %v2675_v23 = vadd.f32 %v3316_v59, %v2643_v53 }
 0x209   : > { %v3318_v33 = vpop.eup %3317  ;;  %3325 = vpow2.f32 %v2598_v25  ;;  %v2569_v52 = vadd.f32 -1.9806975, %v2553_v43  ;;  %2691 = vst [vmem:[%s4044_s18 + $0x9a] sm:$0x20] %v2675_v23 }
 0x20a   : > { %v2676_v46 = vadd.f32 %v3318_v33, %v2644_v48 }
 0x20b   : > { %v3320_v61 = vpop.eup %3319  ;;  %v2600_v34 = vmul.f32 1.442695, %v2569_v52 }
 0x20c   : > { %v3322_v41 = vpop.eup %3321  ;;  %2692 = vst [vmem:[%s4044_s18 + $0xaa] sm:$0x20] %v2676_v46  ;;  %v2677_v57 = vadd.f32 %v3320_v61, %v2645_v13 }
 0x20d   : > { %v2678_v40 = vadd.f32 %v3322_v41, %v2646_v54  ;;  %3327 = vpow2.f32 %v2600_v34 }
 0x20e   : > { %2693 = vst [vmem:[%s4044_s18 + $0xba] sm:$0x20] %v2677_v57  ;;  %v3324_v19 = vpop.eup %3323 }
 0x20f   : > { %2694 = vst [vmem:[%s4044_s18 + $0xca] sm:$0x20] %v2678_v40  ;;  %v2679_v6 = vadd.f32 %v3324_v19, %v2647_v26 }
 0x211   : > { %2695 = vst [vmem:[%s4044_s18 + $0xda] sm:$0x20] %v2679_v6 }
 0x213   : > { %v3326_v2 = vpop.eup %3325 }
 0x214   : > { %v2680_v30 = vadd.f32 %v3326_v2, %v2648_v1 }
 0x216   : > { %2696 = vst [vmem:[%s4044_s18 + $0xea] sm:$0x20] %v2680_v30 }
 0x217   : > { %v3328_v37 = vpop.eup %3327 }
 0x218   : > { %v2681_v36 = vadd.f32 %v3328_v37, %v2649_v47 }
 0x21a   : > { %2697 = vst [vmem:[%s4044_s18 + $0xfa] sm:$0x20] %v2681_v36 }
 0x21b   : > { %3372 = shalt.err (!%p3369_p5)
}
 0x21c   : > { %s3373_s17 = scalar_lea.hbm %s5564_s5, 4096  ;;  %s3377_s24 = scalar_lea.hbm %s5617_s1, 8192 }
 0x21d   : > { %p3374_p4 = scmp.ne.s32.totalorder %s5564_s5, %s3373_s17  ;;  %p3378_p12 = scmp.lt.u32.totalorder %s5564_s5, %s5617_s1 }
 0x21e   : > { %p3379_p1 = scmp.lt.u32.totalorder %s3377_s24, %s3373_s17  ;;  %p3381_p8 = scmp.lt.u32.totalorder %s3373_s17, %s5564_s5 }
 0x21f   : > { %p3375_p7 = pnand %p3374_p4, %p5911_p9 }
 0x220   : > { %p3380_p3 = por %p3379_p1, %p3378_p12 }
 0x221   : > { %p3376_p10 = pneg %p3375_p7 }
 0x222   : > { %p3382_p11 = por %p3381_p8, %p3380_p3 }
 0x224   : > { %p3383_p0 = pnand %p3382_p11, %p3376_p10 }
 0x226   : > { %3386 = shalt.err (!%p3383_p0)
}
 0x227   : > { %s3447_s3 = smov 128   ;;  %s3448_s4 = smov 8  }
 0x228   : > { %2817 = dma.vmem_to_hbm [thread:$0]  (%p5911_p9), %s5566_s29, 4096, %s5564_s5, %s2699_s12, %s3447_s3, %s3447_s3, %s3448_s4  }
 0x229 PF: > { %s2728_s18 = sand.u32 1, %s3421_s6   ;;  %p5912_p6 = scmp.ne.s32.totalorder %s5719_s21, 0 }
 0x22a   : > { %p5913_p13 = scmp.ge.s32.totalorder %s3441_s11, 2  ;;  %s2729_s27 = scalar_lea.sflag [#allocation5], %s2728_s18 }
 0x22c   : > { %p2824_p2 = pnand %p5913_p13, %p5912_p6 }
 0x22e   : > { %3416 = dma.done.wait (!%p2824_p2), %s2729_s27, 4096  }
 0x22f   : > { %3418 = vsyncadd (!%p2824_p2), %s2729_s27, 4294963200  ;;  %s17_s11 = sadd.s32 1, %s3441_s11   ;;  %s5914_s6 = smov %s3425_s7 }
 0x230   : > { %p14_p5 = scmp.ge.s32.totalorder %s17_s11, 4   ;;  %s5915_s7 = smov %s3429_s8 }
 0x231   : > { %s5916_s8 = smov %s3515_s20  ;;  %s5917_s9 = smov %s3437_s10 }
 0x232   : > { %s5918_s10 = smov %s5920_s14  ;;  %16 = sbr.rel (!%p14_p5) target bundleno = 6 (0x6), region = 75 }
 0x239   :  { %2734 = vsyncpa [#allocation4], 1 }
 0x23a   :  { %2736 = vsyncpa [#allocation4 + $0x1], 1 }
 0x23b   :  { %2737 = vsyncpa [#allocation5], 1 }
 0x23c   :  { %2739 = vsyncpa [#allocation5 + $0x1], 1 }

</bundles_post_ra>
